<compile_context>
chip_gen: v7x
topology: tpu7x:2x2x1
jax: 0.10.0
libtpu: 0.0.40
codegen_flags: <defaults>
</compile_context>

<pallas_src>
import jax
import jax.numpy as jnp
import numpy as np
from jax import lax
from jax.experimental import pallas as pl
from jax.experimental.pallas import tpu as pltpu


# (kernel_size, stride) per conv layer, matching the PyTorch module.
LAYER_CFG = [(8, 4), (4, 2), (3, 1), (3, 1)]


# ----------------------------------------------------------------------------
# Pallas kernel: single full-K matmul + folded-BN affine + ReLU
# ----------------------------------------------------------------------------
def _fused_matmul_bn_relu_kernel(x_ref, w_ref, sb_ref, o_ref):
    # x_ref: (tm, K) bf16, w_ref: (K, N) bf16, sb_ref: (2, N) f32, o_ref: (tm, N) f32
    acc = jnp.dot(x_ref[...], w_ref[...], preferred_element_type=jnp.float32)
    sb = sb_ref[...]
    y = acc * sb[0:1, :] + sb[1:2, :]
    o_ref[...] = jnp.maximum(y, 0.0).astype(o_ref.dtype)


def _choose_tm(m):
    # Split M into two parallel blocks (keeps v7x's 2nd TensorCore busy) when the
    # split stays aligned to the bf16 sublane tile (16 rows); otherwise one block.
    if m >= 256 and m % 32 == 0:
        return m // 2
    return m


def fused_matmul_bn_relu(patches, w2d, scale_bias):
    """ReLU((patches @ w2d) * scale + bias). patches/w2d bf16, scale_bias f32 (2, N)."""
    m, k = patches.shape
    _, n = w2d.shape
    tm = _choose_tm(m)
    grid = (m // tm,)
    return pl.pallas_call(
        _fused_matmul_bn_relu_kernel,
        out_shape=jax.ShapeDtypeStruct((m, n), jnp.float32),
        grid_spec=pltpu.PrefetchScalarGridSpec(
            num_scalar_prefetch=0,
            grid=grid,
            in_specs=[
                pl.BlockSpec((tm, k), lambda i: (i, 0)),   # M-tiled, full K
                pl.BlockSpec((k, n), lambda i: (0, 0)),    # full weights, resident
                pl.BlockSpec((2, n), lambda i: (0, 0)),    # fused scale/bias
            ],
            out_specs=pl.BlockSpec((tm, n), lambda i: (i, 0)),
        ),
        compiler_params=pltpu.CompilerParams(
            dimension_semantics=("parallel",),
        ),
    )(patches, w2d, scale_bias)


# ----------------------------------------------------------------------------
# Plain-JAX glue: im2col in NHWC (VALID, cross-correlation like PyTorch)
# ----------------------------------------------------------------------------
def im2col_nhwc(x, k, s):
    """x: (N, H, W, C) -> (N*Ho*Wo, k*k*C) with (kh, kw, Cin) feature ordering
    (matches weights reordered to HWIO)."""
    n, h, w, c = x.shape
    ho = (h - k) // s + 1
    wo = (w - k) // s + 1
    cols = []
    for dy in range(k):
        for dx in range(k):
            cols.append(x[:, dy: dy + s * (ho - 1) + 1: s,
                             dx: dx + s * (wo - 1) + 1: s, :])
    p = jnp.concatenate(cols, axis=-1)          # (N, Ho, Wo, k*k*C) -- no transpose
    return p.reshape(n * ho * wo, k * k * c), ho, wo


def conv_bn_relu_block_nhwc(x, lp, k, s):
    """One Conv+BN(eval)+ReLU block. x: NHWC -> NHWC."""
    n = x.shape[0]
    patches, ho, wo = im2col_nhwc(x, k, s)
    patches = patches.astype(jnp.bfloat16)       # MXU-native operand dtype
    y = fused_matmul_bn_relu(patches, lp["w2d"], lp["scale_bias"])
    cout = lp["w2d"].shape[1]
    return y.reshape(n, ho, wo, cout)            # stay NHWC; no per-layer transpose


@jax.jit
def cnn_base_forward(x_nchw, prepped):
    """Full CNNBase.forward (eval mode). x: (N, 3, H, W) -> (N, feature_dim)."""
    x = x_nchw.transpose(0, 2, 3, 1)             # NCHW -> NHWC once at the input
    for lp, (k, s) in zip(prepped, LAYER_CFG):
        x = conv_bn_relu_block_nhwc(x, lp, k, s)
    n = x.shape[0]
    # PyTorch's Flatten sees NCHW: one transpose at the very end, then flatten.
    return x.transpose(0, 3, 1, 2).reshape(n, -1)   # Dropout = identity (eval)


# ----------------------------------------------------------------------------
# One-time parameter preprocessing (weights reordered/bf16, BN folded)
# ----------------------------------------------------------------------------
def prepare_params(params):
    prepped = []
    for p in params:
        w = p["w"]                                           # (Cout, Cin, kh, kw)
        cout = w.shape[0]
        w2d = w.transpose(2, 3, 1, 0).reshape(-1, cout)      # (kh*kw*Cin, Cout), HWIO
        scale = p["gamma"] / jnp.sqrt(p["rvar"] + p["eps"])  # BN scale
        bias = (p["b"] - p["rmean"]) * scale + p["beta"]     # conv bias + BN shift
        prepped.append(dict(
            w2d=w2d.astype(jnp.bfloat16),
            scale_bias=jnp.stack([scale, bias]).astype(jnp.float32),  # (2, Cout)
        ))
    return prepped


# ----------------------------------------------------------------------------
# Deterministic synthetic parameters
# ----------------------------------------------------------------------------
def make_params(key, input_channels=3):
    layer_defs = [
        (input_channels, 32, 8),
        (32, 64, 4),
        (64, 128, 3),
        (128, 256, 3),
    ]
    params = []
    for cin, cout, k in layer_defs:
        key, kw, kb, kg, kbe, km, kv = jax.random.split(key, 7)
        params.append(dict(
            w=jax.random.normal(kw, (cout, cin, k, k), jnp.float32) * 0.05,
            b=jax.random.normal(kb, (cout,), jnp.float32) * 0.01,
            gamma=1.0 + 0.1 * jax.random.normal(kg, (cout,), jnp.float32),
            beta=0.1 * jax.random.normal(kbe, (cout,), jnp.float32),
            rmean=0.05 * jax.random.normal(km, (cout,), jnp.float32),
            rvar=1.0 + 0.1 * jax.random.uniform(kv, (cout,), jnp.float32),
            eps=1e-5,
        ))
    return params


# ----------------------------------------------------------------------------
# Pure-JAX f32 reference (lax conv) for correctness check
# ----------------------------------------------------------------------------
def reference_forward(x, params):
    for p, (k, s) in zip(params, LAYER_CFG):
        y = lax.conv_general_dilated(
            x, p["w"], window_strides=(s, s), padding="VALID",
            dimension_numbers=("NCHW", "OIHW", "NCHW"))
        y = y + p["b"][None, :, None, None]
        scale = p["gamma"] / jnp.sqrt(p["rvar"] + p["eps"])
        y = (y - p["rmean"][None, :, None, None]) * scale[None, :, None, None] \
            + p["beta"][None, :, None, None]
        x = jnp.maximum(y, 0.0)
    return x.reshape(x.shape[0], -1)


if __name__ == "__main__":
    key = jax.random.PRNGKey(0)
    kx, kp = jax.random.split(key)

    # Canonical module input size: batch=2, 3 channels, 84x84 (feature_dim = 6400).
    x = jax.random.uniform(kx, (2, 3, 84, 84), jnp.float32)
    params = make_params(kp)
    prepped = prepare_params(params)     # one-time weight prep, outside the forward

    out = jax.block_until_ready(cnn_base_forward(x, prepped))
    assert out.shape == (2, 6400), out.shape

    ref = jax.block_until_ready(reference_forward(x, params))
    # bf16 MXU operands (f32 accumulation) give ~1e-2-level relative error vs f32.
    np.testing.assert_allclose(np.asarray(out), np.asarray(ref), rtol=2e-2, atol=2e-2)

    print("KERNEL_OK")
</pallas_src>

<mosaic_0001>
module attributes {stable_mosaic.version = 11 : i64} {
  func.func @_fused_matmul_bn_relu_kernel(%arg0: i32, %arg1: memref<400x192xbf16, #tpu.memory_space<vmem>>, %arg2: memref<192x32xbf16, #tpu.memory_space<vmem>>, %arg3: memref<2x32xf32, #tpu.memory_space<vmem>>, %arg4: memref<400x32xf32, #tpu.memory_space<vmem>>) attributes {dimension_semantics = [#tpu.dimension_semantics<parallel>], iteration_bounds = array<i64: 2>, scalar_prefetch = 0 : i64, scratch_operands = 0 : i64, tpu.core_type = #tpu.core_type<tc>, window_params = [{transform_indices = @transform_0, window_bounds = array<i64: 400, 192>}, {pipeline_mode = #tpu.pipeline_mode<synchronous>, transform_indices = @transform_1, window_bounds = array<i64: 192, 32>}, {pipeline_mode = #tpu.pipeline_mode<synchronous>, transform_indices = @transform_2, window_bounds = array<i64: 2, 32>}, {transform_indices = @transform_3, window_bounds = array<i64: 400, 32>}]} {
    %c0 = arith.constant 0 : index
    %c0_0 = arith.constant 0 : index
    %0 = vector.load %arg1[%c0, %c0_0] : memref<400x192xbf16, #tpu.memory_space<vmem>>, vector<400x192xbf16>
    %c0_1 = arith.constant 0 : index
    %c0_2 = arith.constant 0 : index
    %1 = vector.load %arg2[%c0_1, %c0_2] : memref<192x32xbf16, #tpu.memory_space<vmem>>, vector<192x32xbf16>
    %cst = arith.constant dense<0.000000e+00> : vector<400x32xf32>
    %2 = tpu.matmul %0, %1, %cst {dimension_numbers = #tpu.dot_dimension_numbers<[1], [0], [0], [1], [0, 0, 1, 1], [], []>} : vector<400x192xbf16>, vector<192x32xbf16>, vector<400x32xf32> -> vector<400x32xf32>
    %c0_3 = arith.constant 0 : index
    %c0_4 = arith.constant 0 : index
    %3 = vector.load %arg3[%c0_3, %c0_4] : memref<2x32xf32, #tpu.memory_space<vmem>>, vector<2x32xf32>
    %4 = vector.extract_strided_slice %3 {offsets = [0, 0], sizes = [1, 32], strides = [1, 1]} : vector<2x32xf32> to vector<1x32xf32>
    %5 = vector.broadcast %4 : vector<1x32xf32> to vector<400x32xf32>
    %6 = arith.mulf %2, %5 : vector<400x32xf32>
    %7 = vector.extract_strided_slice %3 {offsets = [1, 0], sizes = [1, 32], strides = [1, 1]} : vector<2x32xf32> to vector<1x32xf32>
    %8 = vector.broadcast %7 : vector<1x32xf32> to vector<400x32xf32>
    %9 = arith.addf %6, %8 : vector<400x32xf32>
    %cst_5 = arith.constant 0.000000e+00 : f32
    %10 = vector.broadcast %cst_5 : f32 to vector<400x32xf32>
    %11 = arith.maximumf %9, %10 : vector<400x32xf32>
    %c0_6 = arith.constant 0 : index
    %c0_7 = arith.constant 0 : index
    %12 = vector.load %arg4[%c0_6, %c0_7] : memref<400x32xf32, #tpu.memory_space<vmem>>, vector<400x32xf32>
    tpu.vector_store %arg4[%c0_6, %c0_7], %11 {strides = array<i32>} : memref<400x32xf32, #tpu.memory_space<vmem>>, vector<400x32xf32>,
    return
  }
  func.func @transform_0(%arg0: i32) -> (i32, i32) {
    %c0_i32 = arith.constant 0 : i32
    %c0_i32_0 = arith.constant 0 : i32
    return %arg0, %c0_i32 : i32, i32
  }
  func.func @transform_1(%arg0: i32) -> (i32, i32) {
    %c0_i32 = arith.constant 0 : i32
    %c0_i32_0 = arith.constant 0 : i32
    %c0_i32_1 = arith.constant 0 : i32
    return %c0_i32, %c0_i32_0 : i32, i32
  }
  func.func @transform_2(%arg0: i32) -> (i32, i32) {
    %c0_i32 = arith.constant 0 : i32
    %c0_i32_0 = arith.constant 0 : i32
    %c0_i32_1 = arith.constant 0 : i32
    return %c0_i32, %c0_i32_0 : i32, i32
  }
  func.func @transform_3(%arg0: i32) -> (i32, i32) {
    %c0_i32 = arith.constant 0 : i32
    %c0_i32_0 = arith.constant 0 : i32
    return %arg0, %c0_i32 : i32, i32
  }
}

module attributes {stable_mosaic.version = 11 : i64} {
  func.func @_fused_matmul_bn_relu_kernel(%arg0: i32, %arg1: memref<162x512xbf16, #tpu.memory_space<vmem>>, %arg2: memref<512x64xbf16, #tpu.memory_space<vmem>>, %arg3: memref<2x64xf32, #tpu.memory_space<vmem>>, %arg4: memref<162x64xf32, #tpu.memory_space<vmem>>) attributes {dimension_semantics = [#tpu.dimension_semantics<parallel>], iteration_bounds = array<i64: 1>, scalar_prefetch = 0 : i64, scratch_operands = 0 : i64, tpu.core_type = #tpu.core_type<tc>, window_params = [{transform_indices = @transform_0, window_bounds = array<i64: 162, 512>}, {pipeline_mode = #tpu.pipeline_mode<synchronous>, transform_indices = @transform_1, window_bounds = array<i64: 512, 64>}, {pipeline_mode = #tpu.pipeline_mode<synchronous>, transform_indices = @transform_2, window_bounds = array<i64: 2, 64>}, {transform_indices = @transform_3, window_bounds = array<i64: 162, 64>}]} {
    %c0 = arith.constant 0 : index
    %c0_0 = arith.constant 0 : index
    %0 = vector.load %arg1[%c0, %c0_0] : memref<162x512xbf16, #tpu.memory_space<vmem>>, vector<162x512xbf16>
    %c0_1 = arith.constant 0 : index
    %c0_2 = arith.constant 0 : index
    %1 = vector.load %arg2[%c0_1, %c0_2] : memref<512x64xbf16, #tpu.memory_space<vmem>>, vector<512x64xbf16>
    %cst = arith.constant dense<0.000000e+00> : vector<162x64xf32>
    %2 = tpu.matmul %0, %1, %cst {dimension_numbers = #tpu.dot_dimension_numbers<[1], [0], [0], [1], [0, 0, 1, 1], [], []>} : vector<162x512xbf16>, vector<512x64xbf16>, vector<162x64xf32> -> vector<162x64xf32>
    %c0_3 = arith.constant 0 : index
    %c0_4 = arith.constant 0 : index
    %3 = vector.load %arg3[%c0_3, %c0_4] : memref<2x64xf32, #tpu.memory_space<vmem>>, vector<2x64xf32>
    %4 = vector.extract_strided_slice %3 {offsets = [0, 0], sizes = [1, 64], strides = [1, 1]} : vector<2x64xf32> to vector<1x64xf32>
    %5 = vector.broadcast %4 : vector<1x64xf32> to vector<162x64xf32>
    %6 = arith.mulf %2, %5 : vector<162x64xf32>
    %7 = vector.extract_strided_slice %3 {offsets = [1, 0], sizes = [1, 64], strides = [1, 1]} : vector<2x64xf32> to vector<1x64xf32>
    %8 = vector.broadcast %7 : vector<1x64xf32> to vector<162x64xf32>
    %9 = arith.addf %6, %8 : vector<162x64xf32>
    %cst_5 = arith.constant 0.000000e+00 : f32
    %10 = vector.broadcast %cst_5 : f32 to vector<162x64xf32>
    %11 = arith.maximumf %9, %10 : vector<162x64xf32>
    %c0_6 = arith.constant 0 : index
    %c0_7 = arith.constant 0 : index
    %12 = vector.load %arg4[%c0_6, %c0_7] : memref<162x64xf32, #tpu.memory_space<vmem>>, vector<162x64xf32>
    tpu.vector_store %arg4[%c0_6, %c0_7], %11 {strides = array<i32>} : memref<162x64xf32, #tpu.memory_space<vmem>>, vector<162x64xf32>,
    return
  }
  func.func @transform_0(%arg0: i32) -> (i32, i32) {
    %c0_i32 = arith.constant 0 : i32
    %c0_i32_0 = arith.constant 0 : i32
    return %arg0, %c0_i32 : i32, i32
  }
  func.func @transform_1(%arg0: i32) -> (i32, i32) {
    %c0_i32 = arith.constant 0 : i32
    %c0_i32_0 = arith.constant 0 : i32
    %c0_i32_1 = arith.constant 0 : i32
    return %c0_i32, %c0_i32_0 : i32, i32
  }
  func.func @transform_2(%arg0: i32) -> (i32, i32) {
    %c0_i32 = arith.constant 0 : i32
    %c0_i32_0 = arith.constant 0 : i32
    %c0_i32_1 = arith.constant 0 : i32
    return %c0_i32, %c0_i32_0 : i32, i32
  }
  func.func @transform_3(%arg0: i32) -> (i32, i32) {
    %c0_i32 = arith.constant 0 : i32
    %c0_i32_0 = arith.constant 0 : i32
    return %arg0, %c0_i32 : i32, i32
  }
}

module attributes {stable_mosaic.version = 11 : i64} {
  func.func @_fused_matmul_bn_relu_kernel(%arg0: i32, %arg1: memref<98x576xbf16, #tpu.memory_space<vmem>>, %arg2: memref<576x128xbf16, #tpu.memory_space<vmem>>, %arg3: memref<2x128xf32, #tpu.memory_space<vmem>>, %arg4: memref<98x128xf32, #tpu.memory_space<vmem>>) attributes {dimension_semantics = [#tpu.dimension_semantics<parallel>], iteration_bounds = array<i64: 1>, scalar_prefetch = 0 : i64, scratch_operands = 0 : i64, tpu.core_type = #tpu.core_type<tc>, window_params = [{transform_indices = @transform_0, window_bounds = array<i64: 98, 576>}, {pipeline_mode = #tpu.pipeline_mode<synchronous>, transform_indices = @transform_1, window_bounds = array<i64: 576, 128>}, {pipeline_mode = #tpu.pipeline_mode<synchronous>, transform_indices = @transform_2, window_bounds = array<i64: 2, 128>}, {transform_indices = @transform_3, window_bounds = array<i64: 98, 128>}]} {
    %c0 = arith.constant 0 : index
    %c0_0 = arith.constant 0 : index
    %0 = vector.load %arg1[%c0, %c0_0] : memref<98x576xbf16, #tpu.memory_space<vmem>>, vector<98x576xbf16>
    %c0_1 = arith.constant 0 : index
    %c0_2 = arith.constant 0 : index
    %1 = vector.load %arg2[%c0_1, %c0_2] : memref<576x128xbf16, #tpu.memory_space<vmem>>, vector<576x128xbf16>
    %cst = arith.constant dense<0.000000e+00> : vector<98x128xf32>
    %2 = tpu.matmul %0, %1, %cst {dimension_numbers = #tpu.dot_dimension_numbers<[1], [0], [0], [1], [0, 0, 1, 1], [], []>} : vector<98x576xbf16>, vector<576x128xbf16>, vector<98x128xf32> -> vector<98x128xf32>
    %c0_3 = arith.constant 0 : index
    %c0_4 = arith.constant 0 : index
    %3 = vector.load %arg3[%c0_3, %c0_4] : memref<2x128xf32, #tpu.memory_space<vmem>>, vector<2x128xf32>
    %4 = vector.extract_strided_slice %3 {offsets = [0, 0], sizes = [1, 128], strides = [1, 1]} : vector<2x128xf32> to vector<1x128xf32>
    %5 = vector.broadcast %4 : vector<1x128xf32> to vector<98x128xf32>
    %6 = arith.mulf %2, %5 : vector<98x128xf32>
    %7 = vector.extract_strided_slice %3 {offsets = [1, 0], sizes = [1, 128], strides = [1, 1]} : vector<2x128xf32> to vector<1x128xf32>
    %8 = vector.broadcast %7 : vector<1x128xf32> to vector<98x128xf32>
    %9 = arith.addf %6, %8 : vector<98x128xf32>
    %cst_5 = arith.constant 0.000000e+00 : f32
    %10 = vector.broadcast %cst_5 : f32 to vector<98x128xf32>
    %11 = arith.maximumf %9, %10 : vector<98x128xf32>
    %c0_6 = arith.constant 0 : index
    %c0_7 = arith.constant 0 : index
    %12 = vector.load %arg4[%c0_6, %c0_7] : memref<98x128xf32, #tpu.memory_space<vmem>>, vector<98x128xf32>
    tpu.vector_store %arg4[%c0_6, %c0_7], %11 {strides = array<i32>} : memref<98x128xf32, #tpu.memory_space<vmem>>, vector<98x128xf32>,
    return
  }
  func.func @transform_0(%arg0: i32) -> (i32, i32) {
    %c0_i32 = arith.constant 0 : i32
    %c0_i32_0 = arith.constant 0 : i32
    return %arg0, %c0_i32 : i32, i32
  }
  func.func @transform_1(%arg0: i32) -> (i32, i32) {
    %c0_i32 = arith.constant 0 : i32
    %c0_i32_0 = arith.constant 0 : i32
    %c0_i32_1 = arith.constant 0 : i32
    return %c0_i32, %c0_i32_0 : i32, i32
  }
  func.func @transform_2(%arg0: i32) -> (i32, i32) {
    %c0_i32 = arith.constant 0 : i32
    %c0_i32_0 = arith.constant 0 : i32
    %c0_i32_1 = arith.constant 0 : i32
    return %c0_i32, %c0_i32_0 : i32, i32
  }
  func.func @transform_3(%arg0: i32) -> (i32, i32) {
    %c0_i32 = arith.constant 0 : i32
    %c0_i32_0 = arith.constant 0 : i32
    return %arg0, %c0_i32 : i32, i32
  }
}

module attributes {stable_mosaic.version = 11 : i64} {
  func.func @_fused_matmul_bn_relu_kernel(%arg0: i32, %arg1: memref<50x1152xbf16, #tpu.memory_space<vmem>>, %arg2: memref<1152x256xbf16, #tpu.memory_space<vmem>>, %arg3: memref<2x256xf32, #tpu.memory_space<vmem>>, %arg4: memref<50x256xf32, #tpu.memory_space<vmem>>) attributes {dimension_semantics = [#tpu.dimension_semantics<parallel>], iteration_bounds = array<i64: 1>, scalar_prefetch = 0 : i64, scratch_operands = 0 : i64, tpu.core_type = #tpu.core_type<tc>, window_params = [{transform_indices = @transform_0, window_bounds = array<i64: 50, 1152>}, {pipeline_mode = #tpu.pipeline_mode<synchronous>, transform_indices = @transform_1, window_bounds = array<i64: 1152, 256>}, {pipeline_mode = #tpu.pipeline_mode<synchronous>, transform_indices = @transform_2, window_bounds = array<i64: 2, 256>}, {transform_indices = @transform_3, window_bounds = array<i64: 50, 256>}]} {
    %c0 = arith.constant 0 : index
    %c0_0 = arith.constant 0 : index
    %0 = vector.load %arg1[%c0, %c0_0] : memref<50x1152xbf16, #tpu.memory_space<vmem>>, vector<50x1152xbf16>
    %c0_1 = arith.constant 0 : index
    %c0_2 = arith.constant 0 : index
    %1 = vector.load %arg2[%c0_1, %c0_2] : memref<1152x256xbf16, #tpu.memory_space<vmem>>, vector<1152x256xbf16>
    %cst = arith.constant dense<0.000000e+00> : vector<50x256xf32>
    %2 = tpu.matmul %0, %1, %cst {dimension_numbers = #tpu.dot_dimension_numbers<[1], [0], [0], [1], [0, 0, 1, 1], [], []>} : vector<50x1152xbf16>, vector<1152x256xbf16>, vector<50x256xf32> -> vector<50x256xf32>
    %c0_3 = arith.constant 0 : index
    %c0_4 = arith.constant 0 : index
    %3 = vector.load %arg3[%c0_3, %c0_4] : memref<2x256xf32, #tpu.memory_space<vmem>>, vector<2x256xf32>
    %4 = vector.extract_strided_slice %3 {offsets = [0, 0], sizes = [1, 256], strides = [1, 1]} : vector<2x256xf32> to vector<1x256xf32>
    %5 = vector.broadcast %4 : vector<1x256xf32> to vector<50x256xf32>
    %6 = arith.mulf %2, %5 : vector<50x256xf32>
    %7 = vector.extract_strided_slice %3 {offsets = [1, 0], sizes = [1, 256], strides = [1, 1]} : vector<2x256xf32> to vector<1x256xf32>
    %8 = vector.broadcast %7 : vector<1x256xf32> to vector<50x256xf32>
    %9 = arith.addf %6, %8 : vector<50x256xf32>
    %cst_5 = arith.constant 0.000000e+00 : f32
    %10 = vector.broadcast %cst_5 : f32 to vector<50x256xf32>
    %11 = arith.maximumf %9, %10 : vector<50x256xf32>
    %c0_6 = arith.constant 0 : index
    %c0_7 = arith.constant 0 : index
    %12 = vector.load %arg4[%c0_6, %c0_7] : memref<50x256xf32, #tpu.memory_space<vmem>>, vector<50x256xf32>
    tpu.vector_store %arg4[%c0_6, %c0_7], %11 {strides = array<i32>} : memref<50x256xf32, #tpu.memory_space<vmem>>, vector<50x256xf32>,
    return
  }
  func.func @transform_0(%arg0: i32) -> (i32, i32) {
    %c0_i32 = arith.constant 0 : i32
    %c0_i32_0 = arith.constant 0 : i32
    return %arg0, %c0_i32 : i32, i32
  }
  func.func @transform_1(%arg0: i32) -> (i32, i32) {
    %c0_i32 = arith.constant 0 : i32
    %c0_i32_0 = arith.constant 0 : i32
    %c0_i32_1 = arith.constant 0 : i32
    return %c0_i32, %c0_i32_0 : i32, i32
  }
  func.func @transform_2(%arg0: i32) -> (i32, i32) {
    %c0_i32 = arith.constant 0 : i32
    %c0_i32_0 = arith.constant 0 : i32
    %c0_i32_1 = arith.constant 0 : i32
    return %c0_i32, %c0_i32_0 : i32, i32
  }
  func.func @transform_3(%arg0: i32) -> (i32, i32) {
    %c0_i32 = arith.constant 0 : i32
    %c0_i32_0 = arith.constant 0 : i32
    return %arg0, %c0_i32 : i32, i32
  }
}

</mosaic_0001>

<bundles_post_ra>
// kernel: cnn_base_forward.4
= control target key start
LH: loop header
LB: loop body
LE: loop exit
PB: predicated region body
PF: predicated region fallthrough
CT: control target
= control target key end

     0   :  { %s1371_s12 = smov 0   ;;  %s1741_s0 = inlined_call_operand.vmem [shape: bf16[800,192], index: 0, kind: input, shape index: {}]   ;;  %s1742_s1 = inlined_call_operand.vmem [shape: bf16[192,32], index: 1, kind: input, shape index: {}]   ;;  %s1743_s2 = inlined_call_operand.vmem [shape: f32[2,32], index: 2, kind: input, shape index: {}]   ;;  %s1744_s3 = inlined_call_operand.vmem [shape: f32[800,32], index: 3, kind: output, shape index: {}]  }
   0x1 LB: > { %s1124_s13 = sadd.s32 4294967295, %s1348_s12   ;;  %p1128_p0 = scmp.ge.s32.totalorder %s1348_s12, 1  ;;  %s1348_s12 = sphi %s1371_s12, %s13_s12  }
   0x2   : > { %p139_p1 = scmp.lt.s32.totalorder %s1348_s12, 3 }
   0x4   : > { %p140_p2 = pnand %p1128_p0, %p139_p1 }
   0x5   : > { %v1255_v0 = vld [vmem:[%s1742_s1] sm:$0xff] (!%p140_p2)   ;;  %v1350_v1 = vmov (!%p140_p2), 0   ;;  %s164_s16 = smul.u32 (!%p140_p2), 50, %s1124_s13  ;;  %v1256_v2 = vld [vmem:[%s1742_s1 + $0x8] sm:$0xff] (!%p140_p2)   ;;  %v1257_v3 = vld [vmem:[%s1742_s1 + $0x10] sm:$0xff] (!%p140_p2)   ;;  %vm549_vm0 = vcmask (!%p140_p2), 523264   ;;  %v859_v63 = vlaneseq (!%p140_p2) }
   0x6   : > { %143 = sbr.rel (%p140_p2) target bundleno = 371 (0x173), region = 32  ;;  %625 = vmatprep.subr.bf16.mxu0 (!%p140_p2), %v1350_v1  ;;  %1222 = vmatprep.subr.bf16.mxu1 (!%p140_p2), %v1350_v1  ;;  %v1258_v4 = vld [vmem:[%s1742_s1 + $0x18] sm:$0xff] (!%p140_p2)   ;;  %v1259_v6 = vld [vmem:[%s1742_s1 + $0x20] sm:$0xff] (!%p140_p2)   ;;  %v1260_v8 = vld [vmem:[%s1742_s1 + $0x28] sm:$0xff] (!%p140_p2)   ;;  %vm1017_vm1 = vcmask (!%p140_p2), 261120  }
   0x7   : > { %626 = vmatpush1.bf16.msra.mxu0 (!%p140_p2), %v1255_v0  ;;  %1234 = vmatpush1.bf16.msra.mxu1 (!%p140_p2), %v1255_v0  ;;  %p165_p3 = scmp.lt.s32.totalorder (!%p140_p2), %s164_s16, 99  ;;  %v1261_v9 = vld [vmem:[%s1742_s1 + $0x30] sm:$0xff] (!%p140_p2)   ;;  %v1262_v10 = vld [vmem:[%s1742_s1 + $0x38] sm:$0xff] (!%p140_p2)   ;;  %v1263_v11 = vld [vmem:[%s1742_s1 + $0x40] sm:$0xff] (!%p140_p2)   ;;  %v860_v0 = vshrl.u32 (!%p140_p2), %v859_v63, 7 }
   0x8   : > { %627 = vmatprep.subr.bf16.mxu0 (!%p140_p2), %v1350_v1  ;;  %1223 = vmatprep.subr.bf16.mxu1 (!%p140_p2), %v1350_v1  ;;  %v1264_v12 = vld [vmem:[%s1742_s1 + $0x48] sm:$0xff] (!%p140_p2)   ;;  %v1265_v13 = vld [vmem:[%s1742_s1 + $0x50] sm:$0xff] (!%p140_p2)   ;;  %v1266_v14 = vld [vmem:[%s1742_s1 + $0x58] sm:$0xff] (!%p140_p2)  }
   0xb   : > { %628 = vmatpush1.bf16.msra.mxu0 (!%p140_p2), %v1256_v2  ;;  %1235 = vmatpush1.bf16.msra.mxu1 (!%p140_p2), %v1256_v2  ;;  %v858_v2 = vld [vmem:[%s1743_s2] sm:$0x3] (!%p140_p2) }
   0xc   : > { %629 = vmatprep.subr.bf16.mxu0 (!%p140_p2), %v1350_v1  ;;  %1224 = vmatprep.subr.bf16.mxu1 (!%p140_p2), %v1350_v1 }
   0xd   : > { %s1746_s16 = smov (!%p165_p3, %s164_s16), 99 }
   0xe   : > { %s1221_s21 = sshll.u32 %s1746_s16, 3 }
   0xf   : > { %630 = vmatpush1.bf16.msra.mxu0 %v1257_v3  ;;  %1236 = vmatpush1.bf16.msra.mxu1 %v1257_v3  ;;  %s1405_s26 = scalar_lea.vmem %s1741_s0, %s1221_s21  ;;  %v915_v3 = vsub.s32 1, %v860_v0  ;;  %s1542_s23 = scalar_lea.vmem %s1744_s3, %s1221_s21 }
  0x10   : > { %631 = vmatprep.subr.bf16.mxu0 %v1350_v1  ;;  %1225 = vmatprep.subr.bf16.mxu1 %v1350_v1  ;;  %v1269_v5 = vld [vmem:[%s1405_s26 + $0x4] ss:$8 sps:$4 sm:$0xff]   ;;  %v1272_v7 = vld [vmem:[%s1405_s26 + $0xd4] ss:$8 sps:$4 sm:$0xff]   ;;  %v1267_v15 = vld [vmem:[%s1405_s26] ss:$8 sps:$4 sm:$0xff]  }
  0x11   : > { %1194 = vmatprep.mubr.msk.bf16.mxu0 %vm549_vm0, %v1269_v5  ;;  %1207 = vmatprep.mubr.msk.bf16.mxu1 %vm549_vm0, %v1272_v7  ;;  %v1270_v16 = vld [vmem:[%s1405_s26 + $0xd0] ss:$8 sps:$4 sm:$0xff]   ;;  %v1273_v17 = vld [vmem:[%s1405_s26 + $0x14] ss:$8 sps:$4 sm:$0xff]   ;;  %v1276_v18 = vld [vmem:[%s1405_s26 + $0xe4] ss:$8 sps:$4 sm:$0xff]   ;;  %v1529_v5 = vrot.slane %v858_v2, %v915_v3 }
  0x12   : > { %v1275_v19 = vld [vmem:[%s1405_s26 + $0x10] ss:$8 sps:$4 sm:$0xff]   ;;  %v1278_v20 = vld [vmem:[%s1405_s26 + $0xe0] ss:$8 sps:$4 sm:$0xff]   ;;  %v1279_v21 = vld [vmem:[%s1405_s26 + $0x24] ss:$8 sps:$4 sm:$0xff]  }
  0x13   : > { %632 = vmatpush1.bf16.msra.mxu0 %v1258_v4  ;;  %1237 = vmatpush1.bf16.msra.mxu1 %v1258_v4  ;;  %v1282_v22 = vld [vmem:[%s1405_s26 + $0xf4] ss:$8 sps:$4 sm:$0xff]   ;;  %v1281_v23 = vld [vmem:[%s1405_s26 + $0x20] ss:$8 sps:$4 sm:$0xff]   ;;  %v1284_v24 = vld [vmem:[%s1405_s26 + $0xf0] ss:$8 sps:$4 sm:$0xff]  }
  0x14   : > { %633 = vmatprep.subr.bf16.mxu0 %v1350_v1  ;;  %1226 = vmatprep.subr.bf16.mxu1 %v1350_v1  ;;  %v1285_v25 = vld [vmem:[%s1405_s26 + $0x34] ss:$8 sps:$4 sm:$0xff]   ;;  %v1288_v26 = vld [vmem:[%s1405_s26 + $0x104] ss:$8 sps:$4 sm:$0xff]   ;;  %v1287_v27 = vld [vmem:[%s1405_s26 + $0x30] ss:$8 sps:$4 sm:$0xff]  }
  0x15   : > { %v1290_v28 = vld [vmem:[%s1405_s26 + $0x100] ss:$8 sps:$4 sm:$0xff]   ;;  %v1291_v29 = vld [vmem:[%s1405_s26 + $0x44] ss:$8 sps:$4 sm:$0xff]   ;;  %v1294_v30 = vld [vmem:[%s1405_s26 + $0x114] ss:$8 sps:$4 sm:$0xff]  }
  0x16   : > { %v1293_v31 = vld [vmem:[%s1405_s26 + $0x40] ss:$8 sps:$4 sm:$0xff]   ;;  %v1296_v32 = vld [vmem:[%s1405_s26 + $0x110] ss:$8 sps:$4 sm:$0xff]   ;;  %v1297_v33 = vld [vmem:[%s1405_s26 + $0x54] ss:$8 sps:$4 sm:$0xff]  }
  0x17   : > { %634 = vmatpush1.bf16.msra.mxu0 %v1259_v6  ;;  %1238 = vmatpush1.bf16.msra.mxu1 %v1259_v6  ;;  %v1300_v34 = vld [vmem:[%s1405_s26 + $0x124] ss:$8 sps:$4 sm:$0xff]   ;;  %v1299_v35 = vld [vmem:[%s1405_s26 + $0x50] ss:$8 sps:$4 sm:$0xff]   ;;  %v1302_v36 = vld [vmem:[%s1405_s26 + $0x120] ss:$8 sps:$4 sm:$0xff]  }
  0x18   : > { %635 = vmatprep.subr.bf16.mxu0 %v1350_v1  ;;  %1227 = vmatprep.subr.bf16.mxu1 %v1350_v1  ;;  %v1303_v37 = vld [vmem:[%s1405_s26 + $0x64] ss:$8 sps:$4 sm:$0xff]   ;;  %v1306_v38 = vld [vmem:[%s1405_s26 + $0x134] ss:$8 sps:$4 sm:$0xff]   ;;  %v1305_v39 = vld [vmem:[%s1405_s26 + $0x60] ss:$8 sps:$4 sm:$0xff]  }
  0x19   : > { %v1308_v40 = vld [vmem:[%s1405_s26 + $0x130] ss:$8 sps:$4 sm:$0xff]   ;;  %v1309_v41 = vld [vmem:[%s1405_s26 + $0x74] ss:$8 sps:$4 sm:$0xff]   ;;  %v1312_v42 = vld [vmem:[%s1405_s26 + $0x144] ss:$8 sps:$4 sm:$0xff]  }
  0x1a   : > { %v1311_v43 = vld [vmem:[%s1405_s26 + $0x70] ss:$8 sps:$4 sm:$0xff]   ;;  %v1314_v44 = vld [vmem:[%s1405_s26 + $0x140] ss:$8 sps:$4 sm:$0xff]   ;;  %v1315_v45 = vld [vmem:[%s1405_s26 + $0x84] ss:$8 sps:$4 sm:$0xff]  }
  0x1b   : > { %636 = vmatpush1.bf16.msra.mxu0 %v1260_v8  ;;  %1239 = vmatpush1.bf16.msra.mxu1 %v1260_v8  ;;  %v1318_v46 = vld [vmem:[%s1405_s26 + $0x154] ss:$8 sps:$4 sm:$0xff]   ;;  %v1317_v47 = vld [vmem:[%s1405_s26 + $0x80] ss:$8 sps:$4 sm:$0xff]   ;;  %v1320_v48 = vld [vmem:[%s1405_s26 + $0x150] ss:$8 sps:$4 sm:$0xff]  }
  0x1c   : > { %637 = vmatprep.subr.bf16.mxu0 %v1350_v1  ;;  %1228 = vmatprep.subr.bf16.mxu1 %v1350_v1  ;;  %v1321_v49 = vld [vmem:[%s1405_s26 + $0x94] ss:$8 sps:$4 sm:$0xff]   ;;  %v1324_v50 = vld [vmem:[%s1405_s26 + $0x164] ss:$8 sps:$4 sm:$0xff]   ;;  %v1323_v51 = vld [vmem:[%s1405_s26 + $0x90] ss:$8 sps:$4 sm:$0xff]  }
  0x1d   : > { %v1326_v52 = vld [vmem:[%s1405_s26 + $0x160] ss:$8 sps:$4 sm:$0xff]   ;;  %v1327_v53 = vld [vmem:[%s1405_s26 + $0xa4] ss:$8 sps:$4 sm:$0xff]   ;;  %v1330_v54 = vld [vmem:[%s1405_s26 + $0x174] ss:$8 sps:$4 sm:$0xff]  }
  0x1e   : > { %v1329_v55 = vld [vmem:[%s1405_s26 + $0xa0] ss:$8 sps:$4 sm:$0xff]   ;;  %v1332_v56 = vld [vmem:[%s1405_s26 + $0x170] ss:$8 sps:$4 sm:$0xff]   ;;  %v1333_v57 = vld [vmem:[%s1405_s26 + $0xb4] ss:$8 sps:$4 sm:$0xff]  }
  0x1f   : > { %638 = vmatpush1.bf16.msra.mxu0 %v1261_v9  ;;  %1240 = vmatpush1.bf16.msra.mxu1 %v1261_v9  ;;  %v1336_v58 = vld [vmem:[%s1405_s26 + $0x184] ss:$8 sps:$4 sm:$0xff]   ;;  %v1335_v59 = vld [vmem:[%s1405_s26 + $0xb0] ss:$8 sps:$4 sm:$0xff]   ;;  %v1338_v60 = vld [vmem:[%s1405_s26 + $0x180] ss:$8 sps:$4 sm:$0xff]  }
  0x20   : > { %639 = vmatprep.subr.bf16.mxu0 %v1350_v1  ;;  %1229 = vmatprep.subr.bf16.mxu1 %v1350_v1  ;;  %v1339_v61 = vld [vmem:[%s1405_s26 + $0xc4] ss:$8 sps:$4 sm:$0xff]   ;;  %v1341_v62 = vld [vmem:[%s1405_s26 + $0xc0] ss:$8 sps:$4 sm:$0xff]  }
  0x23   : > { %640 = vmatpush1.bf16.msra.mxu0 %v1262_v10  ;;  %1241 = vmatpush1.bf16.msra.mxu1 %v1262_v10 }
  0x24   : > { %641 = vmatprep.subr.bf16.mxu0 %v1350_v1  ;;  %1230 = vmatprep.subr.bf16.mxu1 %v1350_v1 }
  0x27   : > { %642 = vmatpush1.bf16.msra.mxu0 %v1263_v11  ;;  %1242 = vmatpush1.bf16.msra.mxu1 %v1263_v11 }
  0x28   : > { %643 = vmatprep.subr.bf16.mxu0 %v1350_v1  ;;  %1231 = vmatprep.subr.bf16.mxu1 %v1350_v1 }
  0x2b   : > { %644 = vmatpush1.bf16.msra.mxu0 %v1264_v12  ;;  %1243 = vmatpush1.bf16.msra.mxu1 %v1264_v12 }
  0x2c   : > { %645 = vmatprep.subr.bf16.mxu0 %v1350_v1  ;;  %1232 = vmatprep.subr.bf16.mxu1 %v1350_v1 }
  0x2f   : > { %646 = vmatpush1.bf16.msra.mxu0 %v1265_v13  ;;  %1244 = vmatpush1.bf16.msra.mxu1 %v1265_v13 }
  0x30   : > { %647 = vmatprep.subr.bf16.mxu0 %v1350_v1  ;;  %1233 = vmatprep.subr.bf16.mxu1 %v1350_v1  ;;  %v861_v1 = vsub.s32 0, %v860_v0 }
  0x32   : > { %v1527_v4 = vrot.slane %v858_v2, %v861_v1 }
  0x33   : > { %648 = vmatpush1.bf16.msra.mxu0 %v1266_v14  ;;  %1245 = vmatpush1.bf16.msra.mxu1 %v1266_v14 }
  0x36   : > { %658 = vmatmul.mubr.bf16.vlgmr.msra.gmra.mrb[0].mxu0 %v1267_v15  ;;  %762 = vmatmul.mubr.bf16.vlgmr.msra.gmra.mrb[0].mxu1 %v1270_v16 }
  0x37   : > { %1195 = vmatprep.mubr.msk.bf16.mxu0 %vm549_vm0, %v1273_v17  ;;  %1208 = vmatprep.mubr.msk.bf16.mxu1 %vm549_vm0, %v1276_v18 }
  0x3e   : > { %666 = vmatmul.mubr.bf16.gmra.mrb[4].mxu0 %v1275_v19  ;;  %770 = vmatmul.mubr.bf16.gmra.mrb[4].mxu1 %v1278_v20 }
  0x3f   : > { %1196 = vmatprep.mubr.msk.bf16.mxu0 %vm549_vm0, %v1279_v21  ;;  %1209 = vmatprep.mubr.msk.bf16.mxu1 %vm549_vm0, %v1282_v22 }
  0x46   : > { %674 = vmatmul.mubr.bf16.gmra.mrb[8].mxu0 %v1281_v23  ;;  %778 = vmatmul.mubr.bf16.gmra.mrb[8].mxu1 %v1284_v24 }
  0x47   : > { %1197 = vmatprep.mubr.msk.bf16.mxu0 %vm549_vm0, %v1285_v25  ;;  %1210 = vmatprep.mubr.msk.bf16.mxu1 %vm549_vm0, %v1288_v26 }
  0x4e   : > { %682 = vmatmul.mubr.bf16.gmra.mrb[12].mxu0 %v1287_v27  ;;  %786 = vmatmul.mubr.bf16.gmra.mrb[12].mxu1 %v1290_v28 }
  0x4f   : > { %1198 = vmatprep.mubr.msk.bf16.mxu0 %vm549_vm0, %v1291_v29  ;;  %1211 = vmatprep.mubr.msk.bf16.mxu1 %vm549_vm0, %v1294_v30 }
  0x56   : > { %690 = vmatmul.mubr.bf16.gmra.mrb[16].mxu0 %v1293_v31  ;;  %794 = vmatmul.mubr.bf16.gmra.mrb[16].mxu1 %v1296_v32 }
  0x57   : > { %1199 = vmatprep.mubr.msk.bf16.mxu0 %vm549_vm0, %v1297_v33  ;;  %1212 = vmatprep.mubr.msk.bf16.mxu1 %vm549_vm0, %v1300_v34 }
  0x5e   : > { %698 = vmatmul.mubr.bf16.gmra.mrb[20].mxu0 %v1299_v35  ;;  %802 = vmatmul.mubr.bf16.gmra.mrb[20].mxu1 %v1302_v36 }
  0x5f   : > { %1200 = vmatprep.mubr.msk.bf16.mxu0 %vm549_vm0, %v1303_v37  ;;  %1213 = vmatprep.mubr.msk.bf16.mxu1 %vm549_vm0, %v1306_v38 }
  0x66   : > { %706 = vmatmul.mubr.bf16.gmra.mrb[24].mxu0 %v1305_v39  ;;  %810 = vmatmul.mubr.bf16.gmra.mrb[24].mxu1 %v1308_v40 }
  0x67   : > { %1201 = vmatprep.mubr.msk.bf16.mxu0 %vm549_vm0, %v1309_v41  ;;  %1214 = vmatprep.mubr.msk.bf16.mxu1 %vm549_vm0, %v1312_v42 }
  0x6e   : > { %714 = vmatmul.mubr.bf16.gmra.mrb[28].mxu0 %v1311_v43  ;;  %818 = vmatmul.mubr.bf16.gmra.mrb[28].mxu1 %v1314_v44 }
  0x6f   : > { %1202 = vmatprep.mubr.msk.bf16.mxu0 %vm549_vm0, %v1315_v45  ;;  %1215 = vmatprep.mubr.msk.bf16.mxu1 %vm549_vm0, %v1318_v46 }
  0x76   : > { %722 = vmatmul.mubr.bf16.gmra.mrb[32].mxu0 %v1317_v47  ;;  %826 = vmatmul.mubr.bf16.gmra.mrb[32].mxu1 %v1320_v48 }
  0x77   : > { %1203 = vmatprep.mubr.msk.bf16.mxu0 %vm549_vm0, %v1321_v49  ;;  %1216 = vmatprep.mubr.msk.bf16.mxu1 %vm549_vm0, %v1324_v50 }
  0x7e   : > { %730 = vmatmul.mubr.bf16.gmra.mrb[36].mxu0 %v1323_v51  ;;  %834 = vmatmul.mubr.bf16.gmra.mrb[36].mxu1 %v1326_v52 }
  0x7f   : > { %1204 = vmatprep.mubr.msk.bf16.mxu0 %vm549_vm0, %v1327_v53  ;;  %1217 = vmatprep.mubr.msk.bf16.mxu1 %vm549_vm0, %v1330_v54 }
  0x86   : > { %738 = vmatmul.mubr.bf16.gmra.mrb[40].mxu0 %v1329_v55  ;;  %842 = vmatmul.mubr.bf16.gmra.mrb[40].mxu1 %v1332_v56 }
  0x87   : > { %1205 = vmatprep.mubr.msk.bf16.mxu0 %vm549_vm0, %v1333_v57  ;;  %1218 = vmatprep.mubr.msk.bf16.mxu1 %vm549_vm0, %v1336_v58 }
  0x8e   : > { %746 = vmatmul.mubr.bf16.gmra.mrb[44].mxu0 %v1335_v59  ;;  %850 = vmatmul.mubr.bf16.gmra.mrb[44].mxu1 %v1338_v60 }
  0x8f   : > { %1206 = vmatprep.mubr.msk.bf16.mxu0 %vm549_vm0, %v1339_v61 }
  0x96   : > { %754 = vmatmul.mubr.bf16.gmra.mrb[48].mxu0 %v1341_v62 }
 0x109   : > { %v659_v6 = vpop.f32.mrb[0].mxu0  ;;  %v763_v7 = vpop.f32.mrb[0].mxu1 }
 0x10a   : > { %v863_v8 = vmul.f32 %v1527_v4, %v659_v6  ;;  %v661_v9 = vpop.f32.mrb[1].mxu0  ;;  %v889_v10 = vmul.f32 %v1527_v4, %v763_v7  ;;  %v765_v11 = vpop.f32.mrb[1].mxu1 }
 0x10b   : > { %v662_v12 = vpop.f32.mrb[2].mxu0  ;;  %v766_v13 = vpop.f32.mrb[2].mxu1 }
 0x10c   : > { %v917_v14 = vadd.f32 %v1529_v5, %v863_v8  ;;  %v864_v15 = vmul.f32 %v1527_v4, %v662_v12  ;;  %v664_v16 = vpop.f32.mrb[3].mxu0  ;;  %v943_v17 = vadd.f32 %v1529_v5, %v889_v10  ;;  %v890_v18 = vmul.f32 %v1527_v4, %v766_v13  ;;  %v768_v19 = vpop.f32.mrb[3].mxu1 }
 0x10e   : > { %v967_v20 = vmax.f32 %v917_v14, 0.0  ;;  %v918_v21 = vadd.f32 %v1529_v5, %v864_v15  ;;  %v993_v22 = vmax.f32 %v943_v17, 0.0  ;;  %v944_v23 = vadd.f32 %v1529_v5, %v890_v18 }
 0x110   : > { %1018 = vst.msk [vmem:[%s1542_s23] sm:$0xff] %vm1017_vm1, %v967_v20  ;;  %v968_v24 = vmax.f32 %v918_v21, 0.0  ;;  %1044 = vst.msk [vmem:[%s1542_s23 + $0xd0] sm:$0xff] %vm1017_vm1, %v993_v22  ;;  %v994_v25 = vmax.f32 %v944_v23, 0.0 }
 0x111   : > { %v667_v26 = vpop.f32.mrb[4].mxu0  ;;  %v771_v27 = vpop.f32.mrb[4].mxu1 }
 0x112   : > { %1019 = vst.msk [vmem:[%s1542_s23 + $0x8] sm:$0xff] %vm1017_vm1, %v968_v24  ;;  %1045 = vst.msk [vmem:[%s1542_s23 + $0xd8] sm:$0xff] %vm1017_vm1, %v994_v25  ;;  %v865_v28 = vmul.f32 %v1527_v4, %v667_v26  ;;  %v669_v29 = vpop.f32.mrb[5].mxu0  ;;  %v891_v30 = vmul.f32 %v1527_v4, %v771_v27  ;;  %v773_v31 = vpop.f32.mrb[5].mxu1 }
 0x113   : > { %v670_v32 = vpop.f32.mrb[6].mxu0  ;;  %v774_v33 = vpop.f32.mrb[6].mxu1 }
 0x114   : > { %v919_v34 = vadd.f32 %v1529_v5, %v865_v28  ;;  %v866_v35 = vmul.f32 %v1527_v4, %v670_v32  ;;  %v672_v36 = vpop.f32.mrb[7].mxu0  ;;  %v945_v37 = vadd.f32 %v1529_v5, %v891_v30  ;;  %v892_v38 = vmul.f32 %v1527_v4, %v774_v33  ;;  %v776_v39 = vpop.f32.mrb[7].mxu1 }
 0x116   : > { %v969_v40 = vmax.f32 %v919_v34, 0.0  ;;  %v920_v41 = vadd.f32 %v1529_v5, %v866_v35  ;;  %v995_v42 = vmax.f32 %v945_v37, 0.0  ;;  %v946_v43 = vadd.f32 %v1529_v5, %v892_v38 }
 0x118   : > { %1020 = vst.msk [vmem:[%s1542_s23 + $0x10] sm:$0xff] %vm1017_vm1, %v969_v40  ;;  %v970_v44 = vmax.f32 %v920_v41, 0.0  ;;  %1046 = vst.msk [vmem:[%s1542_s23 + $0xe0] sm:$0xff] %vm1017_vm1, %v995_v42  ;;  %v996_v45 = vmax.f32 %v946_v43, 0.0 }
 0x119   : > { %v675_v46 = vpop.f32.mrb[8].mxu0  ;;  %v779_v47 = vpop.f32.mrb[8].mxu1 }
 0x11a   : > { %1021 = vst.msk [vmem:[%s1542_s23 + $0x18] sm:$0xff] %vm1017_vm1, %v970_v44  ;;  %1047 = vst.msk [vmem:[%s1542_s23 + $0xe8] sm:$0xff] %vm1017_vm1, %v996_v45  ;;  %v867_v48 = vmul.f32 %v1527_v4, %v675_v46  ;;  %v677_v49 = vpop.f32.mrb[9].mxu0  ;;  %v893_v50 = vmul.f32 %v1527_v4, %v779_v47  ;;  %v781_v51 = vpop.f32.mrb[9].mxu1 }
 0x11b   : > { %v678_v52 = vpop.f32.mrb[10].mxu0  ;;  %v782_v53 = vpop.f32.mrb[10].mxu1 }
 0x11c   : > { %v921_v54 = vadd.f32 %v1529_v5, %v867_v48  ;;  %v868_v55 = vmul.f32 %v1527_v4, %v678_v52  ;;  %v680_v56 = vpop.f32.mrb[11].mxu0  ;;  %v947_v57 = vadd.f32 %v1529_v5, %v893_v50  ;;  %v894_v58 = vmul.f32 %v1527_v4, %v782_v53  ;;  %v784_v59 = vpop.f32.mrb[11].mxu1 }
 0x11e   : > { %v971_v60 = vmax.f32 %v921_v54, 0.0  ;;  %v922_v61 = vadd.f32 %v1529_v5, %v868_v55  ;;  %v997_v62 = vmax.f32 %v947_v57, 0.0  ;;  %v948_v63 = vadd.f32 %v1529_v5, %v894_v58 }
 0x120   : > { %1022 = vst.msk [vmem:[%s1542_s23 + $0x20] sm:$0xff] %vm1017_vm1, %v971_v60  ;;  %v972_v0 = vmax.f32 %v922_v61, 0.0  ;;  %1048 = vst.msk [vmem:[%s1542_s23 + $0xf0] sm:$0xff] %vm1017_vm1, %v997_v62  ;;  %v998_v1 = vmax.f32 %v948_v63, 0.0 }
 0x121   : > { %v683_v2 = vpop.f32.mrb[12].mxu0  ;;  %v787_v3 = vpop.f32.mrb[12].mxu1 }
 0x122   : > { %1023 = vst.msk [vmem:[%s1542_s23 + $0x28] sm:$0xff] %vm1017_vm1, %v972_v0  ;;  %1049 = vst.msk [vmem:[%s1542_s23 + $0xf8] sm:$0xff] %vm1017_vm1, %v998_v1  ;;  %v869_v6 = vmul.f32 %v1527_v4, %v683_v2  ;;  %v685_v7 = vpop.f32.mrb[13].mxu0  ;;  %v895_v8 = vmul.f32 %v1527_v4, %v787_v3  ;;  %v789_v9 = vpop.f32.mrb[13].mxu1 }
 0x123   : > { %v686_v10 = vpop.f32.mrb[14].mxu0  ;;  %v790_v11 = vpop.f32.mrb[14].mxu1 }
 0x124   : > { %v923_v12 = vadd.f32 %v1529_v5, %v869_v6  ;;  %v870_v13 = vmul.f32 %v1527_v4, %v686_v10  ;;  %v688_v14 = vpop.f32.mrb[15].mxu0  ;;  %v949_v15 = vadd.f32 %v1529_v5, %v895_v8  ;;  %v896_v16 = vmul.f32 %v1527_v4, %v790_v11  ;;  %v792_v17 = vpop.f32.mrb[15].mxu1 }
 0x126   : > { %v973_v18 = vmax.f32 %v923_v12, 0.0  ;;  %v924_v19 = vadd.f32 %v1529_v5, %v870_v13  ;;  %v999_v20 = vmax.f32 %v949_v15, 0.0  ;;  %v950_v21 = vadd.f32 %v1529_v5, %v896_v16 }
 0x128   : > { %1024 = vst.msk [vmem:[%s1542_s23 + $0x30] sm:$0xff] %vm1017_vm1, %v973_v18  ;;  %v974_v22 = vmax.f32 %v924_v19, 0.0  ;;  %1050 = vst.msk [vmem:[%s1542_s23 + $0x100] sm:$0xff] %vm1017_vm1, %v999_v20  ;;  %v1000_v23 = vmax.f32 %v950_v21, 0.0 }
 0x129   : > { %v691_v24 = vpop.f32.mrb[16].mxu0  ;;  %v795_v25 = vpop.f32.mrb[16].mxu1 }
 0x12a   : > { %1025 = vst.msk [vmem:[%s1542_s23 + $0x38] sm:$0xff] %vm1017_vm1, %v974_v22  ;;  %1051 = vst.msk [vmem:[%s1542_s23 + $0x108] sm:$0xff] %vm1017_vm1, %v1000_v23  ;;  %v871_v26 = vmul.f32 %v1527_v4, %v691_v24  ;;  %v693_v27 = vpop.f32.mrb[17].mxu0  ;;  %v897_v28 = vmul.f32 %v1527_v4, %v795_v25  ;;  %v797_v29 = vpop.f32.mrb[17].mxu1 }
 0x12b   : > { %v694_v30 = vpop.f32.mrb[18].mxu0  ;;  %v798_v31 = vpop.f32.mrb[18].mxu1 }
 0x12c   : > { %v925_v32 = vadd.f32 %v1529_v5, %v871_v26  ;;  %v872_v33 = vmul.f32 %v1527_v4, %v694_v30  ;;  %v696_v34 = vpop.f32.mrb[19].mxu0  ;;  %v951_v35 = vadd.f32 %v1529_v5, %v897_v28  ;;  %v898_v36 = vmul.f32 %v1527_v4, %v798_v31  ;;  %v800_v37 = vpop.f32.mrb[19].mxu1 }
 0x12e   : > { %v975_v38 = vmax.f32 %v925_v32, 0.0  ;;  %v926_v39 = vadd.f32 %v1529_v5, %v872_v33  ;;  %v1001_v40 = vmax.f32 %v951_v35, 0.0  ;;  %v952_v41 = vadd.f32 %v1529_v5, %v898_v36 }
 0x130   : > { %1026 = vst.msk [vmem:[%s1542_s23 + $0x40] sm:$0xff] %vm1017_vm1, %v975_v38  ;;  %v976_v42 = vmax.f32 %v926_v39, 0.0  ;;  %1052 = vst.msk [vmem:[%s1542_s23 + $0x110] sm:$0xff] %vm1017_vm1, %v1001_v40  ;;  %v1002_v43 = vmax.f32 %v952_v41, 0.0 }
 0x131   : > { %v699_v44 = vpop.f32.mrb[20].mxu0  ;;  %v803_v45 = vpop.f32.mrb[20].mxu1 }
 0x132   : > { %1027 = vst.msk [vmem:[%s1542_s23 + $0x48] sm:$0xff] %vm1017_vm1, %v976_v42  ;;  %1053 = vst.msk [vmem:[%s1542_s23 + $0x118] sm:$0xff] %vm1017_vm1, %v1002_v43  ;;  %v873_v46 = vmul.f32 %v1527_v4, %v699_v44  ;;  %v701_v47 = vpop.f32.mrb[21].mxu0  ;;  %v899_v48 = vmul.f32 %v1527_v4, %v803_v45  ;;  %v805_v49 = vpop.f32.mrb[21].mxu1 }
 0x133   : > { %v702_v50 = vpop.f32.mrb[22].mxu0  ;;  %v806_v51 = vpop.f32.mrb[22].mxu1 }
 0x134   : > { %v927_v52 = vadd.f32 %v1529_v5, %v873_v46  ;;  %v874_v53 = vmul.f32 %v1527_v4, %v702_v50  ;;  %v704_v54 = vpop.f32.mrb[23].mxu0  ;;  %v953_v55 = vadd.f32 %v1529_v5, %v899_v48  ;;  %v900_v56 = vmul.f32 %v1527_v4, %v806_v51  ;;  %v808_v57 = vpop.f32.mrb[23].mxu1 }
 0x136   : > { %v977_v58 = vmax.f32 %v927_v52, 0.0  ;;  %v928_v59 = vadd.f32 %v1529_v5, %v874_v53  ;;  %v1003_v60 = vmax.f32 %v953_v55, 0.0  ;;  %v954_v61 = vadd.f32 %v1529_v5, %v900_v56 }
 0x138   : > { %1028 = vst.msk [vmem:[%s1542_s23 + $0x50] sm:$0xff] %vm1017_vm1, %v977_v58  ;;  %v978_v62 = vmax.f32 %v928_v59, 0.0  ;;  %1054 = vst.msk [vmem:[%s1542_s23 + $0x120] sm:$0xff] %vm1017_vm1, %v1003_v60  ;;  %v1004_v63 = vmax.f32 %v954_v61, 0.0 }
 0x139   : > { %v707_v0 = vpop.f32.mrb[24].mxu0  ;;  %v811_v1 = vpop.f32.mrb[24].mxu1 }
 0x13a   : > { %1029 = vst.msk [vmem:[%s1542_s23 + $0x58] sm:$0xff] %vm1017_vm1, %v978_v62  ;;  %1055 = vst.msk [vmem:[%s1542_s23 + $0x128] sm:$0xff] %vm1017_vm1, %v1004_v63  ;;  %v875_v2 = vmul.f32 %v1527_v4, %v707_v0  ;;  %v709_v3 = vpop.f32.mrb[25].mxu0  ;;  %v901_v6 = vmul.f32 %v1527_v4, %v811_v1  ;;  %v813_v7 = vpop.f32.mrb[25].mxu1 }
 0x13b   : > { %v710_v8 = vpop.f32.mrb[26].mxu0  ;;  %v814_v9 = vpop.f32.mrb[26].mxu1 }
 0x13c   : > { %v929_v10 = vadd.f32 %v1529_v5, %v875_v2  ;;  %v876_v11 = vmul.f32 %v1527_v4, %v710_v8  ;;  %v712_v12 = vpop.f32.mrb[27].mxu0  ;;  %v955_v13 = vadd.f32 %v1529_v5, %v901_v6  ;;  %v902_v14 = vmul.f32 %v1527_v4, %v814_v9  ;;  %v816_v15 = vpop.f32.mrb[27].mxu1 }
 0x13e   : > { %v979_v16 = vmax.f32 %v929_v10, 0.0  ;;  %v930_v17 = vadd.f32 %v1529_v5, %v876_v11  ;;  %v1005_v18 = vmax.f32 %v955_v13, 0.0  ;;  %v956_v19 = vadd.f32 %v1529_v5, %v902_v14 }
 0x140   : > { %1030 = vst.msk [vmem:[%s1542_s23 + $0x60] sm:$0xff] %vm1017_vm1, %v979_v16  ;;  %v980_v20 = vmax.f32 %v930_v17, 0.0  ;;  %1056 = vst.msk [vmem:[%s1542_s23 + $0x130] sm:$0xff] %vm1017_vm1, %v1005_v18  ;;  %v1006_v21 = vmax.f32 %v956_v19, 0.0 }
 0x141   : > { %v715_v22 = vpop.f32.mrb[28].mxu0  ;;  %v819_v23 = vpop.f32.mrb[28].mxu1 }
 0x142   : > { %1031 = vst.msk [vmem:[%s1542_s23 + $0x68] sm:$0xff] %vm1017_vm1, %v980_v20  ;;  %1057 = vst.msk [vmem:[%s1542_s23 + $0x138] sm:$0xff] %vm1017_vm1, %v1006_v21  ;;  %v877_v24 = vmul.f32 %v1527_v4, %v715_v22  ;;  %v717_v25 = vpop.f32.mrb[29].mxu0  ;;  %v903_v26 = vmul.f32 %v1527_v4, %v819_v23  ;;  %v821_v27 = vpop.f32.mrb[29].mxu1 }
 0x143   : > { %v718_v28 = vpop.f32.mrb[30].mxu0  ;;  %v822_v29 = vpop.f32.mrb[30].mxu1 }
 0x144   : > { %v931_v30 = vadd.f32 %v1529_v5, %v877_v24  ;;  %v878_v31 = vmul.f32 %v1527_v4, %v718_v28  ;;  %v720_v32 = vpop.f32.mrb[31].mxu0  ;;  %v957_v33 = vadd.f32 %v1529_v5, %v903_v26  ;;  %v904_v34 = vmul.f32 %v1527_v4, %v822_v29  ;;  %v824_v35 = vpop.f32.mrb[31].mxu1 }
 0x146   : > { %v981_v36 = vmax.f32 %v931_v30, 0.0  ;;  %v932_v37 = vadd.f32 %v1529_v5, %v878_v31  ;;  %v1007_v38 = vmax.f32 %v957_v33, 0.0  ;;  %v958_v39 = vadd.f32 %v1529_v5, %v904_v34 }
 0x148   : > { %1032 = vst.msk [vmem:[%s1542_s23 + $0x70] sm:$0xff] %vm1017_vm1, %v981_v36  ;;  %v982_v40 = vmax.f32 %v932_v37, 0.0  ;;  %1058 = vst.msk [vmem:[%s1542_s23 + $0x140] sm:$0xff] %vm1017_vm1, %v1007_v38  ;;  %v1008_v41 = vmax.f32 %v958_v39, 0.0 }
 0x149   : > { %v723_v42 = vpop.f32.mrb[32].mxu0  ;;  %v827_v43 = vpop.f32.mrb[32].mxu1 }
 0x14a   : > { %1033 = vst.msk [vmem:[%s1542_s23 + $0x78] sm:$0xff] %vm1017_vm1, %v982_v40  ;;  %1059 = vst.msk [vmem:[%s1542_s23 + $0x148] sm:$0xff] %vm1017_vm1, %v1008_v41  ;;  %v879_v44 = vmul.f32 %v1527_v4, %v723_v42  ;;  %v725_v45 = vpop.f32.mrb[33].mxu0  ;;  %v905_v46 = vmul.f32 %v1527_v4, %v827_v43  ;;  %v829_v47 = vpop.f32.mrb[33].mxu1 }
 0x14b   : > { %v726_v48 = vpop.f32.mrb[34].mxu0  ;;  %v830_v49 = vpop.f32.mrb[34].mxu1 }
 0x14c   : > { %v933_v50 = vadd.f32 %v1529_v5, %v879_v44  ;;  %v880_v51 = vmul.f32 %v1527_v4, %v726_v48  ;;  %v728_v52 = vpop.f32.mrb[35].mxu0  ;;  %v959_v53 = vadd.f32 %v1529_v5, %v905_v46  ;;  %v906_v54 = vmul.f32 %v1527_v4, %v830_v49  ;;  %v832_v55 = vpop.f32.mrb[35].mxu1 }
 0x14e   : > { %v983_v56 = vmax.f32 %v933_v50, 0.0  ;;  %v934_v57 = vadd.f32 %v1529_v5, %v880_v51  ;;  %v1009_v58 = vmax.f32 %v959_v53, 0.0  ;;  %v960_v59 = vadd.f32 %v1529_v5, %v906_v54 }
 0x150   : > { %1034 = vst.msk [vmem:[%s1542_s23 + $0x80] sm:$0xff] %vm1017_vm1, %v983_v56  ;;  %v984_v60 = vmax.f32 %v934_v57, 0.0  ;;  %1060 = vst.msk [vmem:[%s1542_s23 + $0x150] sm:$0xff] %vm1017_vm1, %v1009_v58  ;;  %v1010_v61 = vmax.f32 %v960_v59, 0.0 }
 0x151   : > { %v731_v62 = vpop.f32.mrb[36].mxu0  ;;  %v835_v63 = vpop.f32.mrb[36].mxu1 }
 0x152   : > { %1035 = vst.msk [vmem:[%s1542_s23 + $0x88] sm:$0xff] %vm1017_vm1, %v984_v60  ;;  %1061 = vst.msk [vmem:[%s1542_s23 + $0x158] sm:$0xff] %vm1017_vm1, %v1010_v61  ;;  %v881_v0 = vmul.f32 %v1527_v4, %v731_v62  ;;  %v733_v1 = vpop.f32.mrb[37].mxu0  ;;  %v907_v2 = vmul.f32 %v1527_v4, %v835_v63  ;;  %v837_v3 = vpop.f32.mrb[37].mxu1 }
 0x153   : > { %v734_v6 = vpop.f32.mrb[38].mxu0  ;;  %v838_v7 = vpop.f32.mrb[38].mxu1 }
 0x154   : > { %v935_v8 = vadd.f32 %v1529_v5, %v881_v0  ;;  %v882_v9 = vmul.f32 %v1527_v4, %v734_v6  ;;  %v736_v10 = vpop.f32.mrb[39].mxu0  ;;  %v961_v11 = vadd.f32 %v1529_v5, %v907_v2  ;;  %v908_v12 = vmul.f32 %v1527_v4, %v838_v7  ;;  %v840_v13 = vpop.f32.mrb[39].mxu1 }
 0x156   : > { %v985_v14 = vmax.f32 %v935_v8, 0.0  ;;  %v936_v15 = vadd.f32 %v1529_v5, %v882_v9  ;;  %v1011_v16 = vmax.f32 %v961_v11, 0.0  ;;  %v962_v17 = vadd.f32 %v1529_v5, %v908_v12 }
 0x158   : > { %1036 = vst.msk [vmem:[%s1542_s23 + $0x90] sm:$0xff] %vm1017_vm1, %v985_v14  ;;  %v986_v18 = vmax.f32 %v936_v15, 0.0  ;;  %1062 = vst.msk [vmem:[%s1542_s23 + $0x160] sm:$0xff] %vm1017_vm1, %v1011_v16  ;;  %v1012_v19 = vmax.f32 %v962_v17, 0.0 }
 0x159   : > { %v739_v20 = vpop.f32.mrb[40].mxu0  ;;  %v843_v21 = vpop.f32.mrb[40].mxu1 }
 0x15a   : > { %1037 = vst.msk [vmem:[%s1542_s23 + $0x98] sm:$0xff] %vm1017_vm1, %v986_v18  ;;  %1063 = vst.msk [vmem:[%s1542_s23 + $0x168] sm:$0xff] %vm1017_vm1, %v1012_v19  ;;  %v883_v22 = vmul.f32 %v1527_v4, %v739_v20  ;;  %v741_v23 = vpop.f32.mrb[41].mxu0  ;;  %v909_v24 = vmul.f32 %v1527_v4, %v843_v21  ;;  %v845_v25 = vpop.f32.mrb[41].mxu1 }
 0x15b   : > { %v742_v26 = vpop.f32.mrb[42].mxu0  ;;  %v846_v27 = vpop.f32.mrb[42].mxu1 }
 0x15c   : > { %v937_v28 = vadd.f32 %v1529_v5, %v883_v22  ;;  %v884_v29 = vmul.f32 %v1527_v4, %v742_v26  ;;  %v744_v30 = vpop.f32.mrb[43].mxu0  ;;  %v963_v31 = vadd.f32 %v1529_v5, %v909_v24  ;;  %v910_v32 = vmul.f32 %v1527_v4, %v846_v27  ;;  %v848_v33 = vpop.f32.mrb[43].mxu1 }
 0x15e   : > { %v987_v34 = vmax.f32 %v937_v28, 0.0  ;;  %v938_v35 = vadd.f32 %v1529_v5, %v884_v29  ;;  %v1013_v36 = vmax.f32 %v963_v31, 0.0  ;;  %v964_v37 = vadd.f32 %v1529_v5, %v910_v32 }
 0x160   : > { %1038 = vst.msk [vmem:[%s1542_s23 + $0xa0] sm:$0xff] %vm1017_vm1, %v987_v34  ;;  %v988_v38 = vmax.f32 %v938_v35, 0.0  ;;  %1064 = vst.msk [vmem:[%s1542_s23 + $0x170] sm:$0xff] %vm1017_vm1, %v1013_v36  ;;  %v1014_v39 = vmax.f32 %v964_v37, 0.0 }
 0x161   : > { %v747_v40 = vpop.f32.mrb[44].mxu0  ;;  %v851_v41 = vpop.f32.mrb[44].mxu1 }
 0x162   : > { %1039 = vst.msk [vmem:[%s1542_s23 + $0xa8] sm:$0xff] %vm1017_vm1, %v988_v38  ;;  %1065 = vst.msk [vmem:[%s1542_s23 + $0x178] sm:$0xff] %vm1017_vm1, %v1014_v39  ;;  %v885_v42 = vmul.f32 %v1527_v4, %v747_v40  ;;  %v749_v43 = vpop.f32.mrb[45].mxu0  ;;  %v911_v44 = vmul.f32 %v1527_v4, %v851_v41  ;;  %v853_v45 = vpop.f32.mrb[45].mxu1 }
 0x163   : > { %v750_v46 = vpop.f32.mrb[46].mxu0  ;;  %v854_v47 = vpop.f32.mrb[46].mxu1 }
 0x164   : > { %v939_v48 = vadd.f32 %v1529_v5, %v885_v42  ;;  %v886_v49 = vmul.f32 %v1527_v4, %v750_v46  ;;  %v752_v50 = vpop.f32.mrb[47].mxu0  ;;  %v965_v51 = vadd.f32 %v1529_v5, %v911_v44  ;;  %v912_v52 = vmul.f32 %v1527_v4, %v854_v47  ;;  %v856_v53 = vpop.f32.mrb[47].mxu1 }
 0x166   : > { %v989_v54 = vmax.f32 %v939_v48, 0.0  ;;  %v940_v55 = vadd.f32 %v1529_v5, %v886_v49  ;;  %v1015_v56 = vmax.f32 %v965_v51, 0.0  ;;  %v966_v57 = vadd.f32 %v1529_v5, %v912_v52 }
 0x168   : > { %1040 = vst.msk [vmem:[%s1542_s23 + $0xb0] sm:$0xff] %vm1017_vm1, %v989_v54  ;;  %v990_v58 = vmax.f32 %v940_v55, 0.0  ;;  %1066 = vst.msk [vmem:[%s1542_s23 + $0x180] sm:$0xff] %vm1017_vm1, %v1015_v56  ;;  %v1016_v59 = vmax.f32 %v966_v57, 0.0 }
 0x169   : > { %v755_v60 = vpop.f32.mrb[48].mxu0 }
 0x16a   : > { %1041 = vst.msk [vmem:[%s1542_s23 + $0xb8] sm:$0xff] %vm1017_vm1, %v990_v58  ;;  %1067 = vst.msk [vmem:[%s1542_s23 + $0x188] sm:$0xff] %vm1017_vm1, %v1016_v59  ;;  %v887_v61 = vmul.f32 %v1527_v4, %v755_v60  ;;  %v757_v62 = vpop.f32.mrb[49].mxu0 }
 0x16b   : > { %v758_v63 = vpop.f32.mrb[50].mxu0 }
 0x16c   : > { %v941_v0 = vadd.f32 %v1529_v5, %v887_v61  ;;  %v888_v1 = vmul.f32 %v1527_v4, %v758_v63  ;;  %v760_v2 = vpop.f32.mrb[51].mxu0 }
 0x16e   : > { %v991_v3 = vmax.f32 %v941_v0, 0.0  ;;  %v942_v6 = vadd.f32 %v1529_v5, %v888_v1 }
 0x170   : > { %1042 = vst.msk [vmem:[%s1542_s23 + $0xc0] sm:$0xff] %vm1017_vm1, %v991_v3  ;;  %v992_v7 = vmax.f32 %v942_v6, 0.0 }
 0x172   : > { %1043 = vst.msk [vmem:[%s1542_s23 + $0xc8] sm:$0xff] %vm1017_vm1, %v992_v7 }
 0x173 PF: > { %s13_s12 = sadd.s32 1, %s1348_s12  }
 0x174   : > { %p10_p4 = scmp.ge.s32.totalorder %s13_s12, 4  }
 0x176   :  { %12 = sbr.rel (!%p10_p4) target bundleno = 1 (0x1), region = 62 }

// kernel: cnn_base_forward.5
= control target key start
LH: loop header
LB: loop body
LE: loop exit
PB: predicated region body
PF: predicated region fallthrough
CT: control target
= control target key end

     0   :  { %vm839_vm0 = vcmask 523264   ;;  %vm860_vm1 = vcmask 517120   ;;  %s1576_s1 = inlined_call_operand.vmem [shape: bf16[512,64], index: 1, kind: input, shape index: {}]   ;;  %s1577_s0 = inlined_call_operand.vmem [shape: bf16[162,512], index: 0, kind: input, shape index: {}]   ;;  %s1578_s2 = inlined_call_operand.vmem [shape: f32[2,64], index: 2, kind: input, shape index: {}]   ;;  %s1579_s3 = inlined_call_operand.vmem [shape: f32[162,64], index: 3, kind: output, shape index: {}]  }
   0x1   :  { %v1106_v0 = vld [vmem:[%s1576_s1 + $0x40] sm:$0xff]   ;;  %v1110_v4 = vld [vmem:[%s1576_s1 + $0x48] sm:$0xff]   ;;  %v1114_v8 = vld [vmem:[%s1576_s1 + $0x50] sm:$0xff]  }
   0x2   :  { %v1107_v1 = vld [vmem:[%s1576_s1 + $0xc0] sm:$0xff]   ;;  %942 = vmatprep.subr.bf16.mxu0 %v1106_v0  ;;  %v1111_v5 = vld [vmem:[%s1576_s1 + $0xc8] sm:$0xff]   ;;  %v1115_v9 = vld [vmem:[%s1576_s1 + $0xd0] sm:$0xff]  }
   0x3   :  { %v1108_v2 = vld [vmem:[%s1576_s1] sm:$0xff]   ;;  %1024 = vmatprep.subr.bf16.mxu1 %v1107_v1  ;;  %v1112_v6 = vld [vmem:[%s1576_s1 + $0x8] sm:$0xff]   ;;  %v1116_v10 = vld [vmem:[%s1576_s1 + $0x10] sm:$0xff]  }
   0x4   :  { %v1109_v3 = vld [vmem:[%s1576_s1 + $0x80] sm:$0xff]   ;;  %943 = vmatpush3.bf16.msra.mxu0 %v1108_v2  ;;  %v1113_v7 = vld [vmem:[%s1576_s1 + $0x88] sm:$0xff]   ;;  %v1117_v11 = vld [vmem:[%s1576_s1 + $0x90] sm:$0xff]  }
   0x5   :  { %1025 = vmatpush3.bf16.msra.mxu1 %v1109_v3  ;;  %944 = vmatprep.subr.bf16.mxu0 %v1110_v4  ;;  %v1118_v12 = vld [vmem:[%s1576_s1 + $0x58] sm:$0xff]   ;;  %v1122_v16 = vld [vmem:[%s1576_s1 + $0x60] sm:$0xff]   ;;  %v1126_v20 = vld [vmem:[%s1576_s1 + $0x68] sm:$0xff]  }
   0x6   :  { %1026 = vmatprep.subr.bf16.mxu1 %v1111_v5  ;;  %v1119_v13 = vld [vmem:[%s1576_s1 + $0xd8] sm:$0xff]   ;;  %v1123_v17 = vld [vmem:[%s1576_s1 + $0xe0] sm:$0xff]   ;;  %v1127_v21 = vld [vmem:[%s1576_s1 + $0xe8] sm:$0xff]  }
   0x7   :  { %v1120_v14 = vld [vmem:[%s1576_s1 + $0x18] sm:$0xff]   ;;  %v1124_v18 = vld [vmem:[%s1576_s1 + $0x20] sm:$0xff]   ;;  %v1128_v22 = vld [vmem:[%s1576_s1 + $0x28] sm:$0xff]  }
   0x8   :  { %945 = vmatpush3.bf16.msra.mxu0 %v1112_v6  ;;  %v1121_v15 = vld [vmem:[%s1576_s1 + $0x98] sm:$0xff]   ;;  %v1125_v19 = vld [vmem:[%s1576_s1 + $0xa0] sm:$0xff]   ;;  %v1129_v23 = vld [vmem:[%s1576_s1 + $0xa8] sm:$0xff]  }
   0x9   :  { %1027 = vmatpush3.bf16.msra.mxu1 %v1113_v7  ;;  %946 = vmatprep.subr.bf16.mxu0 %v1114_v8  ;;  %v1130_v24 = vld [vmem:[%s1576_s1 + $0x70] sm:$0xff]   ;;  %v1134_v28 = vld [vmem:[%s1576_s1 + $0x78] sm:$0xff]   ;;  %v55_v6 = vld [vmem:[%s1577_s0 + $0x140] sm:$0x11] }
   0xa   :  { %1028 = vmatprep.subr.bf16.mxu1 %v1115_v9  ;;  %v1131_v25 = vld [vmem:[%s1576_s1 + $0xf0] sm:$0xff]   ;;  %v1135_v29 = vld [vmem:[%s1576_s1 + $0xf8] sm:$0xff]   ;;  %v56_v7 = vld [vmem:[%s1577_s0 + $0x148] sm:$0x11] }
   0xb   :  { %v1132_v26 = vld [vmem:[%s1576_s1 + $0x30] sm:$0xff]   ;;  %v1136_v30 = vld [vmem:[%s1576_s1 + $0x38] sm:$0xff]  }
   0xc   :  { %947 = vmatpush3.bf16.msra.mxu0 %v1116_v10  ;;  %v1133_v27 = vld [vmem:[%s1576_s1 + $0xb0] sm:$0xff]   ;;  %v1137_v31 = vld [vmem:[%s1576_s1 + $0xb8] sm:$0xff]   ;;  %v907_v10 = vcombine.high %v55_v6, %v55_v6 }
   0xd   :  { %1029 = vmatpush3.bf16.msra.mxu1 %v1117_v11  ;;  %948 = vmatprep.subr.bf16.mxu0 %v1118_v12  ;;  %v1138_v32 = vld [vmem:[%s1577_s0] ss:$16 sps:$4 sm:$0xff]   ;;  %v1140_v33 = vld [vmem:[%s1577_s0 + $0x4] ss:$16 sps:$4 sm:$0xff]   ;;  %v1141_v34 = vld [vmem:[%s1577_s0 + $0x8] ss:$16 sps:$4 sm:$0xff]   ;;  %v909_v11 = vcombine.high %v56_v7, %v56_v7  ;;  %v906_v12 = vcombine.low %v55_v6, %v55_v6 }
   0xe   :  { %1030 = vmatprep.subr.bf16.mxu1 %v1119_v13  ;;  %v1143_v35 = vld [vmem:[%s1577_s0 + $0xc] ss:$16 sps:$4 sm:$0xff]   ;;  %559 = vmatprep.mubr.bf16.mxu0 %v1140_v33  ;;  %v1144_v36 = vld [vmem:[%s1577_s0 + $0x24] ss:$16 sps:$4 sm:$0xff]   ;;  %v1148_v38 = vld [vmem:[%s1577_s0 + $0x20] ss:$16 sps:$4 sm:$0xff]   ;;  %v908_v13 = vcombine.low %v56_v7, %v56_v7 }
   0xf   :  { %679 = vmatprep.mubr.bf16.mxu1 %v1143_v35  ;;  %v1146_v37 = vld [vmem:[%s1577_s0 + $0x2c] ss:$16 sps:$4 sm:$0xff]   ;;  %v1149_v39 = vld [vmem:[%s1577_s0 + $0x28] ss:$16 sps:$4 sm:$0xff]   ;;  %v1150_v40 = vld [vmem:[%s1577_s0 + $0x44] ss:$16 sps:$4 sm:$0xff]  }
  0x10   :  { %949 = vmatpush3.bf16.msra.mxu0 %v1120_v14  ;;  %v1152_v41 = vld [vmem:[%s1577_s0 + $0x4c] ss:$16 sps:$4 sm:$0xff]   ;;  %v1154_v42 = vld [vmem:[%s1577_s0 + $0x40] ss:$16 sps:$4 sm:$0xff]   ;;  %v1155_v43 = vld [vmem:[%s1577_s0 + $0x48] ss:$16 sps:$4 sm:$0xff]   ;;  %v768_v14 = vlaneseq }
  0x11   :  { %1031 = vmatpush3.bf16.msra.mxu1 %v1121_v15  ;;  %950 = vmatprep.subr.bf16.mxu0 %v1122_v16  ;;  %v1156_v44 = vld [vmem:[%s1577_s0 + $0x64] ss:$16 sps:$4 sm:$0xff]   ;;  %v1158_v45 = vld [vmem:[%s1577_s0 + $0x6c] ss:$16 sps:$4 sm:$0xff]   ;;  %v1160_v46 = vld [vmem:[%s1577_s0 + $0x60] ss:$16 sps:$4 sm:$0xff]  }
  0x12   :  { %1032 = vmatprep.subr.bf16.mxu1 %v1123_v17  ;;  %v1161_v47 = vld [vmem:[%s1577_s0 + $0x68] ss:$16 sps:$4 sm:$0xff]   ;;  %v1162_v48 = vld [vmem:[%s1577_s0 + $0x84] ss:$16 sps:$4 sm:$0xff]   ;;  %v1164_v49 = vld [vmem:[%s1577_s0 + $0x8c] ss:$16 sps:$4 sm:$0xff]  }
  0x13   :  { %v1166_v50 = vld [vmem:[%s1577_s0 + $0x80] ss:$16 sps:$4 sm:$0xff]   ;;  %v1167_v51 = vld [vmem:[%s1577_s0 + $0x88] ss:$16 sps:$4 sm:$0xff]   ;;  %v1168_v52 = vld [vmem:[%s1577_s0 + $0xa4] ss:$16 sps:$4 sm:$0xff]  }
  0x14   :  { %951 = vmatpush3.bf16.msra.mxu0 %v1124_v18  ;;  %v1170_v53 = vld [vmem:[%s1577_s0 + $0xac] ss:$16 sps:$4 sm:$0xff]   ;;  %v1172_v54 = vld [vmem:[%s1577_s0 + $0xa0] ss:$16 sps:$4 sm:$0xff]   ;;  %v1173_v55 = vld [vmem:[%s1577_s0 + $0xa8] ss:$16 sps:$4 sm:$0xff]  }
  0x15   :  { %1033 = vmatpush3.bf16.msra.mxu1 %v1125_v19  ;;  %952 = vmatprep.subr.bf16.mxu0 %v1126_v20  ;;  %v1174_v56 = vld [vmem:[%s1577_s0 + $0xc4] ss:$16 sps:$4 sm:$0xff]   ;;  %v1176_v57 = vld [vmem:[%s1577_s0 + $0xcc] ss:$16 sps:$4 sm:$0xff]   ;;  %v1178_v58 = vld [vmem:[%s1577_s0 + $0xc0] ss:$16 sps:$4 sm:$0xff]  }
  0x16   :  { %1034 = vmatprep.subr.bf16.mxu1 %v1127_v21  ;;  %v1179_v59 = vld [vmem:[%s1577_s0 + $0xc8] ss:$16 sps:$4 sm:$0xff]   ;;  %v1180_v60 = vld [vmem:[%s1577_s0 + $0xe4] ss:$16 sps:$4 sm:$0xff]   ;;  %v1182_v61 = vld [vmem:[%s1577_s0 + $0xec] ss:$16 sps:$4 sm:$0xff]  }
  0x17   :  { %v1184_v62 = vld [vmem:[%s1577_s0 + $0xe0] ss:$16 sps:$4 sm:$0xff]   ;;  %v1185_v63 = vld [vmem:[%s1577_s0 + $0xe8] ss:$16 sps:$4 sm:$0xff]   ;;  %v1186_v0 = vld [vmem:[%s1577_s0 + $0x104] ss:$16 sps:$4 sm:$0xff]  }
  0x18   :  { %953 = vmatpush3.bf16.msra.mxu0 %v1128_v22  ;;  %v1188_v1 = vld [vmem:[%s1577_s0 + $0x10c] ss:$16 sps:$4 sm:$0xff]   ;;  %v1190_v2 = vld [vmem:[%s1577_s0 + $0x100] ss:$16 sps:$4 sm:$0xff]   ;;  %v1191_v3 = vld [vmem:[%s1577_s0 + $0x108] ss:$16 sps:$4 sm:$0xff]  }
  0x19   :  { %1035 = vmatpush3.bf16.msra.mxu1 %v1129_v23  ;;  %954 = vmatprep.subr.bf16.mxu0 %v1130_v24  ;;  %v1192_v4 = vld [vmem:[%s1577_s0 + $0x124] ss:$16 sps:$4 sm:$0xff]   ;;  %v1194_v5 = vld [vmem:[%s1577_s0 + $0x12c] ss:$16 sps:$4 sm:$0xff]   ;;  %v1196_v8 = vld [vmem:[%s1577_s0 + $0x120] ss:$16 sps:$4 sm:$0xff]  }
  0x1a   :  { %1036 = vmatprep.subr.bf16.mxu1 %v1131_v25  ;;  %v1197_v9 = vld [vmem:[%s1577_s0 + $0x128] ss:$16 sps:$4 sm:$0xff]   ;;  %v769_v15 = vshrl.u32 %v768_v14, 7  ;;  %v767_v18 = vld [vmem:[%s1578_s2] sm:$0x3] }
  0x1c   :  { %955 = vmatpush3.bf16.msra.mxu0 %v1132_v26  ;;  %v770_v16 = vsub.s32 0, %v769_v15  ;;  %v795_v21 = vsub.s32 1, %v769_v15 }
  0x1d   :  { %1037 = vmatpush3.bf16.msra.mxu1 %v1133_v27  ;;  %956 = vmatprep.subr.bf16.mxu0 %v1134_v28 }
  0x1e   :  { %1038 = vmatprep.subr.bf16.mxu1 %v1135_v29  ;;  %v1447_v26 = vrot.slane %v767_v18, %v770_v16 }
  0x20   :  { %957 = vmatpush3.bf16.msra.mxu0 %v1136_v30 }
  0x21   :  { %1039 = vmatpush3.bf16.msra.mxu1 %v1137_v31 }
  0x23   :  { %560 = vmatmul.mubr.bf16.vlgmr.msra.gmra.mrb[0].mxu0 %v1138_v32  ;;  %v1449_v32 = vrot.slane %v767_v18, %v795_v21 }
  0x24   :  { %680 = vmatmul.mubr.bf16.vlgmr.msra.gmra.mrb[0].mxu1 %v1141_v34  ;;  %567 = vmatprep.mubr.bf16.mxu0 %v1144_v36 }
  0x25   :  { %687 = vmatprep.mubr.bf16.mxu1 %v1146_v37 }
  0x2b   :  { %568 = vmatmul.mubr.bf16.gmra.mrb[4].mxu0 %v1148_v38 }
  0x2c   :  { %688 = vmatmul.mubr.bf16.gmra.mrb[4].mxu1 %v1149_v39  ;;  %575 = vmatprep.mubr.bf16.mxu0 %v1150_v40 }
  0x2d   :  { %695 = vmatprep.mubr.bf16.mxu1 %v1152_v41 }
  0x33   :  { %576 = vmatmul.mubr.bf16.gmra.mrb[8].mxu0 %v1154_v42 }
  0x34   :  { %696 = vmatmul.mubr.bf16.gmra.mrb[8].mxu1 %v1155_v43  ;;  %583 = vmatprep.mubr.bf16.mxu0 %v1156_v44 }
  0x35   :  { %703 = vmatprep.mubr.bf16.mxu1 %v1158_v45 }
  0x3b   :  { %584 = vmatmul.mubr.bf16.gmra.mrb[12].mxu0 %v1160_v46 }
  0x3c   :  { %704 = vmatmul.mubr.bf16.gmra.mrb[12].mxu1 %v1161_v47  ;;  %591 = vmatprep.mubr.bf16.mxu0 %v1162_v48 }
  0x3d   :  { %711 = vmatprep.mubr.bf16.mxu1 %v1164_v49 }
  0x43   :  { %592 = vmatmul.mubr.bf16.gmra.mrb[16].mxu0 %v1166_v50 }
  0x44   :  { %712 = vmatmul.mubr.bf16.gmra.mrb[16].mxu1 %v1167_v51  ;;  %599 = vmatprep.mubr.bf16.mxu0 %v1168_v52 }
  0x45   :  { %719 = vmatprep.mubr.bf16.mxu1 %v1170_v53 }
  0x4b   :  { %600 = vmatmul.mubr.bf16.gmra.mrb[20].mxu0 %v1172_v54 }
  0x4c   :  { %720 = vmatmul.mubr.bf16.gmra.mrb[20].mxu1 %v1173_v55  ;;  %607 = vmatprep.mubr.bf16.mxu0 %v1174_v56 }
  0x4d   :  { %727 = vmatprep.mubr.bf16.mxu1 %v1176_v57 }
  0x53   :  { %608 = vmatmul.mubr.bf16.gmra.mrb[24].mxu0 %v1178_v58 }
  0x54   :  { %728 = vmatmul.mubr.bf16.gmra.mrb[24].mxu1 %v1179_v59  ;;  %615 = vmatprep.mubr.bf16.mxu0 %v1180_v60 }
  0x55   :  { %735 = vmatprep.mubr.bf16.mxu1 %v1182_v61 }
  0x5b   :  { %616 = vmatmul.mubr.bf16.gmra.mrb[28].mxu0 %v1184_v62 }
  0x5c   :  { %736 = vmatmul.mubr.bf16.gmra.mrb[28].mxu1 %v1185_v63  ;;  %623 = vmatprep.mubr.bf16.mxu0 %v1186_v0 }
  0x5d   :  { %743 = vmatprep.mubr.bf16.mxu1 %v1188_v1 }
  0x63   :  { %624 = vmatmul.mubr.bf16.gmra.mrb[32].mxu0 %v1190_v2 }
  0x64   :  { %744 = vmatmul.mubr.bf16.gmra.mrb[32].mxu1 %v1191_v3  ;;  %631 = vmatprep.mubr.bf16.mxu0 %v1192_v4 }
  0x65   :  { %751 = vmatprep.mubr.bf16.mxu1 %v1194_v5 }
  0x6b   :  { %632 = vmatmul.mubr.bf16.gmra.mrb[36].mxu0 %v1196_v8 }
  0x6c   :  { %752 = vmatmul.mubr.bf16.gmra.mrb[36].mxu1 %v1197_v9  ;;  %639 = vmatprep.mubr.bf16.mxu0 %v907_v10 }
  0x6d   :  { %759 = vmatprep.mubr.bf16.mxu1 %v909_v11 }
  0x73   :  { %640 = vmatmul.mubr.bf16.gmra.mrb[40].mxu0 %v906_v12 }
  0x74   :  { %760 = vmatmul.mubr.bf16.gmra.mrb[40].mxu1 %v908_v13 }
  0xf6   :  { %v958_v17 = vpop.f32.mrb[0].mxu0 }
  0xf7   :  { %v1040_v19 = vpop.f32.mrb[0].mxu1  ;;  %v959_v20 = vpop.f32.mrb[1].mxu0 }
  0xf8   :  { %v960_v22 = vadd.f32 %v959_v20, %v958_v17  ;;  %v1041_v23 = vpop.f32.mrb[1].mxu1  ;;  %v961_v24 = vpop.f32.mrb[2].mxu0 }
  0xf9   :  { %v1042_v25 = vadd.f32 %v1041_v23, %v1040_v19  ;;  %v1043_v27 = vpop.f32.mrb[2].mxu1  ;;  %v962_v28 = vpop.f32.mrb[3].mxu0 }
  0xfa   :  { %v963_v29 = vadd.f32 %v962_v28, %v961_v24  ;;  %v1044_v30 = vpop.f32.mrb[3].mxu1 }
  0xfb   :  { %v682_v31 = vadd.f32 %v1042_v25, %v960_v22  ;;  %v1045_v33 = vadd.f32 %v1044_v30, %v1043_v27 }
  0xfd   :  { %v772_v34 = vmul.f32 %v1447_v26, %v682_v31  ;;  %v685_v35 = vadd.f32 %v1045_v33, %v963_v29 }
  0xfe   :  { %v964_v36 = vpop.f32.mrb[4].mxu0 }
  0xff   :  { %v797_v37 = vadd.f32 %v1449_v32, %v772_v34  ;;  %v773_v38 = vmul.f32 %v1447_v26, %v685_v35  ;;  %v1046_v39 = vpop.f32.mrb[4].mxu1  ;;  %v965_v40 = vpop.f32.mrb[5].mxu0 }
 0x100   :  { %v966_v41 = vadd.f32 %v965_v40, %v964_v36  ;;  %v1047_v42 = vpop.f32.mrb[5].mxu1  ;;  %v967_v43 = vpop.f32.mrb[6].mxu0 }
 0x101   :  { %v818_v44 = vmax.f32 %v797_v37, 0.0  ;;  %v798_v45 = vadd.f32 %v1449_v32, %v773_v38  ;;  %v1048_v46 = vadd.f32 %v1047_v42, %v1046_v39  ;;  %v1049_v47 = vpop.f32.mrb[6].mxu1  ;;  %v968_v48 = vpop.f32.mrb[7].mxu0 }
 0x102   :  { %v969_v49 = vadd.f32 %v968_v48, %v967_v43  ;;  %v1050_v50 = vpop.f32.mrb[7].mxu1 }
 0x103   :  { %840 = vst.msk [vmem:[%s1579_s3] sm:$0xff] %vm839_vm0, %v818_v44  ;;  %v819_v51 = vmax.f32 %v798_v45, 0.0  ;;  %v690_v52 = vadd.f32 %v1048_v46, %v966_v41  ;;  %v1051_v53 = vadd.f32 %v1050_v50, %v1049_v47 }
 0x105   :  { %841 = vst.msk [vmem:[%s1579_s3 + $0x8] sm:$0xff] %vm839_vm0, %v819_v51  ;;  %v774_v54 = vmul.f32 %v1447_v26, %v690_v52  ;;  %v693_v55 = vadd.f32 %v1051_v53, %v969_v49 }
 0x106   :  { %v970_v56 = vpop.f32.mrb[8].mxu0 }
 0x107   :  { %v799_v57 = vadd.f32 %v1449_v32, %v774_v54  ;;  %v775_v58 = vmul.f32 %v1447_v26, %v693_v55  ;;  %v1052_v59 = vpop.f32.mrb[8].mxu1  ;;  %v971_v60 = vpop.f32.mrb[9].mxu0 }
 0x108   :  { %v972_v61 = vadd.f32 %v971_v60, %v970_v56  ;;  %v1053_v62 = vpop.f32.mrb[9].mxu1  ;;  %v973_v63 = vpop.f32.mrb[10].mxu0 }
 0x109   :  { %v820_v0 = vmax.f32 %v799_v57, 0.0  ;;  %v800_v1 = vadd.f32 %v1449_v32, %v775_v58  ;;  %v1054_v2 = vadd.f32 %v1053_v62, %v1052_v59  ;;  %v1055_v3 = vpop.f32.mrb[10].mxu1  ;;  %v974_v4 = vpop.f32.mrb[11].mxu0 }
 0x10a   :  { %v975_v5 = vadd.f32 %v974_v4, %v973_v63  ;;  %v1056_v6 = vpop.f32.mrb[11].mxu1 }
 0x10b   :  { %842 = vst.msk [vmem:[%s1579_s3 + $0x10] sm:$0xff] %vm839_vm0, %v820_v0  ;;  %v821_v7 = vmax.f32 %v800_v1, 0.0  ;;  %v698_v8 = vadd.f32 %v1054_v2, %v972_v61  ;;  %v1057_v9 = vadd.f32 %v1056_v6, %v1055_v3 }
 0x10d   :  { %843 = vst.msk [vmem:[%s1579_s3 + $0x18] sm:$0xff] %vm839_vm0, %v821_v7  ;;  %v776_v10 = vmul.f32 %v1447_v26, %v698_v8  ;;  %v701_v11 = vadd.f32 %v1057_v9, %v975_v5 }
 0x10e   :  { %v976_v12 = vpop.f32.mrb[12].mxu0 }
 0x10f   :  { %v801_v13 = vadd.f32 %v1449_v32, %v776_v10  ;;  %v777_v14 = vmul.f32 %v1447_v26, %v701_v11  ;;  %v1058_v15 = vpop.f32.mrb[12].mxu1  ;;  %v977_v16 = vpop.f32.mrb[13].mxu0 }
 0x110   :  { %v978_v17 = vadd.f32 %v977_v16, %v976_v12  ;;  %v1059_v18 = vpop.f32.mrb[13].mxu1  ;;  %v979_v19 = vpop.f32.mrb[14].mxu0 }
 0x111   :  { %v822_v20 = vmax.f32 %v801_v13, 0.0  ;;  %v802_v21 = vadd.f32 %v1449_v32, %v777_v14  ;;  %v1060_v22 = vadd.f32 %v1059_v18, %v1058_v15  ;;  %v1061_v23 = vpop.f32.mrb[14].mxu1  ;;  %v980_v24 = vpop.f32.mrb[15].mxu0 }
 0x112   :  { %v981_v25 = vadd.f32 %v980_v24, %v979_v19  ;;  %v1062_v27 = vpop.f32.mrb[15].mxu1 }
 0x113   :  { %844 = vst.msk [vmem:[%s1579_s3 + $0x20] sm:$0xff] %vm839_vm0, %v822_v20  ;;  %v823_v28 = vmax.f32 %v802_v21, 0.0  ;;  %v706_v29 = vadd.f32 %v1060_v22, %v978_v17  ;;  %v1063_v30 = vadd.f32 %v1062_v27, %v1061_v23 }
 0x115   :  { %845 = vst.msk [vmem:[%s1579_s3 + $0x28] sm:$0xff] %vm839_vm0, %v823_v28  ;;  %v778_v31 = vmul.f32 %v1447_v26, %v706_v29  ;;  %v709_v33 = vadd.f32 %v1063_v30, %v981_v25 }
 0x116   :  { %v982_v34 = vpop.f32.mrb[16].mxu0 }
 0x117   :  { %v803_v35 = vadd.f32 %v1449_v32, %v778_v31  ;;  %v779_v36 = vmul.f32 %v1447_v26, %v709_v33  ;;  %v1064_v37 = vpop.f32.mrb[16].mxu1  ;;  %v983_v38 = vpop.f32.mrb[17].mxu0 }
 0x118   :  { %v984_v39 = vadd.f32 %v983_v38, %v982_v34  ;;  %v1065_v40 = vpop.f32.mrb[17].mxu1  ;;  %v985_v41 = vpop.f32.mrb[18].mxu0 }
 0x119   :  { %v824_v42 = vmax.f32 %v803_v35, 0.0  ;;  %v804_v43 = vadd.f32 %v1449_v32, %v779_v36  ;;  %v1066_v44 = vadd.f32 %v1065_v40, %v1064_v37  ;;  %v1067_v45 = vpop.f32.mrb[18].mxu1  ;;  %v986_v46 = vpop.f32.mrb[19].mxu0 }
 0x11a   :  { %v987_v47 = vadd.f32 %v986_v46, %v985_v41  ;;  %v1068_v48 = vpop.f32.mrb[19].mxu1 }
 0x11b   :  { %846 = vst.msk [vmem:[%s1579_s3 + $0x30] sm:$0xff] %vm839_vm0, %v824_v42  ;;  %v825_v49 = vmax.f32 %v804_v43, 0.0  ;;  %v714_v50 = vadd.f32 %v1066_v44, %v984_v39  ;;  %v1069_v51 = vadd.f32 %v1068_v48, %v1067_v45 }
 0x11d   :  { %847 = vst.msk [vmem:[%s1579_s3 + $0x38] sm:$0xff] %vm839_vm0, %v825_v49  ;;  %v780_v52 = vmul.f32 %v1447_v26, %v714_v50  ;;  %v717_v53 = vadd.f32 %v1069_v51, %v987_v47 }
 0x11e   :  { %v988_v54 = vpop.f32.mrb[20].mxu0 }
 0x11f   :  { %v805_v55 = vadd.f32 %v1449_v32, %v780_v52  ;;  %v781_v56 = vmul.f32 %v1447_v26, %v717_v53  ;;  %v1070_v57 = vpop.f32.mrb[20].mxu1  ;;  %v989_v58 = vpop.f32.mrb[21].mxu0 }
 0x120   :  { %v990_v59 = vadd.f32 %v989_v58, %v988_v54  ;;  %v1071_v60 = vpop.f32.mrb[21].mxu1  ;;  %v991_v61 = vpop.f32.mrb[22].mxu0 }
 0x121   :  { %v826_v62 = vmax.f32 %v805_v55, 0.0  ;;  %v806_v63 = vadd.f32 %v1449_v32, %v781_v56  ;;  %v1072_v0 = vadd.f32 %v1071_v60, %v1070_v57  ;;  %v1073_v1 = vpop.f32.mrb[22].mxu1  ;;  %v992_v2 = vpop.f32.mrb[23].mxu0 }
 0x122   :  { %v993_v3 = vadd.f32 %v992_v2, %v991_v61  ;;  %v1074_v4 = vpop.f32.mrb[23].mxu1 }
 0x123   :  { %848 = vst.msk [vmem:[%s1579_s3 + $0x40] sm:$0xff] %vm839_vm0, %v826_v62  ;;  %v827_v5 = vmax.f32 %v806_v63, 0.0  ;;  %v722_v6 = vadd.f32 %v1072_v0, %v990_v59  ;;  %v1075_v7 = vadd.f32 %v1074_v4, %v1073_v1 }
 0x125   :  { %849 = vst.msk [vmem:[%s1579_s3 + $0x48] sm:$0xff] %vm839_vm0, %v827_v5  ;;  %v782_v8 = vmul.f32 %v1447_v26, %v722_v6  ;;  %v725_v9 = vadd.f32 %v1075_v7, %v993_v3 }
 0x126   :  { %v994_v10 = vpop.f32.mrb[24].mxu0 }
 0x127   :  { %v807_v11 = vadd.f32 %v1449_v32, %v782_v8  ;;  %v783_v12 = vmul.f32 %v1447_v26, %v725_v9  ;;  %v1076_v13 = vpop.f32.mrb[24].mxu1  ;;  %v995_v14 = vpop.f32.mrb[25].mxu0 }
 0x128   :  { %v996_v15 = vadd.f32 %v995_v14, %v994_v10  ;;  %v1077_v16 = vpop.f32.mrb[25].mxu1  ;;  %v997_v17 = vpop.f32.mrb[26].mxu0 }
 0x129   :  { %v828_v18 = vmax.f32 %v807_v11, 0.0  ;;  %v808_v19 = vadd.f32 %v1449_v32, %v783_v12  ;;  %v1078_v20 = vadd.f32 %v1077_v16, %v1076_v13  ;;  %v1079_v21 = vpop.f32.mrb[26].mxu1  ;;  %v998_v22 = vpop.f32.mrb[27].mxu0 }
 0x12a   :  { %v999_v23 = vadd.f32 %v998_v22, %v997_v17  ;;  %v1080_v24 = vpop.f32.mrb[27].mxu1 }
 0x12b   :  { %850 = vst.msk [vmem:[%s1579_s3 + $0x50] sm:$0xff] %vm839_vm0, %v828_v18  ;;  %v829_v25 = vmax.f32 %v808_v19, 0.0  ;;  %v730_v27 = vadd.f32 %v1078_v20, %v996_v15  ;;  %v1081_v28 = vadd.f32 %v1080_v24, %v1079_v21 }
 0x12d   :  { %851 = vst.msk [vmem:[%s1579_s3 + $0x58] sm:$0xff] %vm839_vm0, %v829_v25  ;;  %v784_v29 = vmul.f32 %v1447_v26, %v730_v27  ;;  %v733_v30 = vadd.f32 %v1081_v28, %v999_v23 }
 0x12e   :  { %v1000_v31 = vpop.f32.mrb[28].mxu0 }
 0x12f   :  { %v809_v33 = vadd.f32 %v1449_v32, %v784_v29  ;;  %v785_v34 = vmul.f32 %v1447_v26, %v733_v30  ;;  %v1082_v35 = vpop.f32.mrb[28].mxu1  ;;  %v1001_v36 = vpop.f32.mrb[29].mxu0 }
 0x130   :  { %v1002_v37 = vadd.f32 %v1001_v36, %v1000_v31  ;;  %v1083_v38 = vpop.f32.mrb[29].mxu1  ;;  %v1003_v39 = vpop.f32.mrb[30].mxu0 }
 0x131   :  { %v830_v40 = vmax.f32 %v809_v33, 0.0  ;;  %v810_v41 = vadd.f32 %v1449_v32, %v785_v34  ;;  %v1084_v42 = vadd.f32 %v1083_v38, %v1082_v35  ;;  %v1085_v43 = vpop.f32.mrb[30].mxu1  ;;  %v1004_v44 = vpop.f32.mrb[31].mxu0 }
 0x132   :  { %v1005_v45 = vadd.f32 %v1004_v44, %v1003_v39  ;;  %v1086_v46 = vpop.f32.mrb[31].mxu1 }
 0x133   :  { %852 = vst.msk [vmem:[%s1579_s3 + $0x60] sm:$0xff] %vm839_vm0, %v830_v40  ;;  %v831_v47 = vmax.f32 %v810_v41, 0.0  ;;  %v738_v48 = vadd.f32 %v1084_v42, %v1002_v37  ;;  %v1087_v49 = vadd.f32 %v1086_v46, %v1085_v43 }
 0x135   :  { %853 = vst.msk [vmem:[%s1579_s3 + $0x68] sm:$0xff] %vm839_vm0, %v831_v47  ;;  %v786_v50 = vmul.f32 %v1447_v26, %v738_v48  ;;  %v741_v51 = vadd.f32 %v1087_v49, %v1005_v45 }
 0x136   :  { %v1006_v52 = vpop.f32.mrb[32].mxu0 }
 0x137   :  { %v811_v53 = vadd.f32 %v1449_v32, %v786_v50  ;;  %v787_v54 = vmul.f32 %v1447_v26, %v741_v51  ;;  %v1088_v55 = vpop.f32.mrb[32].mxu1  ;;  %v1007_v56 = vpop.f32.mrb[33].mxu0 }
 0x138   :  { %v1008_v57 = vadd.f32 %v1007_v56, %v1006_v52  ;;  %v1089_v58 = vpop.f32.mrb[33].mxu1  ;;  %v1009_v59 = vpop.f32.mrb[34].mxu0 }
 0x139   :  { %v832_v60 = vmax.f32 %v811_v53, 0.0  ;;  %v812_v61 = vadd.f32 %v1449_v32, %v787_v54  ;;  %v1090_v62 = vadd.f32 %v1089_v58, %v1088_v55  ;;  %v1091_v63 = vpop.f32.mrb[34].mxu1  ;;  %v1010_v0 = vpop.f32.mrb[35].mxu0 }
 0x13a   :  { %v1011_v1 = vadd.f32 %v1010_v0, %v1009_v59  ;;  %v1092_v2 = vpop.f32.mrb[35].mxu1 }
 0x13b   :  { %854 = vst.msk [vmem:[%s1579_s3 + $0x70] sm:$0xff] %vm839_vm0, %v832_v60  ;;  %v833_v3 = vmax.f32 %v812_v61, 0.0  ;;  %v746_v4 = vadd.f32 %v1090_v62, %v1008_v57  ;;  %v1093_v5 = vadd.f32 %v1092_v2, %v1091_v63 }
 0x13d   :  { %855 = vst.msk [vmem:[%s1579_s3 + $0x78] sm:$0xff] %vm839_vm0, %v833_v3  ;;  %v788_v6 = vmul.f32 %v1447_v26, %v746_v4  ;;  %v749_v7 = vadd.f32 %v1093_v5, %v1011_v1 }
 0x13e   :  { %v1012_v8 = vpop.f32.mrb[36].mxu0 }
 0x13f   :  { %v813_v9 = vadd.f32 %v1449_v32, %v788_v6  ;;  %v789_v10 = vmul.f32 %v1447_v26, %v749_v7  ;;  %v1094_v11 = vpop.f32.mrb[36].mxu1  ;;  %v1013_v12 = vpop.f32.mrb[37].mxu0 }
 0x140   :  { %v1014_v13 = vadd.f32 %v1013_v12, %v1012_v8  ;;  %v1095_v14 = vpop.f32.mrb[37].mxu1  ;;  %v1015_v15 = vpop.f32.mrb[38].mxu0 }
 0x141   :  { %v834_v16 = vmax.f32 %v813_v9, 0.0  ;;  %v814_v17 = vadd.f32 %v1449_v32, %v789_v10  ;;  %v1096_v18 = vadd.f32 %v1095_v14, %v1094_v11  ;;  %v1097_v19 = vpop.f32.mrb[38].mxu1  ;;  %v1016_v20 = vpop.f32.mrb[39].mxu0 }
 0x142   :  { %v1017_v21 = vadd.f32 %v1016_v20, %v1015_v15  ;;  %v1098_v22 = vpop.f32.mrb[39].mxu1 }
 0x143   :  { %856 = vst.msk [vmem:[%s1579_s3 + $0x80] sm:$0xff] %vm839_vm0, %v834_v16  ;;  %v835_v23 = vmax.f32 %v814_v17, 0.0  ;;  %v754_v24 = vadd.f32 %v1096_v18, %v1014_v13  ;;  %v1099_v25 = vadd.f32 %v1098_v22, %v1097_v19 }
 0x145   :  { %857 = vst.msk [vmem:[%s1579_s3 + $0x88] sm:$0xff] %vm839_vm0, %v835_v23  ;;  %v790_v27 = vmul.f32 %v1447_v26, %v754_v24  ;;  %v757_v28 = vadd.f32 %v1099_v25, %v1017_v21 }
 0x146   :  { %v1018_v29 = vpop.f32.mrb[40].mxu0 }
 0x147   :  { %v815_v30 = vadd.f32 %v1449_v32, %v790_v27  ;;  %v791_v31 = vmul.f32 %v1447_v26, %v757_v28  ;;  %v1100_v33 = vpop.f32.mrb[40].mxu1  ;;  %v1019_v34 = vpop.f32.mrb[41].mxu0 }
 0x148   :  { %v1020_v35 = vadd.f32 %v1019_v34, %v1018_v29  ;;  %v1101_v36 = vpop.f32.mrb[41].mxu1  ;;  %v1021_v37 = vpop.f32.mrb[42].mxu0 }
 0x149   :  { %v836_v38 = vmax.f32 %v815_v30, 0.0  ;;  %v816_v39 = vadd.f32 %v1449_v32, %v791_v31  ;;  %v1102_v40 = vadd.f32 %v1101_v36, %v1100_v33  ;;  %v1103_v41 = vpop.f32.mrb[42].mxu1  ;;  %v1022_v42 = vpop.f32.mrb[43].mxu0 }
 0x14a   :  { %v1104_v43 = vpop.f32.mrb[43].mxu1 }
 0x14b   :  { %858 = vst.msk [vmem:[%s1579_s3 + $0x90] sm:$0xff] %vm839_vm0, %v836_v38  ;;  %v837_v44 = vmax.f32 %v816_v39, 0.0  ;;  %v762_v45 = vadd.f32 %v1102_v40, %v1020_v35 }
 0x14d   :  { %859 = vst.msk [vmem:[%s1579_s3 + $0x98] sm:$0xff] %vm839_vm0, %v837_v44  ;;  %v792_v46 = vmul.f32 %v1447_v26, %v762_v45 }
 0x14f   :  { %v817_v47 = vadd.f32 %v1449_v32, %v792_v46 }
 0x151   :  { %v838_v48 = vmax.f32 %v817_v47, 0.0 }
 0x153   :  { %861 = vst.msk [vmem:[%s1579_s3 + $0xa0] sm:$0x3] %vm860_vm1, %v838_v48 }

// kernel: cnn_base_forward.6
= control target key start
LH: loop header
LB: loop body
LE: loop exit
PB: predicated region body
PF: predicated region fallthrough
CT: control target
= control target key end

     0   :  { %v1194_v34 = vmov 0.0   ;;  %vm1195_vm0 = vmmov 0   ;;  %vm509_vm1 = vcmask 523264   ;;  %s1548_s1 = inlined_call_operand.vmem [shape: bf16[576,128], index: 1, kind: input, shape index: {}]   ;;  %s1549_s0 = inlined_call_operand.vmem [shape: bf16[98,576], index: 0, kind: input, shape index: {}]   ;;  %s1550_s2 = inlined_call_operand.vmem [shape: f32[2,128], index: 2, kind: input, shape index: {}]   ;;  %s1551_s3 = inlined_call_operand.vmem [shape: f32[98,128], index: 3, kind: output, shape index: {}]  }
   0x1   :  { %v1111_v0 = vld [vmem:[%s1548_s1 + $0x40] sm:$0xff]   ;;  %v1115_v4 = vld [vmem:[%s1548_s1 + $0x48] sm:$0xff]   ;;  %v1119_v8 = vld [vmem:[%s1548_s1 + $0x50] sm:$0xff]  }
   0x2   :  { %v1112_v1 = vld [vmem:[%s1548_s1 + $0xc0] sm:$0xff]   ;;  %938 = vmatprep.subr.bf16.mxu0 %v1111_v0  ;;  %v1116_v5 = vld [vmem:[%s1548_s1 + $0xc8] sm:$0xff]   ;;  %v1120_v9 = vld [vmem:[%s1548_s1 + $0xd0] sm:$0xff]  }
   0x3   :  { %v1113_v2 = vld [vmem:[%s1548_s1] sm:$0xff]   ;;  %996 = vmatprep.subr.bf16.mxu1 %v1112_v1  ;;  %v1117_v6 = vld [vmem:[%s1548_s1 + $0x8] sm:$0xff]   ;;  %v1121_v10 = vld [vmem:[%s1548_s1 + $0x10] sm:$0xff]  }
   0x4   :  { %v1114_v3 = vld [vmem:[%s1548_s1 + $0x80] sm:$0xff]   ;;  %939 = vmatpush3.bf16.msra.mxu0 %v1113_v2  ;;  %v1118_v7 = vld [vmem:[%s1548_s1 + $0x88] sm:$0xff]   ;;  %v1122_v11 = vld [vmem:[%s1548_s1 + $0x90] sm:$0xff]  }
   0x5   :  { %997 = vmatpush3.bf16.msra.mxu1 %v1114_v3  ;;  %940 = vmatprep.subr.bf16.mxu0 %v1115_v4  ;;  %v1123_v12 = vld [vmem:[%s1548_s1 + $0x58] sm:$0xff]   ;;  %v1127_v16 = vld [vmem:[%s1548_s1 + $0x60] sm:$0xff]   ;;  %v1131_v20 = vld [vmem:[%s1548_s1 + $0x68] sm:$0xff]  }
   0x6   :  { %998 = vmatprep.subr.bf16.mxu1 %v1116_v5  ;;  %v1124_v13 = vld [vmem:[%s1548_s1 + $0xd8] sm:$0xff]   ;;  %v1128_v17 = vld [vmem:[%s1548_s1 + $0xe0] sm:$0xff]   ;;  %v1132_v21 = vld [vmem:[%s1548_s1 + $0xe8] sm:$0xff]  }
   0x7   :  { %v1125_v14 = vld [vmem:[%s1548_s1 + $0x18] sm:$0xff]   ;;  %v1129_v18 = vld [vmem:[%s1548_s1 + $0x20] sm:$0xff]   ;;  %v1133_v22 = vld [vmem:[%s1548_s1 + $0x28] sm:$0xff]  }
   0x8   :  { %941 = vmatpush3.bf16.msra.mxu0 %v1117_v6  ;;  %v1126_v15 = vld [vmem:[%s1548_s1 + $0x98] sm:$0xff]   ;;  %v1130_v19 = vld [vmem:[%s1548_s1 + $0xa0] sm:$0xff]   ;;  %v1134_v23 = vld [vmem:[%s1548_s1 + $0xa8] sm:$0xff]  }
   0x9   :  { %999 = vmatpush3.bf16.msra.mxu1 %v1118_v7  ;;  %942 = vmatprep.subr.bf16.mxu0 %v1119_v8  ;;  %v1135_v24 = vld [vmem:[%s1548_s1 + $0x70] sm:$0xff]   ;;  %v1139_v28 = vld [vmem:[%s1548_s1 + $0x78] sm:$0xff]   ;;  %v1148_v36 = vld [vmem:[%s1549_s0 + $0xc] ss:$20 sps:$4 sm:$0xff]  }
   0xa   :  { %1000 = vmatprep.subr.bf16.mxu1 %v1120_v9  ;;  %v1136_v25 = vld [vmem:[%s1548_s1 + $0xf0] sm:$0xff]   ;;  %v1140_v29 = vld [vmem:[%s1548_s1 + $0xf8] sm:$0xff]   ;;  %v1149_v37 = vld [vmem:[%s1548_s1 + $0x100] sm:$0xff]   ;;  %651 = vmatprep.mubr.bf16.mxu1 %v1148_v36 }
   0xb   :  { %v1137_v26 = vld [vmem:[%s1548_s1 + $0x30] sm:$0xff]   ;;  %v1141_v30 = vld [vmem:[%s1548_s1 + $0x38] sm:$0xff]   ;;  %v1150_v38 = vld [vmem:[%s1549_s0 + $0x2c] ss:$20 sps:$4 sm:$0xff]  }
   0xc   :  { %943 = vmatpush3.bf16.msra.mxu0 %v1121_v10  ;;  %v1138_v27 = vld [vmem:[%s1548_s1 + $0xb0] sm:$0xff]   ;;  %v1142_v31 = vld [vmem:[%s1548_s1 + $0xb8] sm:$0xff]   ;;  %v1160_v43 = vld [vmem:[%s1548_s1 + $0x108] sm:$0xff]  }
   0xd   :  { %1001 = vmatpush3.bf16.msra.mxu1 %v1122_v11  ;;  %944 = vmatprep.subr.bf16.mxu0 %v1123_v12  ;;  %v1143_v32 = vld [vmem:[%s1549_s0] ss:$20 sps:$4 sm:$0xff]   ;;  %v1145_v33 = vld [vmem:[%s1549_s0 + $0x4] ss:$20 sps:$4 sm:$0xff]   ;;  %v1146_v35 = vld [vmem:[%s1549_s0 + $0x8] ss:$20 sps:$4 sm:$0xff]  }
   0xe   :  { %1002 = vmatprep.subr.bf16.mxu1 %v1124_v13  ;;  %563 = vmatprep.mubr.bf16.mxu0 %v1145_v33  ;;  %v1152_v39 = vld [vmem:[%s1549_s0 + $0x34] ss:$20 sps:$4 sm:$0xff]   ;;  %v1155_v41 = vld [vmem:[%s1549_s0 + $0x30] ss:$20 sps:$4 sm:$0xff]   ;;  %v1162_v47 = vld [vmem:[%s1549_s0 + $0x58] ss:$20 sps:$4 sm:$0xff]  }
   0xf   :  { %v1154_v40 = vld [vmem:[%s1549_s0 + $0x28] ss:$20 sps:$4 sm:$0xff]   ;;  %v1169_v45 = vld [vmem:[%s1548_s1 + $0x110] sm:$0xff]   ;;  %v1165_v49 = vld [vmem:[%s1549_s0 + $0x84] ss:$20 sps:$4 sm:$0xff]  }
  0x10   :  { %945 = vmatpush3.bf16.msra.mxu0 %v1125_v14  ;;  %v1156_v42 = vld [vmem:[%s1549_s0 + $0x54] ss:$20 sps:$4 sm:$0xff]   ;;  %v1158_v44 = vld [vmem:[%s1549_s0 + $0x5c] ss:$20 sps:$4 sm:$0xff]   ;;  %v1167_v51 = vld [vmem:[%s1549_s0 + $0x78] ss:$20 sps:$4 sm:$0xff]  }
  0x11   :  { %1003 = vmatpush3.bf16.msra.mxu1 %v1126_v15  ;;  %946 = vmatprep.subr.bf16.mxu0 %v1127_v16  ;;  %v1161_v46 = vld [vmem:[%s1549_s0 + $0x50] ss:$20 sps:$4 sm:$0xff]   ;;  %v1182_v50 = vld [vmem:[%s1548_s1 + $0x118] sm:$0xff]   ;;  %v1168_v52 = vld [vmem:[%s1549_s0 + $0x80] ss:$20 sps:$4 sm:$0xff]  }
  0x12   :  { %1004 = vmatprep.subr.bf16.mxu1 %v1128_v17  ;;  %v1163_v48 = vld [vmem:[%s1549_s0 + $0x7c] ss:$20 sps:$4 sm:$0xff]   ;;  %v1170_v53 = vld [vmem:[%s1549_s0 + $0xa4] ss:$20 sps:$4 sm:$0xff]   ;;  %v1172_v54 = vld [vmem:[%s1549_s0 + $0xac] ss:$20 sps:$4 sm:$0xff]  }
  0x13   :  { %v1174_v55 = vld [vmem:[%s1549_s0 + $0xa0] ss:$20 sps:$4 sm:$0xff]   ;;  %v1175_v56 = vld [vmem:[%s1549_s0 + $0xa8] ss:$20 sps:$4 sm:$0xff]   ;;  %v1181_v62 = vld [vmem:[%s1549_s0 + $0xd0] ss:$20 sps:$4 sm:$0xff]  }
  0x14   :  { %947 = vmatpush3.bf16.msra.mxu0 %v1129_v18  ;;  %v1176_v57 = vld [vmem:[%s1549_s0 + $0xcc] ss:$20 sps:$4 sm:$0xff]   ;;  %v1178_v58 = vld [vmem:[%s1549_s0 + $0xd4] ss:$20 sps:$4 sm:$0xff]   ;;  %v52_v60 = vld [vmem:[%s1549_s0 + $0xf8] sm:$0x11] }
  0x15   :  { %1005 = vmatpush3.bf16.msra.mxu1 %v1130_v19  ;;  %948 = vmatprep.subr.bf16.mxu0 %v1131_v20  ;;  %v51_v59 = vld [vmem:[%s1549_s0 + $0xf0] sm:$0x11]  ;;  %v1180_v61 = vld [vmem:[%s1549_s0 + $0xc8] ss:$20 sps:$4 sm:$0xff]   ;;  %v893_v0 = vcombine.high %v52_v60, %v52_v60  ;;  %v892_v2 = vcombine.low %v52_v60, %v52_v60  ;;  %v1189_v5 = vld [vmem:[%s1549_s0 + $0x38] ss:$20 sps:$4 sm:$0xff]  }
  0x16   :  { %1006 = vmatprep.subr.bf16.mxu1 %v1132_v21  ;;  %v891_v63 = vcombine.high %v51_v59, %v51_v59  ;;  %v890_v1 = vcombine.low %v51_v59, %v51_v59  ;;  %v1187_v3 = vld [vmem:[%s1549_s0 + $0x10] ss:$20 sps:$4 sm:$0xff]   ;;  %v1190_v6 = vld [vmem:[%s1549_s0 + $0xd8] ss:$20 sps:$4 sm:$0xff]   ;;  %v1191_v7 = vld [vmem:[%s1549_s0 + $0x60] ss:$20 sps:$4 sm:$0xff]  }
  0x17   :  { %v1188_v4 = vld [vmem:[%s1549_s0 + $0xb0] ss:$20 sps:$4 sm:$0xff]   ;;  %v1192_v8 = vld [vmem:[%s1549_s0 + $0x100] ss:$0 sps:$4 sm:$0x11]  }
  0x18   :  { %949 = vmatpush3.bf16.msra.mxu0 %v1133_v22  ;;  %v1193_v9 = vld [vmem:[%s1549_s0 + $0x88] ss:$20 sps:$4 sm:$0xff]  }
  0x19   :  { %1007 = vmatpush3.bf16.msra.mxu1 %v1134_v23  ;;  %950 = vmatprep.subr.bf16.mxu0 %v1135_v24 }
  0x1a   :  { %1008 = vmatprep.subr.bf16.mxu1 %v1136_v25 }
  0x1c   :  { %951 = vmatpush3.bf16.msra.mxu0 %v1137_v26 }
  0x1d   :  { %1009 = vmatpush3.bf16.msra.mxu1 %v1138_v27  ;;  %952 = vmatprep.subr.bf16.mxu0 %v1139_v28 }
  0x1e   :  { %1010 = vmatprep.subr.bf16.mxu1 %v1140_v29 }
  0x20   :  { %953 = vmatpush3.bf16.msra.mxu0 %v1141_v30 }
  0x21   :  { %1011 = vmatpush3.bf16.msra.mxu1 %v1142_v31  ;;  %1065 = vmatprep.subr.bf16.mxu0 %v1194_v34 }
  0x22   :  { %1101 = vmatprep.subr.bf16.mxu1 %v1194_v34 }
  0x23   :  { %564 = vmatmul.mubr.bf16.vlgmr.msra.gmra.mrb[0].mxu0 %v1143_v32 }
  0x24   :  { %652 = vmatmul.mubr.bf16.vlgmr.msra.gmra.mrb[0].mxu1 %v1146_v35  ;;  %1066 = vmatpush3.bf16.msra.mxu0 %v1149_v37 }
  0x25   :  { %571 = vmatprep.mubr.bf16.mxu0 %v1150_v38  ;;  %1105 = vmatpush3.bf16.msra.mxu1 %v1149_v37 }
  0x26   :  { %659 = vmatprep.mubr.bf16.mxu1 %v1152_v39  ;;  %1067 = vmatprep.subr.bf16.mxu0 %v1194_v34 }
  0x27   :  { %1102 = vmatprep.subr.bf16.mxu1 %v1194_v34 }
  0x28   :  { %1068 = vmatpush3.bf16.msra.mxu0 %v1160_v43 }
  0x29   :  { %1106 = vmatpush3.bf16.msra.mxu1 %v1160_v43  ;;  %1069 = vmatprep.subr.bf16.mxu0 %v1194_v34 }
  0x2a   :  { %1103 = vmatprep.subr.bf16.mxu1 %v1194_v34 }
  0x2b   :  { %572 = vmatmul.mubr.bf16.gmra.mrb[4].mxu0 %v1154_v40 }
  0x2c   :  { %660 = vmatmul.mubr.bf16.gmra.mrb[4].mxu1 %v1155_v41  ;;  %579 = vmatprep.mubr.bf16.mxu0 %v1156_v42 }
  0x2d   :  { %667 = vmatprep.mubr.bf16.mxu1 %v1158_v44  ;;  %1070 = vmatpush3.bf16.msra.mxu0 %v1169_v45 }
  0x2e   :  { %1107 = vmatpush3.bf16.msra.mxu1 %v1169_v45  ;;  %1071 = vmatprep.subr.bf16.mxu0 %v1194_v34 }
  0x2f   :  { %1104 = vmatprep.subr.bf16.mxu1 %v1194_v34 }
  0x31   :  { %1072 = vmatpush3.bf16.msra.mxu0 %v1182_v50 }
  0x32   :  { %1108 = vmatpush3.bf16.msra.mxu1 %v1182_v50 }
  0x33   :  { %580 = vmatmul.mubr.bf16.gmra.mrb[8].mxu0 %v1161_v46 }
  0x34   :  { %668 = vmatmul.mubr.bf16.gmra.mrb[8].mxu1 %v1162_v47  ;;  %587 = vmatprep.mubr.bf16.mxu0 %v1163_v48 }
  0x35   :  { %675 = vmatprep.mubr.bf16.mxu1 %v1165_v49 }
  0x3b   :  { %588 = vmatmul.mubr.bf16.gmra.mrb[12].mxu0 %v1167_v51 }
  0x3c   :  { %676 = vmatmul.mubr.bf16.gmra.mrb[12].mxu1 %v1168_v52  ;;  %595 = vmatprep.mubr.bf16.mxu0 %v1170_v53 }
  0x3d   :  { %683 = vmatprep.mubr.bf16.mxu1 %v1172_v54 }
  0x43   :  { %596 = vmatmul.mubr.bf16.gmra.mrb[16].mxu0 %v1174_v55 }
  0x44   :  { %684 = vmatmul.mubr.bf16.gmra.mrb[16].mxu1 %v1175_v56  ;;  %603 = vmatprep.mubr.bf16.mxu0 %v1176_v57 }
  0x45   :  { %691 = vmatprep.mubr.bf16.mxu1 %v1178_v58 }
  0x4b   :  { %604 = vmatmul.mubr.bf16.gmra.mrb[20].mxu0 %v1180_v61 }
  0x4c   :  { %692 = vmatmul.mubr.bf16.gmra.mrb[20].mxu1 %v1181_v62  ;;  %611 = vmatprep.mubr.bf16.mxu0 %v891_v63 }
  0x4d   :  { %699 = vmatprep.mubr.bf16.mxu1 %v893_v0 }
  0x53   :  { %612 = vmatmul.mubr.bf16.gmra.mrb[24].mxu0 %v890_v1 }
  0x54   :  { %700 = vmatmul.mubr.bf16.gmra.mrb[24].mxu1 %v892_v2  ;;  %1073 = vmatprep.mubr.msk.bf16.mxu0 %vm1195_vm0, %v1194_v34 }
  0x55   :  { %1089 = vmatprep.mubr.msk.bf16.mxu1 %vm1195_vm0, %v1194_v34 }
  0x5b   :  { %1074 = vmatmul.mubr.msk.bf16.vlgmr.msra.gmra.mrb[28].mxu0 %vm509_vm1, %v1187_v3 }
  0x5c   :  { %1090 = vmatmul.mubr.msk.bf16.vlgmr.msra.gmra.mrb[28].mxu1 %vm509_vm1, %v1188_v4  ;;  %1077 = vmatprep.mubr.msk.bf16.mxu0 %vm1195_vm0, %v1194_v34 }
  0x5d   :  { %1093 = vmatprep.mubr.msk.bf16.mxu1 %vm1195_vm0, %v1194_v34 }
  0x63   :  { %1078 = vmatmul.mubr.msk.bf16.gmra.mrb[32].mxu0 %vm509_vm1, %v1189_v5 }
  0x64   :  { %1094 = vmatmul.mubr.msk.bf16.gmra.mrb[32].mxu1 %vm509_vm1, %v1190_v6  ;;  %1081 = vmatprep.mubr.msk.bf16.mxu0 %vm1195_vm0, %v1194_v34 }
  0x65   :  { %1097 = vmatprep.mubr.msk.bf16.mxu1 %vm1195_vm0, %v1194_v34 }
  0x6b   :  { %1082 = vmatmul.mubr.msk.bf16.gmra.mrb[36].mxu0 %vm509_vm1, %v1191_v7 }
  0x6c   :  { %1098 = vmatmul.mubr.msk.bf16.gmra.mrb[36].mxu1 %vm509_vm1, %v1192_v8  ;;  %1085 = vmatprep.mubr.msk.bf16.mxu0 %vm1195_vm0, %v1194_v34 }
  0x73   :  { %1086 = vmatmul.mubr.msk.bf16.gmra.mrb[40].mxu0 %vm509_vm1, %v1193_v9 }
  0xf6   :  { %v954_v10 = vpop.f32.mrb[0].mxu0 }
  0xf7   :  { %v1012_v11 = vpop.f32.mrb[0].mxu1  ;;  %v955_v12 = vpop.f32.mrb[1].mxu0 }
  0xf8   :  { %v956_v13 = vadd.f32 %v955_v12, %v954_v10  ;;  %v1013_v14 = vpop.f32.mrb[1].mxu1  ;;  %v957_v15 = vpop.f32.mrb[2].mxu0 }
  0xf9   :  { %v1014_v16 = vadd.f32 %v1013_v14, %v1012_v11  ;;  %v1015_v17 = vpop.f32.mrb[2].mxu1  ;;  %v958_v18 = vpop.f32.mrb[3].mxu0 }
  0xfa   :  { %v959_v19 = vadd.f32 %v958_v18, %v957_v15  ;;  %v1016_v20 = vpop.f32.mrb[3].mxu1 }
  0xfb   :  { %v1017_v21 = vadd.f32 %v1016_v20, %v1015_v17  ;;  %v1452_v22 = vadd.f32 %v1014_v16, %v956_v13 }
  0xfd   :  { %v1454_v23 = vadd.f32 %v1017_v21, %v959_v19 }
  0xfe   :  { %v960_v24 = vpop.f32.mrb[4].mxu0 }
  0xff   :  { %v1018_v25 = vpop.f32.mrb[4].mxu1  ;;  %v961_v26 = vpop.f32.mrb[5].mxu0 }
 0x100   :  { %v962_v27 = vadd.f32 %v961_v26, %v960_v24  ;;  %v1019_v28 = vpop.f32.mrb[5].mxu1  ;;  %v963_v29 = vpop.f32.mrb[6].mxu0 }
 0x101   :  { %v1020_v30 = vadd.f32 %v1019_v28, %v1018_v25  ;;  %v1021_v31 = vpop.f32.mrb[6].mxu1  ;;  %v964_v32 = vpop.f32.mrb[7].mxu0 }
 0x102   :  { %v965_v33 = vadd.f32 %v964_v32, %v963_v29  ;;  %v1022_v34 = vpop.f32.mrb[7].mxu1 }
 0x103   :  { %v1023_v35 = vadd.f32 %v1022_v34, %v1021_v31  ;;  %v1456_v36 = vadd.f32 %v1020_v30, %v962_v27  ;;  %v796_v27 = vlaneseq }
 0x105   :  { %v1458_v37 = vadd.f32 %v1023_v35, %v965_v33  ;;  %v797_v32 = vshrl.u32 %v796_v27, 7 }
 0x106   :  { %v966_v38 = vpop.f32.mrb[8].mxu0 }
 0x107   :  { %v1024_v39 = vpop.f32.mrb[8].mxu1  ;;  %v967_v40 = vpop.f32.mrb[9].mxu0 }
 0x108   :  { %v968_v41 = vadd.f32 %v967_v40, %v966_v38  ;;  %v1025_v42 = vpop.f32.mrb[9].mxu1  ;;  %v969_v43 = vpop.f32.mrb[10].mxu0 }
 0x109   :  { %v1026_v44 = vadd.f32 %v1025_v42, %v1024_v39  ;;  %v1027_v45 = vpop.f32.mrb[10].mxu1  ;;  %v970_v46 = vpop.f32.mrb[11].mxu0 }
 0x10a   :  { %v971_v47 = vadd.f32 %v970_v46, %v969_v43  ;;  %v1028_v48 = vpop.f32.mrb[11].mxu1 }
 0x10b   :  { %v1029_v49 = vadd.f32 %v1028_v48, %v1027_v45  ;;  %v1460_v50 = vadd.f32 %v1026_v44, %v968_v41  ;;  %v798_v45 = vsub.s32 0, %v797_v32  ;;  %v815_v48 = vsub.s32 1, %v797_v32 }
 0x10d   :  { %v1462_v51 = vadd.f32 %v1029_v49, %v971_v47  ;;  %v795_v47 = vld [vmem:[%s1550_s2] sm:$0x3] }
 0x10e   :  { %v972_v52 = vpop.f32.mrb[12].mxu0 }
 0x10f   :  { %v1030_v53 = vpop.f32.mrb[12].mxu1  ;;  %v973_v54 = vpop.f32.mrb[13].mxu0 }
 0x110   :  { %v974_v55 = vadd.f32 %v973_v54, %v972_v52  ;;  %v1031_v56 = vpop.f32.mrb[13].mxu1  ;;  %v975_v57 = vpop.f32.mrb[14].mxu0  ;;  %v1471_v52 = vrot.slane %v795_v47, %v798_v45 }
 0x111   :  { %v1032_v58 = vadd.f32 %v1031_v56, %v1030_v53  ;;  %v1033_v59 = vpop.f32.mrb[14].mxu1  ;;  %v976_v60 = vpop.f32.mrb[15].mxu0 }
 0x112   :  { %v977_v61 = vadd.f32 %v976_v60, %v975_v57  ;;  %v1034_v62 = vpop.f32.mrb[15].mxu1 }
 0x113   :  { %v1035_v63 = vadd.f32 %v1034_v62, %v1033_v59  ;;  %v1464_v0 = vadd.f32 %v1032_v58, %v974_v55  ;;  %v1474_v55 = vrot.slane %v795_v47, %v815_v48 }
 0x115   :  { %v1466_v1 = vadd.f32 %v1035_v63, %v977_v61 }
 0x116   :  { %v978_v2 = vpop.f32.mrb[16].mxu0 }
 0x117   :  { %v1036_v3 = vpop.f32.mrb[16].mxu1  ;;  %v979_v4 = vpop.f32.mrb[17].mxu0 }
 0x118   :  { %v980_v5 = vadd.f32 %v979_v4, %v978_v2  ;;  %v1037_v6 = vpop.f32.mrb[17].mxu1  ;;  %v981_v7 = vpop.f32.mrb[18].mxu0 }
 0x119   :  { %v1038_v8 = vadd.f32 %v1037_v6, %v1036_v3  ;;  %v1039_v9 = vpop.f32.mrb[18].mxu1  ;;  %v982_v10 = vpop.f32.mrb[19].mxu0 }
 0x11a   :  { %v983_v11 = vadd.f32 %v982_v10, %v981_v7  ;;  %v1040_v12 = vpop.f32.mrb[19].mxu1 }
 0x11b   :  { %v1041_v13 = vadd.f32 %v1040_v12, %v1039_v9  ;;  %v686_v14 = vadd.f32 %v1038_v8, %v980_v5 }
 0x11d   :  { %v689_v15 = vadd.f32 %v1041_v13, %v983_v11 }
 0x11e   :  { %v984_v16 = vpop.f32.mrb[20].mxu0 }
 0x11f   :  { %v1042_v17 = vpop.f32.mrb[20].mxu1  ;;  %v985_v18 = vpop.f32.mrb[21].mxu0 }
 0x120   :  { %v986_v19 = vadd.f32 %v985_v18, %v984_v16  ;;  %v1043_v20 = vpop.f32.mrb[21].mxu1  ;;  %v987_v21 = vpop.f32.mrb[22].mxu0 }
 0x121   :  { %v1044_v24 = vadd.f32 %v1043_v20, %v1042_v17  ;;  %v1045_v25 = vpop.f32.mrb[22].mxu1  ;;  %v988_v26 = vpop.f32.mrb[23].mxu0 }
 0x122   :  { %v989_v28 = vadd.f32 %v988_v26, %v987_v21  ;;  %v1046_v29 = vpop.f32.mrb[23].mxu1 }
 0x123   :  { %v1047_v30 = vadd.f32 %v1046_v29, %v1045_v25  ;;  %v694_v31 = vadd.f32 %v1044_v24, %v986_v19 }
 0x125   :  { %v697_v33 = vadd.f32 %v1047_v30, %v989_v28 }
 0x126   :  { %v990_v34 = vpop.f32.mrb[24].mxu0 }
 0x127   :  { %v1048_v35 = vpop.f32.mrb[24].mxu1  ;;  %v991_v38 = vpop.f32.mrb[25].mxu0 }
 0x128   :  { %v992_v39 = vadd.f32 %v991_v38, %v990_v34  ;;  %v1049_v40 = vpop.f32.mrb[25].mxu1  ;;  %v993_v41 = vpop.f32.mrb[26].mxu0 }
 0x129   :  { %v1050_v42 = vadd.f32 %v1049_v40, %v1048_v35  ;;  %v994_v43 = vpop.f32.mrb[27].mxu0  ;;  %v1051_v44 = vpop.f32.mrb[26].mxu1 }
 0x12a   :  { %v1052_v46 = vpop.f32.mrb[27].mxu1 }
 0x12b   :  { %v702_v49 = vadd.f32 %v1050_v42, %v992_v39 }
 0x12e   :  { %v741_v53 = vpop.f32.mrb[28].mxu0 }
 0x12f   :  { %v742_v54 = vadd.f32 %v741_v53, %v1452_v22  ;;  %v773_v56 = vpop.f32.mrb[28].mxu1  ;;  %v1075_v57 = vpop.f32.mrb[29].mxu0 }
 0x130   :  { %v774_v58 = vadd.f32 %v773_v56, %v686_v14  ;;  %v1091_v59 = vpop.f32.mrb[29].mxu1  ;;  %v744_v60 = vpop.f32.mrb[30].mxu0 }
 0x131   :  { %v800_v61 = vmul.f32 %v1471_v52, %v742_v54  ;;  %v745_v62 = vadd.f32 %v744_v60, %v1454_v23  ;;  %v776_v63 = vpop.f32.mrb[30].mxu1  ;;  %v1076_v2 = vpop.f32.mrb[31].mxu0 }
 0x132   :  { %v808_v3 = vmul.f32 %v1471_v52, %v774_v58  ;;  %v777_v4 = vadd.f32 %v776_v63, %v689_v15  ;;  %v1092_v5 = vpop.f32.mrb[31].mxu1 }
 0x133   :  { %v817_v6 = vadd.f32 %v1474_v55, %v800_v61  ;;  %v801_v22 = vmul.f32 %v1471_v52, %v745_v62 }
 0x134   :  { %v825_v7 = vadd.f32 %v1474_v55, %v808_v3  ;;  %v809_v8 = vmul.f32 %v1471_v52, %v777_v4 }
 0x135   :  { %v830_v9 = vmax.f32 %v817_v6, 0.0  ;;  %v818_v10 = vadd.f32 %v1474_v55, %v801_v22 }
 0x136   :  { %v838_v11 = vmax.f32 %v825_v7, 0.0  ;;  %v826_v23 = vadd.f32 %v1474_v55, %v809_v8  ;;  %v749_v12 = vpop.f32.mrb[32].mxu0 }
 0x137   :  { %843 = vst [vmem:[%s1551_s3] sm:$0xff] %v830_v9  ;;  %v831_v13 = vmax.f32 %v818_v10, 0.0  ;;  %v750_v14 = vadd.f32 %v749_v12, %v1456_v36  ;;  %v781_v15 = vpop.f32.mrb[32].mxu1  ;;  %v1079_v16 = vpop.f32.mrb[33].mxu0 }
 0x138   :  { %851 = vst [vmem:[%s1551_s3 + $0x40] sm:$0xff] %v838_v11  ;;  %v839_v17 = vmax.f32 %v826_v23, 0.0  ;;  %v782_v18 = vadd.f32 %v781_v15, %v694_v31  ;;  %v1095_v19 = vpop.f32.mrb[33].mxu1  ;;  %v752_v20 = vpop.f32.mrb[34].mxu0 }
 0x139   :  { %844 = vst [vmem:[%s1551_s3 + $0x8] sm:$0xff] %v831_v13  ;;  %v802_v21 = vmul.f32 %v1471_v52, %v750_v14  ;;  %v753_v24 = vadd.f32 %v752_v20, %v1458_v37  ;;  %v784_v25 = vpop.f32.mrb[34].mxu1  ;;  %v1080_v36 = vpop.f32.mrb[35].mxu0 }
 0x13a   :  { %852 = vst [vmem:[%s1551_s3 + $0x48] sm:$0xff] %v839_v17  ;;  %v810_v26 = vmul.f32 %v1471_v52, %v782_v18  ;;  %v785_v27 = vadd.f32 %v784_v25, %v697_v33  ;;  %v1096_v28 = vpop.f32.mrb[35].mxu1 }
 0x13b   :  { %v819_v29 = vadd.f32 %v1474_v55, %v802_v21  ;;  %v803_v30 = vmul.f32 %v1471_v52, %v753_v24 }
 0x13c   :  { %v827_v31 = vadd.f32 %v1474_v55, %v810_v26  ;;  %v811_v32 = vmul.f32 %v1471_v52, %v785_v27 }
 0x13d   :  { %v832_v34 = vmax.f32 %v819_v29, 0.0  ;;  %v820_v37 = vadd.f32 %v1474_v55, %v803_v30 }
 0x13e   :  { %v840_v35 = vmax.f32 %v827_v31, 0.0  ;;  %v828_v38 = vadd.f32 %v1474_v55, %v811_v32  ;;  %v757_v39 = vpop.f32.mrb[36].mxu0 }
 0x13f   :  { %845 = vst [vmem:[%s1551_s3 + $0x10] sm:$0xff] %v832_v34  ;;  %v833_v33 = vmax.f32 %v820_v37, 0.0  ;;  %v758_v40 = vadd.f32 %v757_v39, %v1460_v50  ;;  %v789_v41 = vpop.f32.mrb[36].mxu1  ;;  %v1083_v42 = vpop.f32.mrb[37].mxu0 }
 0x140   :  { %853 = vst [vmem:[%s1551_s3 + $0x50] sm:$0xff] %v840_v35  ;;  %v841_v43 = vmax.f32 %v828_v38, 0.0  ;;  %v790_v44 = vadd.f32 %v789_v41, %v702_v49  ;;  %v760_v45 = vpop.f32.mrb[38].mxu0  ;;  %v1099_v46 = vpop.f32.mrb[37].mxu1 }
 0x141   :  { %846 = vst [vmem:[%s1551_s3 + $0x18] sm:$0xff] %v833_v33  ;;  %v804_v47 = vmul.f32 %v1471_v52, %v758_v40  ;;  %v761_v48 = vadd.f32 %v760_v45, %v1462_v51  ;;  %v1084_v53 = vpop.f32.mrb[39].mxu0  ;;  %v792_v50 = vpop.f32.mrb[38].mxu1 }
 0x142   :  { %854 = vst [vmem:[%s1551_s3 + $0x58] sm:$0xff] %v841_v43  ;;  %v812_v54 = vmul.f32 %v1471_v52, %v790_v44  ;;  %v1100_v56 = vpop.f32.mrb[39].mxu1 }
 0x143   :  { %v821_v49 = vadd.f32 %v1474_v55, %v804_v47  ;;  %v805_v57 = vmul.f32 %v1471_v52, %v761_v48 }
 0x144   :  { %v829_v58 = vadd.f32 %v1474_v55, %v812_v54 }
 0x145   :  { %v834_v59 = vmax.f32 %v821_v49, 0.0  ;;  %v822_v60 = vadd.f32 %v1474_v55, %v805_v57 }
 0x146   :  { %v842_v61 = vmax.f32 %v829_v58, 0.0  ;;  %v765_v51 = vpop.f32.mrb[40].mxu0 }
 0x147   :  { %847 = vst [vmem:[%s1551_s3 + $0x20] sm:$0xff] %v834_v59  ;;  %v835_v62 = vmax.f32 %v822_v60, 0.0  ;;  %v766_v63 = vadd.f32 %v765_v51, %v1464_v0  ;;  %v1087_v2 = vpop.f32.mrb[41].mxu0 }
 0x148   :  { %855 = vst [vmem:[%s1551_s3 + $0x60] sm:$0x3] %v842_v61  ;;  %v768_v3 = vpop.f32.mrb[42].mxu0 }
 0x149   :  { %848 = vst [vmem:[%s1551_s3 + $0x28] sm:$0xff] %v835_v62  ;;  %v806_v4 = vmul.f32 %v1471_v52, %v766_v63  ;;  %v769_v5 = vadd.f32 %v768_v3, %v1466_v1  ;;  %v1088_v6 = vpop.f32.mrb[43].mxu0 }
 0x14b   :  { %v823_v22 = vadd.f32 %v1474_v55, %v806_v4  ;;  %v807_v7 = vmul.f32 %v1471_v52, %v769_v5 }
 0x14d   :  { %v836_v0 = vmax.f32 %v823_v22, 0.0  ;;  %v824_v8 = vadd.f32 %v1474_v55, %v807_v7 }
 0x14f   :  { %849 = vst [vmem:[%s1551_s3 + $0x30] sm:$0xff] %v836_v0  ;;  %v837_v9 = vmax.f32 %v824_v8, 0.0 }
 0x151   :  { %850 = vst [vmem:[%s1551_s3 + $0x38] sm:$0xff] %v837_v9 }

// kernel: cnn_base_forward.7
= control target key start
LH: loop header
LB: loop body
LE: loop exit
PB: predicated region body
PF: predicated region fallthrough
CT: control target
= control target key end

     0   :  { %s2703_s1 = inlined_call_operand.vmem [shape: bf16[1152,256], index: 1, kind: input, shape index: {}]   ;;  %s2704_s0 = inlined_call_operand.vmem [shape: bf16[50,1152], index: 0, kind: input, shape index: {}]   ;;  %s2705_s2 = inlined_call_operand.vmem [shape: f32[2,256], index: 2, kind: input, shape index: {}]   ;;  %s2706_s3 = inlined_call_operand.vmem [shape: f32[50,256], index: 3, kind: output, shape index: {}]  }
   0x1   :  { %v1794_v0 = vld [vmem:[%s2703_s1 + $0x4] ss:$8 sps:$4 sm:$0xff]   ;;  %v1798_v2 = vld [vmem:[%s2703_s1] ss:$8 sps:$4 sm:$0xff]   ;;  %v1800_v4 = vld [vmem:[%s2703_s1 + $0x14] ss:$8 sps:$4 sm:$0xff]  }
   0x2   :  { %v1796_v1 = vld [vmem:[%s2703_s1 + $0x204] ss:$8 sps:$4 sm:$0xff]   ;;  %1084 = vmatprep.subr.bf16.mxu1 %v1794_v0  ;;  %v1799_v3 = vld [vmem:[%s2703_s1 + $0x200] ss:$8 sps:$4 sm:$0xff]   ;;  %v1802_v5 = vld [vmem:[%s2703_s1 + $0x214] ss:$8 sps:$4 sm:$0xff]  }
   0x3   :  { %1226 = vmatprep.subr.bf16.mxu0 %v1796_v1  ;;  %1085 = vmatpush1.bf16.msra.mxu1 %v1798_v2  ;;  %v1804_v6 = vld [vmem:[%s2703_s1 + $0x10] ss:$8 sps:$4 sm:$0xff]   ;;  %v1806_v8 = vld [vmem:[%s2703_s1 + $0x24] ss:$8 sps:$4 sm:$0xff]   ;;  %v1810_v10 = vld [vmem:[%s2703_s1 + $0x20] ss:$8 sps:$4 sm:$0xff]  }
   0x4   :  { %1227 = vmatpush1.bf16.msra.mxu0 %v1799_v3  ;;  %1086 = vmatprep.subr.bf16.mxu1 %v1800_v4  ;;  %v1805_v7 = vld [vmem:[%s2703_s1 + $0x210] ss:$8 sps:$4 sm:$0xff]   ;;  %v1808_v9 = vld [vmem:[%s2703_s1 + $0x224] ss:$8 sps:$4 sm:$0xff]   ;;  %v1811_v11 = vld [vmem:[%s2703_s1 + $0x220] ss:$8 sps:$4 sm:$0xff]  }
   0x5   :  { %1228 = vmatprep.subr.bf16.mxu0 %v1802_v5  ;;  %v1812_v12 = vld [vmem:[%s2703_s1 + $0x34] ss:$8 sps:$4 sm:$0xff]   ;;  %v1816_v14 = vld [vmem:[%s2703_s1 + $0x30] ss:$8 sps:$4 sm:$0xff]   ;;  %v1818_v16 = vld [vmem:[%s2703_s1 + $0x44] ss:$8 sps:$4 sm:$0xff]  }
   0x6   :  { %v1814_v13 = vld [vmem:[%s2703_s1 + $0x234] ss:$8 sps:$4 sm:$0xff]   ;;  %v1817_v15 = vld [vmem:[%s2703_s1 + $0x230] ss:$8 sps:$4 sm:$0xff]   ;;  %v1820_v17 = vld [vmem:[%s2703_s1 + $0x244] ss:$8 sps:$4 sm:$0xff]  }
   0x7   :  { %1087 = vmatpush1.bf16.msra.mxu1 %v1804_v6  ;;  %v1822_v18 = vld [vmem:[%s2703_s1 + $0x40] ss:$8 sps:$4 sm:$0xff]   ;;  %v1824_v20 = vld [vmem:[%s2703_s1 + $0x54] ss:$8 sps:$4 sm:$0xff]   ;;  %v1828_v22 = vld [vmem:[%s2703_s1 + $0x50] ss:$8 sps:$4 sm:$0xff]  }
   0x8   :  { %1229 = vmatpush1.bf16.msra.mxu0 %v1805_v7  ;;  %1088 = vmatprep.subr.bf16.mxu1 %v1806_v8  ;;  %v1823_v19 = vld [vmem:[%s2703_s1 + $0x240] ss:$8 sps:$4 sm:$0xff]   ;;  %v1826_v21 = vld [vmem:[%s2703_s1 + $0x254] ss:$8 sps:$4 sm:$0xff]   ;;  %v1829_v23 = vld [vmem:[%s2703_s1 + $0x250] ss:$8 sps:$4 sm:$0xff]  }
   0x9   :  { %1230 = vmatprep.subr.bf16.mxu0 %v1808_v9  ;;  %v1830_v24 = vld [vmem:[%s2703_s1 + $0x64] ss:$8 sps:$4 sm:$0xff]   ;;  %v1834_v26 = vld [vmem:[%s2703_s1 + $0x60] ss:$8 sps:$4 sm:$0xff]   ;;  %v1836_v28 = vld [vmem:[%s2703_s1 + $0x74] ss:$8 sps:$4 sm:$0xff]  }
   0xa   :  { %v1832_v25 = vld [vmem:[%s2703_s1 + $0x264] ss:$8 sps:$4 sm:$0xff]   ;;  %v1835_v27 = vld [vmem:[%s2703_s1 + $0x260] ss:$8 sps:$4 sm:$0xff]   ;;  %v1838_v29 = vld [vmem:[%s2703_s1 + $0x274] ss:$8 sps:$4 sm:$0xff]  }
   0xb   :  { %1089 = vmatpush1.bf16.msra.mxu1 %v1810_v10  ;;  %v1840_v30 = vld [vmem:[%s2703_s1 + $0x70] ss:$8 sps:$4 sm:$0xff]   ;;  %v1842_v32 = vld [vmem:[%s2703_s1 + $0x84] ss:$8 sps:$4 sm:$0xff]   ;;  %v1846_v34 = vld [vmem:[%s2703_s1 + $0x80] ss:$8 sps:$4 sm:$0xff]  }
   0xc   :  { %1231 = vmatpush1.bf16.msra.mxu0 %v1811_v11  ;;  %1090 = vmatprep.subr.bf16.mxu1 %v1812_v12  ;;  %v1841_v31 = vld [vmem:[%s2703_s1 + $0x270] ss:$8 sps:$4 sm:$0xff]   ;;  %v1844_v33 = vld [vmem:[%s2703_s1 + $0x284] ss:$8 sps:$4 sm:$0xff]   ;;  %v1847_v35 = vld [vmem:[%s2703_s1 + $0x280] ss:$8 sps:$4 sm:$0xff]  }
   0xd   :  { %1232 = vmatprep.subr.bf16.mxu0 %v1814_v13  ;;  %v1848_v36 = vld [vmem:[%s2703_s1 + $0x94] ss:$8 sps:$4 sm:$0xff]   ;;  %v1852_v38 = vld [vmem:[%s2703_s1 + $0x90] ss:$8 sps:$4 sm:$0xff]   ;;  %v1854_v40 = vld [vmem:[%s2703_s1 + $0xa4] ss:$8 sps:$4 sm:$0xff]  }
   0xe   :  { %v1850_v37 = vld [vmem:[%s2703_s1 + $0x294] ss:$8 sps:$4 sm:$0xff]   ;;  %v1853_v39 = vld [vmem:[%s2703_s1 + $0x290] ss:$8 sps:$4 sm:$0xff]   ;;  %v1856_v41 = vld [vmem:[%s2703_s1 + $0x2a4] ss:$8 sps:$4 sm:$0xff]  }
   0xf   :  { %1091 = vmatpush1.bf16.msra.mxu1 %v1816_v14  ;;  %v1858_v42 = vld [vmem:[%s2703_s1 + $0xa0] ss:$8 sps:$4 sm:$0xff]   ;;  %v1860_v44 = vld [vmem:[%s2703_s1 + $0xb4] ss:$8 sps:$4 sm:$0xff]   ;;  %v1864_v46 = vld [vmem:[%s2703_s1 + $0xb0] ss:$8 sps:$4 sm:$0xff]  }
  0x10   :  { %1233 = vmatpush1.bf16.msra.mxu0 %v1817_v15  ;;  %1092 = vmatprep.subr.bf16.mxu1 %v1818_v16  ;;  %v1859_v43 = vld [vmem:[%s2703_s1 + $0x2a0] ss:$8 sps:$4 sm:$0xff]   ;;  %v1862_v45 = vld [vmem:[%s2703_s1 + $0x2b4] ss:$8 sps:$4 sm:$0xff]   ;;  %v1865_v47 = vld [vmem:[%s2703_s1 + $0x2b0] ss:$8 sps:$4 sm:$0xff]  }
  0x11   :  { %1234 = vmatprep.subr.bf16.mxu0 %v1820_v17  ;;  %v1892_v48 = vld [vmem:[%s2704_s0 + $0x4] ss:$36 sps:$4 sm:$0xff]   ;;  %v1898_v51 = vld [vmem:[%s2704_s0 + $0x14] ss:$36 sps:$4 sm:$0xff]  }
  0x12   :  { %v1866_v49 = vld [vmem:[%s2703_s1 + $0xc4] ss:$8 sps:$4 sm:$0xff]   ;;  %1116 = vmatprep.mubr.bf16.mxu1 %v1892_v48  ;;  %v1870_v52 = vld [vmem:[%s2703_s1 + $0xc0] ss:$8 sps:$4 sm:$0xff]   ;;  %v1872_v54 = vld [vmem:[%s2703_s1 + $0xd4] ss:$8 sps:$4 sm:$0xff]   ;;  %1258 = vmatprep.mubr.bf16.mxu0 %v1898_v51 }
  0x13   :  { %1093 = vmatpush1.bf16.msra.mxu1 %v1822_v18  ;;  %v1868_v50 = vld [vmem:[%s2703_s1 + $0x2c4] ss:$8 sps:$4 sm:$0xff]   ;;  %v1871_v53 = vld [vmem:[%s2703_s1 + $0x2c0] ss:$8 sps:$4 sm:$0xff]   ;;  %v1874_v55 = vld [vmem:[%s2703_s1 + $0x2d4] ss:$8 sps:$4 sm:$0xff]  }
  0x14   :  { %1235 = vmatpush1.bf16.msra.mxu0 %v1823_v19  ;;  %1094 = vmatprep.subr.bf16.mxu1 %v1824_v20  ;;  %v1876_v56 = vld [vmem:[%s2703_s1 + $0xd0] ss:$8 sps:$4 sm:$0xff]   ;;  %v1878_v58 = vld [vmem:[%s2703_s1 + $0xe4] ss:$8 sps:$4 sm:$0xff]   ;;  %v1882_v60 = vld [vmem:[%s2703_s1 + $0xe0] ss:$8 sps:$4 sm:$0xff]  }
  0x15   :  { %1236 = vmatprep.subr.bf16.mxu0 %v1826_v21  ;;  %v1877_v57 = vld [vmem:[%s2703_s1 + $0x2d0] ss:$8 sps:$4 sm:$0xff]   ;;  %v1880_v59 = vld [vmem:[%s2703_s1 + $0x2e4] ss:$8 sps:$4 sm:$0xff]   ;;  %v1883_v61 = vld [vmem:[%s2703_s1 + $0x2e0] ss:$8 sps:$4 sm:$0xff]  }
  0x16   :  { %v1884_v62 = vld [vmem:[%s2703_s1 + $0xf4] ss:$8 sps:$4 sm:$0xff]   ;;  %v1888_v0 = vld [vmem:[%s2703_s1 + $0xf0] ss:$8 sps:$4 sm:$0xff]   ;;  %v1895_v2 = vld [vmem:[%s2703_s1 + $0x104] ss:$8 sps:$4 sm:$0xff]  }
  0x17   :  { %1095 = vmatpush1.bf16.msra.mxu1 %v1828_v22  ;;  %v1886_v63 = vld [vmem:[%s2703_s1 + $0x2f4] ss:$8 sps:$4 sm:$0xff]   ;;  %v1889_v1 = vld [vmem:[%s2703_s1 + $0x2f0] ss:$8 sps:$4 sm:$0xff]   ;;  %v1901_v3 = vld [vmem:[%s2703_s1 + $0x304] ss:$8 sps:$4 sm:$0xff]  }
  0x18   :  { %1237 = vmatpush1.bf16.msra.mxu0 %v1829_v23  ;;  %1096 = vmatprep.subr.bf16.mxu1 %v1830_v24  ;;  %v1890_v4 = vld [vmem:[%s2704_s0] ss:$36 sps:$4 sm:$0xff]   ;;  %v1896_v6 = vld [vmem:[%s2704_s0 + $0x10] ss:$36 sps:$4 sm:$0xff]   ;;  %v1960_v20 = vld [vmem:[%s2704_s0 + $0x48] ss:$36 sps:$4 sm:$0xff]  }
  0x19   :  { %1238 = vmatprep.subr.bf16.mxu0 %v1832_v25  ;;  %v1893_v5 = vld [vmem:[%s2703_s1 + $0x100] ss:$8 sps:$4 sm:$0xff]   ;;  %v1904_v8 = vld [vmem:[%s2703_s1 + $0x114] ss:$8 sps:$4 sm:$0xff]   ;;  %v1902_v10 = vld [vmem:[%s2703_s1 + $0x110] ss:$8 sps:$4 sm:$0xff]  }
  0x1a   :  { %v1899_v7 = vld [vmem:[%s2703_s1 + $0x300] ss:$8 sps:$4 sm:$0xff]   ;;  %v1907_v9 = vld [vmem:[%s2703_s1 + $0x314] ss:$8 sps:$4 sm:$0xff]   ;;  %v1905_v11 = vld [vmem:[%s2703_s1 + $0x310] ss:$8 sps:$4 sm:$0xff]  }
  0x1b   :  { %1097 = vmatpush1.bf16.msra.mxu1 %v1834_v26  ;;  %v1910_v12 = vld [vmem:[%s2703_s1 + $0x124] ss:$8 sps:$4 sm:$0xff]   ;;  %v1908_v14 = vld [vmem:[%s2703_s1 + $0x120] ss:$8 sps:$4 sm:$0xff]   ;;  %v1916_v16 = vld [vmem:[%s2703_s1 + $0x134] ss:$8 sps:$4 sm:$0xff]  }
  0x1c   :  { %1239 = vmatpush1.bf16.msra.mxu0 %v1835_v27  ;;  %1098 = vmatprep.subr.bf16.mxu1 %v1836_v28  ;;  %v1913_v13 = vld [vmem:[%s2703_s1 + $0x324] ss:$8 sps:$4 sm:$0xff]   ;;  %v1911_v15 = vld [vmem:[%s2703_s1 + $0x320] ss:$8 sps:$4 sm:$0xff]   ;;  %v1919_v17 = vld [vmem:[%s2703_s1 + $0x334] ss:$8 sps:$4 sm:$0xff]  }
  0x1d   :  { %1240 = vmatprep.subr.bf16.mxu0 %v1838_v29  ;;  %v1956_v18 = vld [vmem:[%s2704_s0 + $0x4c] ss:$36 sps:$4 sm:$0xff]   ;;  %v1958_v19 = vld [vmem:[%s2704_s0 + $0x5c] ss:$36 sps:$4 sm:$0xff]  }
  0x1e   :  { %v1914_v21 = vld [vmem:[%s2703_s1 + $0x130] ss:$8 sps:$4 sm:$0xff]   ;;  %v1922_v24 = vld [vmem:[%s2703_s1 + $0x144] ss:$8 sps:$4 sm:$0xff]   ;;  %v1920_v26 = vld [vmem:[%s2703_s1 + $0x140] ss:$8 sps:$4 sm:$0xff]  }
  0x1f   :  { %1099 = vmatpush1.bf16.msra.mxu1 %v1840_v30  ;;  %v1917_v22 = vld [vmem:[%s2703_s1 + $0x330] ss:$8 sps:$4 sm:$0xff]   ;;  %v1925_v25 = vld [vmem:[%s2703_s1 + $0x344] ss:$8 sps:$4 sm:$0xff]   ;;  %v1923_v27 = vld [vmem:[%s2703_s1 + $0x340] ss:$8 sps:$4 sm:$0xff]  }
  0x20   :  { %1241 = vmatpush1.bf16.msra.mxu0 %v1841_v31  ;;  %1100 = vmatprep.subr.bf16.mxu1 %v1842_v32  ;;  %v1964_v23 = vld [vmem:[%s2704_s0 + $0x58] ss:$36 sps:$4 sm:$0xff]   ;;  %v1976_v31 = vld [vmem:[%s2704_s0 + $0xa4] ss:$36 sps:$4 sm:$0xff]   ;;  %v1978_v32 = vld [vmem:[%s2704_s0 + $0x90] ss:$36 sps:$4 sm:$0xff]  }
  0x21   :  { %1242 = vmatprep.subr.bf16.mxu0 %v1844_v33  ;;  %v1928_v28 = vld [vmem:[%s2703_s1 + $0x154] ss:$8 sps:$4 sm:$0xff]   ;;  %v1926_v33 = vld [vmem:[%s2703_s1 + $0x150] ss:$8 sps:$4 sm:$0xff]   ;;  %v1949_v51 = vld [vmem:[%s2703_s1 + $0x384] ss:$8 sps:$4 sm:$0xff]  }
  0x22   :  { %v1931_v29 = vld [vmem:[%s2703_s1 + $0x354] ss:$8 sps:$4 sm:$0xff]   ;;  %v1938_v48 = vld [vmem:[%s2703_s1 + $0x170] ss:$8 sps:$4 sm:$0xff]  }
  0x23   :  { %1101 = vmatpush1.bf16.msra.mxu1 %v1846_v34  ;;  %v1974_v30 = vld [vmem:[%s2704_s0 + $0x94] ss:$36 sps:$4 sm:$0xff]  }
  0x24   :  { %1243 = vmatpush1.bf16.msra.mxu0 %v1847_v35  ;;  %1102 = vmatprep.subr.bf16.mxu1 %v1848_v36  ;;  %v1929_v34 = vld [vmem:[%s2703_s1 + $0x350] ss:$8 sps:$4 sm:$0xff]   ;;  %v1982_v35 = vld [vmem:[%s2704_s0 + $0xa0] ss:$36 sps:$4 sm:$0xff]  }
  0x25   :  { %1244 = vmatprep.subr.bf16.mxu0 %v1850_v37  ;;  %v1934_v36 = vld [vmem:[%s2703_s1 + $0x164] ss:$8 sps:$4 sm:$0xff]  }
  0x26   :  { %v1937_v37 = vld [vmem:[%s2703_s1 + $0x364] ss:$8 sps:$4 sm:$0xff]  }
  0x27   :  { %1103 = vmatpush1.bf16.msra.mxu1 %v1852_v38  ;;  %v1932_v38 = vld [vmem:[%s2703_s1 + $0x160] ss:$8 sps:$4 sm:$0xff]  }
  0x28   :  { %1245 = vmatpush1.bf16.msra.mxu0 %v1853_v39  ;;  %1104 = vmatprep.subr.bf16.mxu1 %v1854_v40  ;;  %v1935_v39 = vld [vmem:[%s2703_s1 + $0x360] ss:$8 sps:$4 sm:$0xff]   ;;  %v45_v40 = vld [vmem:[%s2704_s0 + $0xd8] sm:$0x11] }
  0x29   :  { %1246 = vmatprep.subr.bf16.mxu0 %v1856_v41  ;;  %v47_v41 = vld [vmem:[%s2704_s0 + $0xe8] sm:$0x11] }
  0x2b   :  { %1105 = vmatpush1.bf16.msra.mxu1 %v1858_v42  ;;  %v1940_v42 = vld [vmem:[%s2703_s1 + $0x174] ss:$8 sps:$4 sm:$0xff]  }
  0x2c   :  { %1247 = vmatpush1.bf16.msra.mxu0 %v1859_v43  ;;  %1106 = vmatprep.subr.bf16.mxu1 %v1860_v44  ;;  %v1943_v43 = vld [vmem:[%s2703_s1 + $0x374] ss:$8 sps:$4 sm:$0xff]   ;;  %v1565_v44 = vcombine.high %v45_v40, %v45_v40 }
  0x2d   :  { %1248 = vmatprep.subr.bf16.mxu0 %v1862_v45  ;;  %v1569_v45 = vcombine.high %v47_v41, %v47_v41 }
  0x2f   :  { %1107 = vmatpush1.bf16.msra.mxu1 %v1864_v46  ;;  %v1564_v46 = vcombine.low %v45_v40, %v45_v40  ;;  %v48_v40 = vld [vmem:[%s2704_s0 + $0xf0] sm:$0x11] }
  0x30   :  { %1249 = vmatpush1.bf16.msra.mxu0 %v1865_v47  ;;  %1108 = vmatprep.subr.bf16.mxu1 %v1866_v49  ;;  %v1568_v47 = vcombine.low %v47_v41, %v47_v41  ;;  %v1941_v49 = vld [vmem:[%s2703_s1 + $0x370] ss:$8 sps:$4 sm:$0xff]   ;;  %v2038_v41 = vld [vmem:[%s2703_s1 + $0x440] ss:$8 sps:$4 sm:$0xff]  }
  0x31   :  { %1250 = vmatprep.subr.bf16.mxu0 %v1868_v50  ;;  %v1946_v50 = vld [vmem:[%s2703_s1 + $0x184] ss:$8 sps:$4 sm:$0xff]  }
  0x33   :  { %1109 = vmatpush1.bf16.msra.mxu1 %v1870_v52  ;;  %v1944_v52 = vld [vmem:[%s2703_s1 + $0x180] ss:$8 sps:$4 sm:$0xff]  }
  0x34   :  { %1251 = vmatpush1.bf16.msra.mxu0 %v1871_v53  ;;  %1110 = vmatprep.subr.bf16.mxu1 %v1872_v54  ;;  %v2010_v53 = vld [vmem:[%s2704_s0 + $0xc] ss:$36 sps:$4 sm:$0xff]   ;;  %v1947_v54 = vld [vmem:[%s2703_s1 + $0x380] ss:$8 sps:$4 sm:$0xff]  }
  0x35   :  { %1252 = vmatprep.subr.bf16.mxu0 %v1874_v55  ;;  %v2013_v55 = vld [vmem:[%s2704_s0 + $0x1c] ss:$36 sps:$4 sm:$0xff]  }
  0x37   :  { %1111 = vmatpush1.bf16.msra.mxu1 %v1876_v56  ;;  %v1952_v56 = vld [vmem:[%s2703_s1 + $0x194] ss:$8 sps:$4 sm:$0xff]  }
  0x38   :  { %1253 = vmatpush1.bf16.msra.mxu0 %v1877_v57  ;;  %1112 = vmatprep.subr.bf16.mxu1 %v1878_v58  ;;  %v1955_v57 = vld [vmem:[%s2703_s1 + $0x394] ss:$8 sps:$4 sm:$0xff]   ;;  %v1950_v58 = vld [vmem:[%s2703_s1 + $0x190] ss:$8 sps:$4 sm:$0xff]  }
  0x39   :  { %1254 = vmatprep.subr.bf16.mxu0 %v1880_v59  ;;  %v1953_v59 = vld [vmem:[%s2703_s1 + $0x390] ss:$8 sps:$4 sm:$0xff]  }
  0x3b   :  { %1113 = vmatpush1.bf16.msra.mxu1 %v1882_v60  ;;  %v1963_v60 = vld [vmem:[%s2703_s1 + $0x1a4] ss:$8 sps:$4 sm:$0xff]  }
  0x3c   :  { %1255 = vmatpush1.bf16.msra.mxu0 %v1883_v61  ;;  %1114 = vmatprep.subr.bf16.mxu1 %v1884_v62  ;;  %v1967_v61 = vld [vmem:[%s2703_s1 + $0x3a4] ss:$8 sps:$4 sm:$0xff]   ;;  %v1961_v62 = vld [vmem:[%s2703_s1 + $0x1a0] ss:$8 sps:$4 sm:$0xff]  }
  0x3d   :  { %1256 = vmatprep.subr.bf16.mxu0 %v1886_v63  ;;  %v1965_v63 = vld [vmem:[%s2703_s1 + $0x3a0] ss:$8 sps:$4 sm:$0xff]  }
  0x3f   :  { %1115 = vmatpush1.bf16.msra.mxu1 %v1888_v0  ;;  %v1970_v0 = vld [vmem:[%s2703_s1 + $0x1b4] ss:$8 sps:$4 sm:$0xff]  }
  0x40   :  { %1257 = vmatpush1.bf16.msra.mxu0 %v1889_v1  ;;  %1155 = vmatprep.subr.bf16.mxu1 %v1895_v2  ;;  %v1973_v1 = vld [vmem:[%s2703_s1 + $0x3b4] ss:$8 sps:$4 sm:$0xff]   ;;  %v1968_v2 = vld [vmem:[%s2703_s1 + $0x1b0] ss:$8 sps:$4 sm:$0xff]  }
  0x41   :  { %1297 = vmatprep.subr.bf16.mxu0 %v1901_v3  ;;  %v1971_v3 = vld [vmem:[%s2703_s1 + $0x3b0] ss:$8 sps:$4 sm:$0xff]  }
  0x42   :  { %1117 = vmatmul.mubr.bf16.vlgmr.msra.gmra.mrb[0].mxu1 %v1890_v4  ;;  %v1981_v4 = vld [vmem:[%s2703_s1 + $0x1c4] ss:$8 sps:$4 sm:$0xff]  }
  0x43   :  { %1259 = vmatmul.mubr.bf16.vlgmr.msra.gmra.mrb[0].mxu0 %v1896_v6  ;;  %1156 = vmatpush1.bf16.msra.mxu1 %v1893_v5  ;;  %v1985_v5 = vld [vmem:[%s2703_s1 + $0x3c4] ss:$8 sps:$4 sm:$0xff]   ;;  %v1979_v6 = vld [vmem:[%s2703_s1 + $0x1c0] ss:$8 sps:$4 sm:$0xff]  }
  0x44   :  { %1298 = vmatpush1.bf16.msra.mxu0 %v1899_v7  ;;  %1157 = vmatprep.subr.bf16.mxu1 %v1904_v8  ;;  %v1983_v7 = vld [vmem:[%s2703_s1 + $0x3c0] ss:$8 sps:$4 sm:$0xff]   ;;  %v1988_v8 = vld [vmem:[%s2703_s1 + $0x1d4] ss:$8 sps:$4 sm:$0xff]  }
  0x45   :  { %1299 = vmatprep.subr.bf16.mxu0 %v1907_v9  ;;  %1126 = vmatprep.mubr.bf16.mxu1 %v1956_v18  ;;  %v1991_v9 = vld [vmem:[%s2703_s1 + $0x3d4] ss:$8 sps:$4 sm:$0xff]   ;;  %v2002_v18 = vld [vmem:[%s2703_s1 + $0x1f0] ss:$8 sps:$4 sm:$0xff]  }
  0x46   :  { %1268 = vmatprep.mubr.bf16.mxu0 %v1958_v19  ;;  %v2005_v19 = vld [vmem:[%s2703_s1 + $0x3f0] ss:$8 sps:$4 sm:$0xff]  }
  0x47   :  { %1158 = vmatpush1.bf16.msra.mxu1 %v1902_v10  ;;  %v1986_v10 = vld [vmem:[%s2703_s1 + $0x1d0] ss:$8 sps:$4 sm:$0xff]  }
  0x48   :  { %1300 = vmatpush1.bf16.msra.mxu0 %v1905_v11  ;;  %1159 = vmatprep.subr.bf16.mxu1 %v1910_v12  ;;  %v1989_v11 = vld [vmem:[%s2703_s1 + $0x3d0] ss:$8 sps:$4 sm:$0xff]   ;;  %v1997_v12 = vld [vmem:[%s2703_s1 + $0x1e4] ss:$8 sps:$4 sm:$0xff]  }
  0x49   :  { %1301 = vmatprep.subr.bf16.mxu0 %v1913_v13  ;;  %v2001_v13 = vld [vmem:[%s2703_s1 + $0x3e4] ss:$8 sps:$4 sm:$0xff]  }
  0x4a   :  { %1127 = vmatmul.mubr.bf16.gmra.mrb[4].mxu1 %v1960_v20  ;;  %v2016_v20 = vld [vmem:[%s2703_s1 + $0x404] ss:$8 sps:$4 sm:$0xff]  }
  0x4b   :  { %1160 = vmatpush1.bf16.msra.mxu1 %v1908_v14  ;;  %1269 = vmatmul.mubr.bf16.gmra.mrb[4].mxu0 %v1964_v23  ;;  %v1995_v14 = vld [vmem:[%s2703_s1 + $0x1e0] ss:$8 sps:$4 sm:$0xff]  }
  0x4c   :  { %1302 = vmatpush1.bf16.msra.mxu0 %v1911_v15  ;;  %1161 = vmatprep.subr.bf16.mxu1 %v1916_v16  ;;  %v1999_v15 = vld [vmem:[%s2703_s1 + $0x3e0] ss:$8 sps:$4 sm:$0xff]   ;;  %v2004_v16 = vld [vmem:[%s2703_s1 + $0x1f4] ss:$8 sps:$4 sm:$0xff]  }
  0x4d   :  { %1303 = vmatprep.subr.bf16.mxu0 %v1919_v17  ;;  %1136 = vmatprep.mubr.bf16.mxu1 %v1974_v30  ;;  %v2007_v17 = vld [vmem:[%s2703_s1 + $0x3f4] ss:$8 sps:$4 sm:$0xff]   ;;  %v2014_v23 = vld [vmem:[%s2703_s1 + $0x400] ss:$8 sps:$4 sm:$0xff]  }
  0x4e   :  { %1278 = vmatprep.mubr.bf16.mxu0 %v1976_v31  ;;  %v2025_v30 = vld [vmem:[%s2704_s0 + $0x60] ss:$36 sps:$4 sm:$0xff]  }
  0x4f   :  { %1162 = vmatpush1.bf16.msra.mxu1 %v1914_v21  ;;  %v2008_v21 = vld [vmem:[%s2704_s0 + $0x8] ss:$36 sps:$4 sm:$0xff]  }
  0x50   :  { %1304 = vmatpush1.bf16.msra.mxu0 %v1917_v22  ;;  %1163 = vmatprep.subr.bf16.mxu1 %v1922_v24  ;;  %v2011_v22 = vld [vmem:[%s2704_s0 + $0x18] ss:$36 sps:$4 sm:$0xff]   ;;  %v2026_v31 = vld [vmem:[%s2703_s1 + $0x420] ss:$8 sps:$4 sm:$0xff]  }
  0x51   :  { %1305 = vmatprep.subr.bf16.mxu0 %v1925_v25  ;;  %v2019_v24 = vld [vmem:[%s2703_s1 + $0x414] ss:$8 sps:$4 sm:$0xff]  }
  0x52   :  { %1137 = vmatmul.mubr.bf16.gmra.mrb[8].mxu1 %v1978_v32  ;;  %v2020_v25 = vld [vmem:[%s2704_s0 + $0x54] ss:$36 sps:$4 sm:$0xff]  }
  0x53   :  { %1164 = vmatpush1.bf16.msra.mxu1 %v1920_v26  ;;  %1279 = vmatmul.mubr.bf16.gmra.mrb[8].mxu0 %v1982_v35  ;;  %v2022_v26 = vld [vmem:[%s2704_s0 + $0x64] ss:$36 sps:$4 sm:$0xff]   ;;  %v2031_v32 = vld [vmem:[%s2703_s1 + $0x434] ss:$8 sps:$4 sm:$0xff]   ;;  %v2029_v35 = vld [vmem:[%s2703_s1 + $0x430] ss:$8 sps:$4 sm:$0xff]  }
  0x54   :  { %1306 = vmatpush1.bf16.msra.mxu0 %v1923_v27  ;;  %1165 = vmatprep.subr.bf16.mxu1 %v1928_v28  ;;  %v2017_v27 = vld [vmem:[%s2703_s1 + $0x410] ss:$8 sps:$4 sm:$0xff]   ;;  %v2028_v28 = vld [vmem:[%s2703_s1 + $0x424] ss:$8 sps:$4 sm:$0xff]  }
  0x55   :  { %1307 = vmatprep.subr.bf16.mxu0 %v1931_v29  ;;  %1146 = vmatprep.mubr.bf16.mxu1 %v1565_v44  ;;  %v2024_v29 = vld [vmem:[%s2704_s0 + $0x50] ss:$36 sps:$4 sm:$0xff]   ;;  %v1571_v44 = vcombine.high %v48_v40, %v48_v40 }
  0x56   :  { %1288 = vmatprep.mubr.bf16.mxu0 %v1569_v45  ;;  %v2041_v45 = vld [vmem:[%s2703_s1 + $0x450] ss:$8 sps:$4 sm:$0xff]  }
  0x57   :  { %1166 = vmatpush1.bf16.msra.mxu1 %v1926_v33  ;;  %v2032_v33 = vld [vmem:[%s2704_s0 + $0x9c] ss:$36 sps:$4 sm:$0xff]  }
  0x58   :  { %1308 = vmatpush1.bf16.msra.mxu0 %v1929_v34  ;;  %1167 = vmatprep.subr.bf16.mxu1 %v1934_v36  ;;  %v2034_v34 = vld [vmem:[%s2704_s0 + $0xac] ss:$36 sps:$4 sm:$0xff]  }
  0x59   :  { %1309 = vmatprep.subr.bf16.mxu0 %v1937_v37  ;;  %v2040_v36 = vld [vmem:[%s2703_s1 + $0x444] ss:$8 sps:$4 sm:$0xff]   ;;  %v2036_v37 = vld [vmem:[%s2704_s0 + $0x98] ss:$36 sps:$4 sm:$0xff]  }
  0x5a   :  { %1147 = vmatmul.mubr.bf16.gmra.mrb[12].mxu1 %v1564_v46  ;;  %v2050_v46 = vld [vmem:[%s2703_s1 + $0x464] ss:$8 sps:$4 sm:$0xff]  }
  0x5b   :  { %1168 = vmatpush1.bf16.msra.mxu1 %v1932_v38  ;;  %1289 = vmatmul.mubr.bf16.gmra.mrb[12].mxu0 %v1568_v47  ;;  %v2037_v38 = vld [vmem:[%s2704_s0 + $0xa8] ss:$36 sps:$4 sm:$0xff]  }
  0x5c   :  { %1310 = vmatpush1.bf16.msra.mxu0 %v1935_v39  ;;  %1169 = vmatprep.subr.bf16.mxu1 %v1940_v42  ;;  %v46_v39 = vld [vmem:[%s2704_s0 + $0xe0] sm:$0x11]  ;;  %v2043_v42 = vld [vmem:[%s2703_s1 + $0x454] ss:$8 sps:$4 sm:$0xff]  }
  0x5d   :  { %1311 = vmatprep.subr.bf16.mxu0 %v1943_v43  ;;  %1187 = vmatprep.mubr.bf16.mxu1 %v2010_v53  ;;  %v1567_v43 = vcombine.high %v46_v39, %v46_v39  ;;  %v1566_v47 = vcombine.low %v46_v39, %v46_v39  ;;  %v2054_v53 = vld [vmem:[%s2704_s0 + $0x20] ss:$36 sps:$4 sm:$0xff]  }
  0x5e   :  { %1329 = vmatprep.mubr.bf16.mxu0 %v2013_v55  ;;  %v2056_v55 = vld [vmem:[%s2704_s0 + $0x68] ss:$36 sps:$4 sm:$0xff]  }
  0x5f   :  { %1170 = vmatpush1.bf16.msra.mxu1 %v1938_v48  ;;  %v1570_v48 = vcombine.low %v48_v40, %v48_v40 }
  0x60   :  { %1312 = vmatpush1.bf16.msra.mxu0 %v1941_v49  ;;  %1171 = vmatprep.subr.bf16.mxu1 %v1946_v50  ;;  %v2048_v49 = vld [vmem:[%s2703_s1 + $0x460] ss:$8 sps:$4 sm:$0xff]   ;;  %v2053_v50 = vld [vmem:[%s2703_s1 + $0x474] ss:$8 sps:$4 sm:$0xff]  }
  0x61   :  { %1313 = vmatprep.subr.bf16.mxu0 %v1949_v51  ;;  %v2051_v51 = vld [vmem:[%s2703_s1 + $0x470] ss:$8 sps:$4 sm:$0xff]  }
  0x63   :  { %1172 = vmatpush1.bf16.msra.mxu1 %v1944_v52  ;;  %v2058_v52 = vmov 0  }
  0x64   :  { %1314 = vmatpush1.bf16.msra.mxu0 %v1947_v54  ;;  %1173 = vmatprep.subr.bf16.mxu1 %v1952_v56  ;;  %v2055_v54 = vld [vmem:[%s2704_s0 + $0xb0] ss:$36 sps:$4 sm:$0xff]   ;;  %v2057_v56 = vld [vmem:[%s2704_s0 + $0xf8] ss:$0 sps:$4 sm:$0x11]  }
  0x65   :  { %1315 = vmatprep.subr.bf16.mxu0 %v1955_v57 }
  0x67   :  { %1174 = vmatpush1.bf16.msra.mxu1 %v1950_v58 }
  0x68   :  { %1316 = vmatpush1.bf16.msra.mxu0 %v1953_v59  ;;  %1175 = vmatprep.subr.bf16.mxu1 %v1963_v60 }
  0x69   :  { %1317 = vmatprep.subr.bf16.mxu0 %v1967_v61 }
  0x6b   :  { %1176 = vmatpush1.bf16.msra.mxu1 %v1961_v62 }
  0x6c   :  { %1318 = vmatpush1.bf16.msra.mxu0 %v1965_v63  ;;  %1177 = vmatprep.subr.bf16.mxu1 %v1970_v0 }
  0x6d   :  { %1319 = vmatprep.subr.bf16.mxu0 %v1973_v1  ;;  %v1441_v1 = vlaneseq }
  0x6f   :  { %1178 = vmatpush1.bf16.msra.mxu1 %v1968_v2 }
  0x70   :  { %1320 = vmatpush1.bf16.msra.mxu0 %v1971_v3  ;;  %1179 = vmatprep.subr.bf16.mxu1 %v1981_v4 }
  0x71   :  { %1321 = vmatprep.subr.bf16.mxu0 %v1985_v5 }
  0x73   :  { %1180 = vmatpush1.bf16.msra.mxu1 %v1979_v6 }
  0x74   :  { %1322 = vmatpush1.bf16.msra.mxu0 %v1983_v7  ;;  %1181 = vmatprep.subr.bf16.mxu1 %v1988_v8 }
  0x75   :  { %1323 = vmatprep.subr.bf16.mxu0 %v1991_v9 }
  0x77   :  { %1182 = vmatpush1.bf16.msra.mxu1 %v1986_v10 }
  0x78   :  { %1324 = vmatpush1.bf16.msra.mxu0 %v1989_v11  ;;  %1183 = vmatprep.subr.bf16.mxu1 %v1997_v12 }
  0x79   :  { %1325 = vmatprep.subr.bf16.mxu0 %v2001_v13  ;;  %v1442_v13 = vshrl.u32 %v1441_v1, 7 }
  0x7b   :  { %1184 = vmatpush1.bf16.msra.mxu1 %v1995_v14 }
  0x7c   :  { %1326 = vmatpush1.bf16.msra.mxu0 %v1999_v15  ;;  %1185 = vmatprep.subr.bf16.mxu1 %v2004_v16  ;;  %v1443_v15 = vsub.s32 0, %v1442_v13 }
  0x7d   :  { %1327 = vmatprep.subr.bf16.mxu0 %v2007_v17 }
  0x7f   :  { %1186 = vmatpush1.bf16.msra.mxu1 %v2002_v18  ;;  %v1439_v18 = vld [vmem:[%s2705_s2] sm:$0xf] }
  0x80   :  { %1328 = vmatpush1.bf16.msra.mxu0 %v2005_v19  ;;  %1717 = vmatprep.subr.bf16.mxu1 %v2016_v20  ;;  %v1447_v19 = vsub.s32 2, %v1442_v13 }
  0x81   :  { %1368 = vmatprep.subr.bf16.mxu0 %v2016_v20 }
  0x82   :  { %1188 = vmatmul.mubr.bf16.vlgmr.msra.gmra.mrb[0].mxu1 %v2008_v21 }
  0x83   :  { %1330 = vmatmul.mubr.bf16.vlgmr.msra.gmra.mrb[0].mxu0 %v2011_v22  ;;  %1725 = vmatpush1.bf16.msra.mxu1 %v2014_v23 }
  0x84   :  { %1369 = vmatpush1.bf16.msra.mxu0 %v2014_v23  ;;  %1718 = vmatprep.subr.bf16.mxu1 %v2019_v24  ;;  %v1475_v23 = vsub.s32 1, %v1442_v13 }
  0x85   :  { %1370 = vmatprep.subr.bf16.mxu0 %v2019_v24  ;;  %1197 = vmatprep.mubr.bf16.mxu1 %v2020_v25 }
  0x86   :  { %1339 = vmatprep.mubr.bf16.mxu0 %v2022_v26 }
  0x87   :  { %1726 = vmatpush1.bf16.msra.mxu1 %v2017_v27 }
  0x88   :  { %1371 = vmatpush1.bf16.msra.mxu0 %v2017_v27  ;;  %1719 = vmatprep.subr.bf16.mxu1 %v2028_v28  ;;  %v1479_v27 = vsub.s32 3, %v1442_v13 }
  0x89   :  { %1372 = vmatprep.subr.bf16.mxu0 %v2028_v28 }
  0x8a   :  { %1198 = vmatmul.mubr.bf16.gmra.mrb[4].mxu1 %v2024_v29 }
  0x8b   :  { %1340 = vmatmul.mubr.bf16.gmra.mrb[4].mxu0 %v2025_v30  ;;  %1727 = vmatpush1.bf16.msra.mxu1 %v2026_v31  ;;  %v1444_v30 = vrot.slane %v1439_v18, %v1443_v15 }
  0x8c   :  { %1373 = vmatpush1.bf16.msra.mxu0 %v2026_v31  ;;  %1720 = vmatprep.subr.bf16.mxu1 %v2031_v32  ;;  %v1448_v31 = vrot.slane %v1439_v18, %v1447_v19 }
  0x8d   :  { %1374 = vmatprep.subr.bf16.mxu0 %v2031_v32  ;;  %1207 = vmatprep.mubr.bf16.mxu1 %v2032_v33  ;;  %v1476_v32 = vrot.slane %v1439_v18, %v1475_v23  ;;  %v1480_v33 = vrot.slane %v1439_v18, %v1479_v27 }
  0x8e   :  { %1349 = vmatprep.mubr.bf16.mxu0 %v2034_v34  ;;  %v2620_v34 = vrot.slane %v1444_v30, %v1443_v15 }
  0x8f   :  { %1728 = vmatpush1.bf16.msra.mxu1 %v2029_v35  ;;  %v2624_v39 = vrot.slane %v1476_v32, %v1475_v23 }
  0x90   :  { %1375 = vmatpush1.bf16.msra.mxu0 %v2029_v35  ;;  %1721 = vmatprep.subr.bf16.mxu1 %v2040_v36 }
  0x91   :  { %1376 = vmatprep.subr.bf16.mxu0 %v2040_v36 }
  0x92   :  { %1208 = vmatmul.mubr.bf16.gmra.mrb[8].mxu1 %v2036_v37  ;;  %v2622_v37 = vrot.slane %v1448_v31, %v1443_v15 }
  0x93   :  { %1350 = vmatmul.mubr.bf16.gmra.mrb[8].mxu0 %v2037_v38  ;;  %1729 = vmatpush1.bf16.msra.mxu1 %v2038_v41 }
  0x94   :  { %1377 = vmatpush1.bf16.msra.mxu0 %v2038_v41  ;;  %1722 = vmatprep.subr.bf16.mxu1 %v2043_v42 }
  0x95   :  { %1378 = vmatprep.subr.bf16.mxu0 %v2043_v42  ;;  %1217 = vmatprep.mubr.bf16.mxu1 %v1567_v43 }
  0x96   :  { %1359 = vmatprep.mubr.bf16.mxu0 %v1571_v44  ;;  %v2626_v44 = vrot.slane %v1480_v33, %v1475_v23 }
  0x97   :  { %1730 = vmatpush1.bf16.msra.mxu1 %v2041_v45 }
  0x98   :  { %1379 = vmatpush1.bf16.msra.mxu0 %v2041_v45  ;;  %1723 = vmatprep.subr.bf16.mxu1 %v2050_v46 }
  0x99   :  { %1380 = vmatprep.subr.bf16.mxu0 %v2050_v46 }
  0x9a   :  { %1218 = vmatmul.mubr.bf16.gmra.mrb[12].mxu1 %v1566_v47 }
  0x9b   :  { %1360 = vmatmul.mubr.bf16.gmra.mrb[12].mxu0 %v1570_v48  ;;  %1731 = vmatpush1.bf16.msra.mxu1 %v2048_v49 }
  0x9c   :  { %1381 = vmatpush1.bf16.msra.mxu0 %v2048_v49  ;;  %1724 = vmatprep.subr.bf16.mxu1 %v2053_v50 }
  0x9d   :  { %1382 = vmatprep.subr.bf16.mxu0 %v2053_v50  ;;  %1400 = vmatprep.mubr.bf16.mxu0 %v2058_v52 }
  0x9e   :  { %1420 = vmatprep.mubr.bf16.mxu1 %v2058_v52 }
  0x9f   :  { %1732 = vmatpush1.bf16.msra.mxu1 %v2051_v51 }
  0xa0   :  { %1383 = vmatpush1.bf16.msra.mxu0 %v2051_v51 }
  0xa2   :  { %1421 = vmatmul.mubr.bf16.vlgmr.msra.gmra.mrb[16].mxu1 %v2055_v54 }
  0xa3   :  { %1401 = vmatmul.mubr.bf16.vlgmr.msra.gmra.mrb[0].mxu0 %v2054_v53  ;;  %1430 = vmatprep.mubr.bf16.mxu1 %v2058_v52 }
  0xa4   :  { %1410 = vmatprep.mubr.bf16.mxu0 %v2058_v52 }
  0xaa   :  { %1431 = vmatmul.mubr.bf16.gmra.mrb[20].mxu1 %v2057_v56 }
  0xab   :  { %1411 = vmatmul.mubr.bf16.gmra.mrb[4].mxu0 %v2056_v55 }
 0x155   :  { %v1189_v57 = vpop.f32.mrb[0].mxu1 }
 0x156   :  { %v1191_v58 = vpop.f32.mrb[1].mxu1 }
 0x157   :  { %v1193_v59 = vpop.f32.mrb[2].mxu1 }
 0x158   :  { %v1195_v60 = vpop.f32.mrb[3].mxu1 }
 0x15d   :  { %v2607_v61 = vpop.f32.mrb[4].mxu1 }
 0x15e   :  { %v2609_v62 = vpop.f32.mrb[5].mxu1 }
 0x15f   :  { %v2611_v63 = vpop.f32.mrb[6].mxu1 }
 0x160   :  { %v2613_v0 = vpop.f32.mrb[7].mxu1 }
 0x165   :  { %v1209_v2 = vpop.f32.mrb[8].mxu1 }
 0x166   :  { %v1351_v3 = vpop.f32.mrb[8].mxu0  ;;  %v1211_v5 = vpop.f32.mrb[9].mxu1 }
 0x167   :  { %v1741_v4 = vadd.f32 %v1351_v3, %v1209_v2  ;;  %v1353_v6 = vpop.f32.mrb[9].mxu0  ;;  %v1213_v8 = vpop.f32.mrb[10].mxu1 }
 0x168   :  { %v1743_v7 = vadd.f32 %v1353_v6, %v1211_v5  ;;  %v1355_v9 = vpop.f32.mrb[10].mxu0  ;;  %v1215_v11 = vpop.f32.mrb[11].mxu1 }
 0x169   :  { %v1745_v10 = vadd.f32 %v1355_v9, %v1213_v8  ;;  %v1357_v12 = vpop.f32.mrb[11].mxu0 }
 0x16a   :  { %v1747_v14 = vadd.f32 %v1357_v12, %v1215_v11 }
 0x16d   :  { %v1219_v16 = vpop.f32.mrb[12].mxu1 }
 0x16e   :  { %v1361_v17 = vpop.f32.mrb[12].mxu0  ;;  %v1221_v21 = vpop.f32.mrb[13].mxu1 }
 0x16f   :  { %v1749_v20 = vadd.f32 %v1361_v17, %v1219_v16  ;;  %v1363_v22 = vpop.f32.mrb[13].mxu0  ;;  %v1223_v25 = vpop.f32.mrb[14].mxu1 }
 0x170   :  { %v2618_v24 = vadd.f32 %v1363_v22, %v1221_v21  ;;  %v1365_v26 = vpop.f32.mrb[14].mxu0  ;;  %v1224_v28 = vpop.f32.mrb[15].mxu1 }
 0x171   :  { %v1366_v29 = vpop.f32.mrb[15].mxu0 }
 0x175   :  { %v1422_v36 = vpop.f32.mrb[16].mxu1 }
 0x176   :  { %v1402_v35 = vpop.f32.mrb[0].mxu0  ;;  %v1742_v40 = vadd.f32 %v1741_v4, %v1422_v36  ;;  %v1424_v42 = vpop.f32.mrb[17].mxu1 }
 0x177   :  { %v1733_v38 = vadd.f32 %v1402_v35, %v1189_v57  ;;  %v1404_v41 = vpop.f32.mrb[1].mxu0  ;;  %v1744_v45 = vadd.f32 %v1743_v7, %v1424_v42  ;;  %v1426_v47 = vpop.f32.mrb[18].mxu1 }
 0x178   :  { %v1734_v43 = vadd.f32 %v1404_v41, %v1191_v58  ;;  %v1406_v46 = vpop.f32.mrb[2].mxu0  ;;  %v1467_v49 = vmul.f32 %v1742_v40, %v2620_v34  ;;  %v1746_v51 = vadd.f32 %v1745_v10, %v1426_v47  ;;  %v1428_v53 = vpop.f32.mrb[19].mxu1 }
 0x179   :  { %v1459_v48 = vmul.f32 %v1733_v38, %v2620_v34  ;;  %v1735_v50 = vadd.f32 %v1406_v46, %v1193_v59  ;;  %v1408_v52 = vpop.f32.mrb[3].mxu0  ;;  %v1468_v55 = vmul.f32 %v1744_v45, %v2622_v37  ;;  %v1748_v57 = vadd.f32 %v1747_v14, %v1428_v53 }
 0x17a   :  { %v1460_v54 = vmul.f32 %v1734_v43, %v2622_v37  ;;  %v1736_v56 = vadd.f32 %v1408_v52, %v1195_v60  ;;  %v1499_v1 = vadd.f32 %v2624_v39, %v1467_v49  ;;  %v1469_v3 = vmul.f32 %v1746_v51, %v2620_v34 }
 0x17b   :  { %v1491_v58 = vadd.f32 %v2624_v39, %v1459_v48  ;;  %v1461_v2 = vmul.f32 %v1735_v50, %v2620_v34  ;;  %v1500_v59 = vadd.f32 %v2626_v44, %v1468_v55  ;;  %v1470_v6 = vmul.f32 %v1748_v57, %v2622_v37 }
 0x17c   :  { %v1492_v4 = vadd.f32 %v2626_v44, %v1460_v54  ;;  %v1462_v5 = vmul.f32 %v1736_v56, %v2622_v37  ;;  %v1513_v8 = vmax.f32 %v1499_v1, 0.0  ;;  %v1501_v9 = vadd.f32 %v2624_v39, %v1469_v3 }
 0x17d   :  { %v1505_v7 = vmax.f32 %v1491_v58, 0.0  ;;  %v1493_v60 = vadd.f32 %v2624_v39, %v1461_v2  ;;  %v1514_v11 = vmax.f32 %v1500_v59, 0.0  ;;  %v1502_v13 = vadd.f32 %v2626_v44, %v1470_v6  ;;  %v1432_v15 = vpop.f32.mrb[20].mxu1 }
 0x17e   :  { %v1506_v10 = vmax.f32 %v1492_v4, 0.0  ;;  %v1494_v12 = vadd.f32 %v2626_v44, %v1462_v5  ;;  %v1412_v14 = vpop.f32.mrb[4].mxu0  ;;  %1527 = vst [vmem:[%s2706_s3 + $0x40] sm:$0xff] %v1513_v8  ;;  %v1515_v17 = vmax.f32 %v1501_v9, 0.0  ;;  %v1750_v19 = vadd.f32 %v1749_v20, %v1432_v15  ;;  %v1434_v22 = vpop.f32.mrb[21].mxu1 }
 0x17f   :  { %1519 = vst [vmem:[%s2706_s3] sm:$0xff] %v1505_v7  ;;  %v1507_v16 = vmax.f32 %v1493_v60, 0.0  ;;  %v1737_v18 = vadd.f32 %v1412_v14, %v2607_v61  ;;  %v1414_v21 = vpop.f32.mrb[5].mxu0  ;;  %1528 = vst [vmem:[%s2706_s3 + $0x48] sm:$0xff] %v1514_v11  ;;  %v1516_v25 = vmax.f32 %v1502_v13, 0.0  ;;  %v1752_v27 = vadd.f32 %v2618_v24, %v1434_v22  ;;  %v1436_v29 = vpop.f32.mrb[22].mxu1 }
 0x180   :  { %1520 = vst [vmem:[%s2706_s3 + $0x8] sm:$0xff] %v1506_v10  ;;  %v1508_v23 = vmax.f32 %v1494_v12, 0.0  ;;  %v1738_v26 = vadd.f32 %v1414_v21, %v2609_v62  ;;  %v1416_v28 = vpop.f32.mrb[6].mxu0  ;;  %1529 = vst [vmem:[%s2706_s3 + $0x50] sm:$0xff] %v1515_v17  ;;  %v1471_v20 = vmul.f32 %v1750_v19, %v2620_v34  ;;  %v1437_v62 = vpop.f32.mrb[23].mxu1 }
 0x181   :  { %1521 = vst [vmem:[%s2706_s3 + $0x10] sm:$0xff] %v1507_v16  ;;  %v1463_v61 = vmul.f32 %v1737_v18, %v2620_v34  ;;  %v1739_v30 = vadd.f32 %v1416_v28, %v2611_v63  ;;  %v1418_v31 = vpop.f32.mrb[7].mxu0  ;;  %1530 = vst [vmem:[%s2706_s3 + $0x58] sm:$0xff] %v1516_v25  ;;  %v1472_v32 = vmul.f32 %v1752_v27, %v2622_v37 }
 0x182   :  { %1522 = vst [vmem:[%s2706_s3 + $0x18] sm:$0xff] %v1508_v23  ;;  %v1464_v24 = vmul.f32 %v1738_v26, %v2622_v37  ;;  %v1740_v33 = vadd.f32 %v1418_v31, %v2613_v0  ;;  %v1503_v63 = vadd.f32 %v2624_v39, %v1471_v20 }
 0x183   :  { %v1495_v35 = vadd.f32 %v2624_v39, %v1463_v61  ;;  %v1465_v36 = vmul.f32 %v1739_v30, %v2620_v34  ;;  %v1504_v40 = vadd.f32 %v2626_v44, %v1472_v32 }
 0x184   :  { %v1496_v38 = vadd.f32 %v2626_v44, %v1464_v24  ;;  %v1466_v41 = vmul.f32 %v1740_v33, %v2622_v37  ;;  %v1517_v43 = vmax.f32 %v1503_v63, 0.0 }
 0x185   :  { %v1509_v42 = vmax.f32 %v1495_v35, 0.0  ;;  %v1497_v45 = vadd.f32 %v2624_v39, %v1465_v36  ;;  %v1518_v47 = vmax.f32 %v1504_v40, 0.0 }
 0x186   :  { %v1510_v46 = vmax.f32 %v1496_v38, 0.0  ;;  %v1498_v0 = vadd.f32 %v2626_v44, %v1466_v41  ;;  %1531 = vst [vmem:[%s2706_s3 + $0x60] sm:$0x3] %v1517_v43 }
 0x187   :  { %1523 = vst [vmem:[%s2706_s3 + $0x20] sm:$0xff] %v1509_v42  ;;  %v1511_v34 = vmax.f32 %v1497_v45, 0.0  ;;  %1532 = vst [vmem:[%s2706_s3 + $0x68] sm:$0x3] %v1518_v47 }
 0x188   :  { %1524 = vst [vmem:[%s2706_s3 + $0x28] sm:$0xff] %v1510_v46  ;;  %v1512_v37 = vmax.f32 %v1498_v0, 0.0 }
 0x189   :  { %1525 = vst [vmem:[%s2706_s3 + $0x30] sm:$0xff] %v1511_v34 }
 0x18a   :  { %1526 = vst [vmem:[%s2706_s3 + $0x38] sm:$0xff] %v1512_v37 }

</bundles_post_ra>
